<compile_context>
chip_gen: v7x
topology: tpu7x:2x2x1
jax: 0.10.0
libtpu: 0.0.40
codegen_flags: <defaults>
</compile_context>

<pallas_src>
import functools

import jax
import jax.numpy as jnp
from jax.experimental import pallas as pl
from jax.experimental.pallas import tpu as pltpu

_EPS = 1e-5  # nn.LayerNorm default eps


def _round_up(x, m):
    return ((x + m - 1) // m) * m


def _detect_tpu():
    """Best-effort (tensorcores_per_chip, vmem_bytes_per_core)."""
    n_tc, vmem = 1, 64 * 1024 * 1024  # conservative defaults (v7x VMEM)
    try:
        info = pltpu.get_tpu_info()
        v = getattr(info, "vmem_capacity_bytes", None)
        if v:
            vmem = int(v)
        for name in ("num_tensorcores", "tensorcore_count", "num_cores",
                     "core_count"):
            c = getattr(info, name, None)
            if isinstance(c, int) and 0 < c <= 4:
                n_tc = c
                break
    except Exception:
        pass
    if n_tc == 1:
        try:
            kind = jax.devices()[0].device_kind.lower().replace(" ", "")
            if "v7" in kind or "7x" in kind:
                n_tc = 2  # v7x: 2 TensorCores / chip
        except Exception:
            pass
    return n_tc, vmem


def _auto_block_b(B, n_tc, max_rows):
    """Batch tile. Single block on 1-TC chips (grid is a serial loop there);
    even, 128-aligned split on multi-TC chips (v7x). VMEM-capped."""
    B8 = _round_up(max(B, 8), 8)
    if n_tc <= 1 and B8 <= max_rows:
        return B8                                   # one block, one grid step
    steps = 2 if n_tc > 1 else 1
    steps = max(steps, -(-B8 // max(max_rows, 128)))  # respect the VMEM cap
    if n_tc > 1 and steps % 2:
        steps += 1                                  # keep both TCs busy
    blk = _round_up(-(-B8 // steps), 128)           # 128: legal lane-dense out
    if blk >= B8:
        return B8                                   # too small to split
    return blk


def _param_spec(shape, single_buffer):
    """Constant index_map -> parameter stays VMEM-resident across grid steps.
    Optionally request single buffering (halves resident param VMEM)."""
    idx = lambda i: (0,) * len(shape)
    if single_buffer:
        try:
            return pl.BlockSpec(shape, idx, pipeline_mode=pl.Buffered(1))
        except Exception:
            pass
    return pl.BlockSpec(shape, idx)


def _size_predict_kernel(n_layers, reduce_out, x_ref, *refs):
    # refs: w_0 .. w_{L-1}, ln_slab, w_out, b_out, o_ref
    o_ref = refs[-1]
    wo_ref, bo_ref = refs[-3], refs[-2]
    slab_ref = refs[-4]           # (3*L, n_features) f32: [b, gamma, beta]*L
    w_refs = refs[:n_layers]

    h = x_ref[...]                # bf16 (block_b, in_features)
    for l in range(n_layers):
        w_ref = w_refs[l]
        # MXU: bf16 x bf16 -> f32 accumulation.
        y = jnp.dot(h.astype(w_ref.dtype), w_ref[...],
                    preferred_element_type=jnp.float32)
        y = y + slab_ref[3 * l: 3 * l + 1, :]
        # Single-pass LayerNorm statistics in f32 (clamped var for safety).
        mu = jnp.mean(y, axis=-1, keepdims=True)
        var = jnp.maximum(jnp.mean(y * y, axis=-1, keepdims=True) - mu * mu, 0.0)
        y = (y - mu) * jax.lax.rsqrt(var + _EPS)
        y = y * slab_ref[3 * l + 1: 3 * l + 2, :] + slab_ref[3 * l + 2: 3 * l + 3, :]
        h = jnp.maximum(y, 0.0)   # ReLU; Dropout == identity at inference

    if reduce_out:
        # target_size == 1: contract the feature axis of both operands
        # (flash-attn style 'nt' matmul) -> (1, block_b) directly, so the
        # store is a lane-dense, unmasked row write.
        out = jnp.einsum("tf,bf->tb", wo_ref[...], h.astype(jnp.float32),
                         preferred_element_type=jnp.float32) + bo_ref[...]
        o_ref[...] = out.astype(o_ref.dtype)
    else:
        out = jnp.dot(h.astype(jnp.float32), wo_ref[...],
                      preferred_element_type=jnp.float32) + bo_ref[...]
        o_ref[...] = out.astype(o_ref.dtype)


def size_predict_forward(x, params, *, block_b=None, matmul_dtype=jnp.bfloat16):
    """x: (B, input_size) float32.  params: dict of f32 weights (see init)."""
    B, in_features = x.shape
    n_layers = len(params["layers"])
    n_features = params["layers"][0][0].shape[1]
    target_size = params["w_out"].shape[1]
    reduce_out = (target_size == 1)

    # ---- parameters (all VMEM-resident across grid steps) ----
    flat_params = [w.astype(matmul_dtype) for (w, _, _, _) in params["layers"]]
    ln_slab = jnp.concatenate(
        [jnp.concatenate([b.reshape(1, -1), g.reshape(1, -1), bt.reshape(1, -1)],
                         axis=0)
         for (_, b, g, bt) in params["layers"]],
        axis=0).astype(jnp.float32)                        # (3L, n_features)
    flat_params.append(ln_slab)

    if reduce_out:
        t_pad = 1
        w_out = params["w_out"].T.astype(jnp.float32)      # (1, n_features)
        b_out = params["b_out"].astype(jnp.float32)        # (1, 1)
    else:
        t_pad = _round_up(target_size, 128)                # lane-dense output
        w_out = params["w_out"].astype(jnp.float32)
        b_out = params["b_out"].astype(jnp.float32)
        if t_pad != target_size:
            w_out = jnp.pad(w_out, ((0, 0), (0, t_pad - target_size)))
            b_out = jnp.pad(b_out, ((0, 0), (0, t_pad - target_size)))
    flat_params += [w_out, b_out]

    # ---- generation-aware batch tiling + VMEM budget ----
    n_tc, vmem_cap = _detect_tpu()
    param_bytes = 2 * sum(int(p.size) * p.dtype.itemsize for p in flat_params)
    act_cols = max(n_features, in_features, t_pad)
    out_row_bytes = 4 if reduce_out else t_pad * 4
    bytes_per_row = (2 * in_features * 2        # x block (bf16, double-buffered)
                     + 2 * out_row_bytes        # output block (double-buffered)
                     + 8 * act_cols * 4)        # f32 activation temporaries
    budget = max(int(vmem_cap * 0.6) - param_bytes, 128 * bytes_per_row)
    max_rows = max(128, min(4096, budget // bytes_per_row // 8 * 8))
    if block_b is None:
        block_b = _auto_block_b(B, n_tc, max_rows)
    B_pad = _round_up(B, block_b)

    # ---- input: bf16, batch-padded only if needed, feature dim unpadded ----
    x_p = x.astype(matmul_dtype)
    if B_pad != B:
        x_p = jnp.pad(x_p, ((0, B_pad - B), (0, 0)))

    kernel = functools.partial(_size_predict_kernel, n_layers, reduce_out)
    grid = (B_pad // block_b,)
    x_spec = pl.BlockSpec((block_b, in_features), lambda i: (i, 0))
    if reduce_out:
        out_shape = jax.ShapeDtypeStruct((1, B_pad), x.dtype)
        out_spec = pl.BlockSpec((1, block_b), lambda i: (0, i))
    else:
        out_shape = jax.ShapeDtypeStruct((B_pad, t_pad), x.dtype)
        out_spec = pl.BlockSpec((block_b, t_pad), lambda i: (i, 0))

    # Advisory cost estimate so XLA schedules the custom call sensibly.
    flops, k = 0, in_features
    for _ in range(n_layers):
        flops += 2 * B_pad * k * n_features
        k = n_features
    flops += 2 * B_pad * n_features * max(target_size, 1)
    bytes_accessed = (int(x_p.size) * x_p.dtype.itemsize
                      + B_pad * out_row_bytes
                      + sum(int(p.size) * p.dtype.itemsize for p in flat_params))
    cost = pl.CostEstimate(flops=int(flops),
                           transcendentals=int(B_pad * n_layers),
                           bytes_accessed=int(bytes_accessed))

    footprint = param_bytes + block_b * bytes_per_row
    vmem_limit = int(min(vmem_cap * 0.9, max(32 << 20, footprint * 1.5)))
    compiler_params = pltpu.CompilerParams(
        dimension_semantics=("parallel",),   # megacore split on v7x; no-op on 1 TC
        vmem_limit_bytes=vmem_limit)

    def _call(single_buffer):
        in_specs = ([x_spec]
                    + [_param_spec(p.shape, single_buffer) for p in flat_params])
        return pl.pallas_call(
            kernel,
            out_shape=out_shape,
            grid_spec=pltpu.PrefetchScalarGridSpec(
                num_scalar_prefetch=0,
                grid=grid,
                in_specs=in_specs,
                out_specs=out_spec),
            compiler_params=compiler_params,
            cost_estimate=cost,
        )(x_p, *flat_params)

    try:
        out = _call(True)      # single-buffered constant-index params
    except Exception:
        out = _call(False)     # fallback if pipeline_mode=Buffered(1) unsupported

    if reduce_out:
        return out[0, :B].reshape(B, 1)
    return out[:B, :target_size]


def init_params(key, input_size, n_features, target_size, n_layers):
    """Deterministic init mimicking PyTorch defaults (U(-1/sqrt(fan_in), ..)).
    Linear weights are stored transposed: (in_features, out_features)."""
    params = {"layers": []}
    in_dim = input_size
    for _ in range(n_layers):
        key, kw, kb = jax.random.split(key, 3)
        bound = 1.0 / jnp.sqrt(in_dim)
        w = jax.random.uniform(kw, (in_dim, n_features), jnp.float32, -bound, bound)
        b = jax.random.uniform(kb, (1, n_features), jnp.float32, -bound, bound)
        gamma = jnp.ones((1, n_features), jnp.float32)
        beta = jnp.zeros((1, n_features), jnp.float32)
        params["layers"].append((w, b, gamma, beta))
        in_dim = n_features
    key, kw, kb = jax.random.split(key, 3)
    bound = 1.0 / jnp.sqrt(n_features)
    params["w_out"] = jax.random.uniform(
        kw, (n_features, target_size), jnp.float32, -bound, bound)
    params["b_out"] = jax.random.uniform(
        kb, (1, target_size), jnp.float32, -bound, bound)
    return params


def reference_forward(x, params, matmul_dtype=jnp.float32):
    """Pure-JAX reference (module semantics). matmul_dtype=bf16 reproduces the
    kernel's mixed-precision matmuls; f32 gives the original module numerics."""
    h = x.astype(jnp.float32)
    for (w, b, g, bt) in params["layers"]:
        y = jnp.dot(h.astype(matmul_dtype), w.astype(matmul_dtype),
                    preferred_element_type=jnp.float32) + b
        mu = jnp.mean(y, axis=-1, keepdims=True)
        var = jnp.mean((y - mu) ** 2, axis=-1, keepdims=True)
        y = (y - mu) * jax.lax.rsqrt(var + _EPS) * g + bt
        h = jnp.maximum(y, 0.0)
    return h @ params["w_out"] + params["b_out"]


if __name__ == "__main__":
    # (batch, input_size) -> (batch, target_size), module-consistent shapes.
    batch, input_size, n_features, target_size, n_layers = 256, 32, 128, 1, 2

    key = jax.random.PRNGKey(0)
    key, kx = jax.random.split(key)
    x = jax.random.normal(kx, (batch, input_size), jnp.float32)
    params = init_params(key, input_size, n_features, target_size, n_layers)

    out = size_predict_forward(x, params)   # block_b auto: 1 block (v5e/v6e), 2x128 (v7x)
    out = jax.block_until_ready(out)
    assert out.shape == (batch, target_size), out.shape

    # Check against a reference using the same bf16-operand / f32-accum matmuls.
    ref_mixed = reference_forward(x, params, matmul_dtype=jnp.bfloat16)
    assert jnp.allclose(out, ref_mixed, atol=2e-3, rtol=2e-3), (
        float(jnp.max(jnp.abs(out - ref_mixed))))

    # Loose check against the pure-f32 reference (original module numerics).
    ref_f32 = reference_forward(x, params, matmul_dtype=jnp.float32)
    assert float(jnp.max(jnp.abs(out - ref_f32))) < 0.1, (
        float(jnp.max(jnp.abs(out - ref_f32))))

    print("KERNEL_OK")
</pallas_src>

<mosaic_0001>
module attributes {stable_mosaic.version = 11 : i64} {
  func.func @_size_predict_kernel(%arg0: i32, %arg1: memref<256x32xbf16, #tpu.memory_space<vmem>>, %arg2: memref<32x128xbf16, #tpu.memory_space<vmem>>, %arg3: memref<128x128xbf16, #tpu.memory_space<vmem>>, %arg4: memref<6x128xf32, #tpu.memory_space<vmem>>, %arg5: memref<1x128xf32, #tpu.memory_space<vmem>>, %arg6: memref<1x1xf32, #tpu.memory_space<vmem>>, %arg7: memref<1x256xf32, #tpu.memory_space<vmem>>) attributes {dimension_semantics = [#tpu.dimension_semantics<parallel>], iteration_bounds = array<i64: 1>, scalar_prefetch = 0 : i64, scratch_operands = 0 : i64, tpu.core_type = #tpu.core_type<tc>, window_params = [{transform_indices = @transform_0, window_bounds = array<i64: 256, 32>}, {pipeline_mode = #tpu.pipeline_mode<synchronous>, transform_indices = @transform_1, window_bounds = array<i64: 32, 128>}, {pipeline_mode = #tpu.pipeline_mode<synchronous>, transform_indices = @transform_2, window_bounds = array<i64: 128, 128>}, {pipeline_mode = #tpu.pipeline_mode<synchronous>, transform_indices = @transform_3, window_bounds = array<i64: 6, 128>}, {pipeline_mode = #tpu.pipeline_mode<synchronous>, transform_indices = @transform_4, window_bounds = array<i64: 1, 128>}, {pipeline_mode = #tpu.pipeline_mode<synchronous>, transform_indices = @transform_5, window_bounds = array<i64: 1, 1>}, {transform_indices = @transform_6, window_bounds = array<i64: 1, 256>}]} {
    %c0 = arith.constant 0 : index
    %c0_0 = arith.constant 0 : index
    %0 = vector.load %arg1[%c0, %c0_0] : memref<256x32xbf16, #tpu.memory_space<vmem>>, vector<256x32xbf16>
    %c0_1 = arith.constant 0 : index
    %c0_2 = arith.constant 0 : index
    %1 = vector.load %arg2[%c0_1, %c0_2] : memref<32x128xbf16, #tpu.memory_space<vmem>>, vector<32x128xbf16>
    %cst = arith.constant dense<0.000000e+00> : vector<256x128xf32>
    %2 = tpu.matmul %0, %1, %cst {dimension_numbers = #tpu.dot_dimension_numbers<[1], [0], [0], [1], [0, 0, 1, 1], [], []>} : vector<256x32xbf16>, vector<32x128xbf16>, vector<256x128xf32> -> vector<256x128xf32>
    %c0_3 = arith.constant 0 : index
    %c0_4 = arith.constant 0 : index
    %3 = vector.load %arg4[%c0_3, %c0_4] : memref<6x128xf32, #tpu.memory_space<vmem>>, vector<1x128xf32>
    %4 = vector.broadcast %3 : vector<1x128xf32> to vector<256x128xf32>
    %5 = arith.addf %2, %4 : vector<256x128xf32>
    %cst_5 = arith.constant dense<0.000000e+00> : vector<256xf32>
    %6 = vector.multi_reduction <add>, %5, %cst_5 [1] : vector<256x128xf32> to vector<256xf32>
    %7 = vector.shape_cast %6 : vector<256xf32> to vector<256x1xf32>
    %cst_6 = arith.constant 1.280000e+02 : f32
    %8 = vector.broadcast %cst_6 : f32 to vector<256x1xf32>
    %9 = arith.divf %7, %8 : vector<256x1xf32>
    %10 = arith.mulf %5, %5 : vector<256x128xf32>
    %cst_7 = arith.constant dense<0.000000e+00> : vector<256xf32>
    %11 = vector.multi_reduction <add>, %10, %cst_7 [1] : vector<256x128xf32> to vector<256xf32>
    %12 = vector.shape_cast %11 : vector<256xf32> to vector<256x1xf32>
    %cst_8 = arith.constant 1.280000e+02 : f32
    %13 = vector.broadcast %cst_8 : f32 to vector<256x1xf32>
    %14 = arith.divf %12, %13 : vector<256x1xf32>
    %15 = arith.mulf %9, %9 : vector<256x1xf32>
    %16 = arith.subf %14, %15 : vector<256x1xf32>
    %cst_9 = arith.constant 0.000000e+00 : f32
    %17 = vector.broadcast %cst_9 : f32 to vector<256x1xf32>
    %18 = arith.maximumf %16, %17 : vector<256x1xf32>
    %19 = vector.broadcast %9 : vector<256x1xf32> to vector<256x128xf32>
    %20 = arith.subf %5, %19 : vector<256x128xf32>
    %cst_10 = arith.constant 9.99999974E-6 : f32
    %21 = vector.broadcast %cst_10 : f32 to vector<256x1xf32>
    %22 = arith.addf %18, %21 : vector<256x1xf32>
    %23 = math.rsqrt %22 : vector<256x1xf32>
    %24 = vector.broadcast %23 : vector<256x1xf32> to vector<256x128xf32>
    %25 = arith.mulf %20, %24 : vector<256x128xf32>
    %c1 = arith.constant 1 : index
    %c0_11 = arith.constant 0 : index
    %26 = vector.load %arg4[%c1, %c0_11] : memref<6x128xf32, #tpu.memory_space<vmem>>, vector<1x128xf32>
    %27 = vector.broadcast %26 : vector<1x128xf32> to vector<256x128xf32>
    %28 = arith.mulf %25, %27 : vector<256x128xf32>
    %c2 = arith.constant 2 : index
    %c0_12 = arith.constant 0 : index
    %29 = vector.load %arg4[%c2, %c0_12] : memref<6x128xf32, #tpu.memory_space<vmem>>, vector<1x128xf32>
    %30 = vector.broadcast %29 : vector<1x128xf32> to vector<256x128xf32>
    %31 = arith.addf %28, %30 : vector<256x128xf32>
    %cst_13 = arith.constant 0.000000e+00 : f32
    %32 = vector.broadcast %cst_13 : f32 to vector<256x128xf32>
    %33 = arith.maximumf %31, %32 : vector<256x128xf32>
    %34 = arith.truncf %33 : vector<256x128xf32> to vector<256x128xbf16>
    %c0_14 = arith.constant 0 : index
    %c0_15 = arith.constant 0 : index
    %35 = vector.load %arg3[%c0_14, %c0_15] : memref<128x128xbf16, #tpu.memory_space<vmem>>, vector<128x128xbf16>
    %cst_16 = arith.constant dense<0.000000e+00> : vector<256x128xf32>
    %36 = tpu.matmul %34, %35, %cst_16 {dimension_numbers = #tpu.dot_dimension_numbers<[1], [0], [0], [1], [0, 0, 1, 1], [], []>} : vector<256x128xbf16>, vector<128x128xbf16>, vector<256x128xf32> -> vector<256x128xf32>
    %c3 = arith.constant 3 : index
    %c0_17 = arith.constant 0 : index
    %37 = vector.load %arg4[%c3, %c0_17] : memref<6x128xf32, #tpu.memory_space<vmem>>, vector<1x128xf32>
    %38 = vector.broadcast %37 : vector<1x128xf32> to vector<256x128xf32>
    %39 = arith.addf %36, %38 : vector<256x128xf32>
    %cst_18 = arith.constant dense<0.000000e+00> : vector<256xf32>
    %40 = vector.multi_reduction <add>, %39, %cst_18 [1] : vector<256x128xf32> to vector<256xf32>
    %41 = vector.shape_cast %40 : vector<256xf32> to vector<256x1xf32>
    %cst_19 = arith.constant 1.280000e+02 : f32
    %42 = vector.broadcast %cst_19 : f32 to vector<256x1xf32>
    %43 = arith.divf %41, %42 : vector<256x1xf32>
    %44 = arith.mulf %39, %39 : vector<256x128xf32>
    %cst_20 = arith.constant dense<0.000000e+00> : vector<256xf32>
    %45 = vector.multi_reduction <add>, %44, %cst_20 [1] : vector<256x128xf32> to vector<256xf32>
    %46 = vector.shape_cast %45 : vector<256xf32> to vector<256x1xf32>
    %cst_21 = arith.constant 1.280000e+02 : f32
    %47 = vector.broadcast %cst_21 : f32 to vector<256x1xf32>
    %48 = arith.divf %46, %47 : vector<256x1xf32>
    %49 = arith.mulf %43, %43 : vector<256x1xf32>
    %50 = arith.subf %48, %49 : vector<256x1xf32>
    %cst_22 = arith.constant 0.000000e+00 : f32
    %51 = vector.broadcast %cst_22 : f32 to vector<256x1xf32>
    %52 = arith.maximumf %50, %51 : vector<256x1xf32>
    %53 = vector.broadcast %43 : vector<256x1xf32> to vector<256x128xf32>
    %54 = arith.subf %39, %53 : vector<256x128xf32>
    %cst_23 = arith.constant 9.99999974E-6 : f32
    %55 = vector.broadcast %cst_23 : f32 to vector<256x1xf32>
    %56 = arith.addf %52, %55 : vector<256x1xf32>
    %57 = math.rsqrt %56 : vector<256x1xf32>
    %58 = vector.broadcast %57 : vector<256x1xf32> to vector<256x128xf32>
    %59 = arith.mulf %54, %58 : vector<256x128xf32>
    %c4 = arith.constant 4 : index
    %c0_24 = arith.constant 0 : index
    %60 = vector.load %arg4[%c4, %c0_24] : memref<6x128xf32, #tpu.memory_space<vmem>>, vector<1x128xf32>
    %61 = vector.broadcast %60 : vector<1x128xf32> to vector<256x128xf32>
    %62 = arith.mulf %59, %61 : vector<256x128xf32>
    %c5 = arith.constant 5 : index
    %c0_25 = arith.constant 0 : index
    %63 = vector.load %arg4[%c5, %c0_25] : memref<6x128xf32, #tpu.memory_space<vmem>>, vector<1x128xf32>
    %64 = vector.broadcast %63 : vector<1x128xf32> to vector<256x128xf32>
    %65 = arith.addf %62, %64 : vector<256x128xf32>
    %cst_26 = arith.constant 0.000000e+00 : f32
    %66 = vector.broadcast %cst_26 : f32 to vector<256x128xf32>
    %67 = arith.maximumf %65, %66 : vector<256x128xf32>
    %c0_27 = arith.constant 0 : index
    %c0_28 = arith.constant 0 : index
    %68 = vector.load %arg5[%c0_27, %c0_28] : memref<1x128xf32, #tpu.memory_space<vmem>>, vector<1x128xf32>
    "tpu.trace_start"() <{level = 10 : i32, message = "tf,bf->tb"}> : () -> ()
    %cst_29 = arith.constant dense<0.000000e+00> : vector<1x256xf32>
    %69 = tpu.matmul %68, %67, %cst_29 {dimension_numbers = #tpu.dot_dimension_numbers<[1], [1], [0], [0], [0, 0, 1, 0], [], []>} : vector<1x128xf32>, vector<256x128xf32>, vector<1x256xf32> -> vector<1x256xf32>
    "tpu.trace_stop"() : () -> ()
    %c0_30 = arith.constant 0 : index
    %c0_31 = arith.constant 0 : index
    %70 = vector.load %arg6[%c0_30, %c0_31] : memref<1x1xf32, #tpu.memory_space<vmem>>, vector<1x1xf32>
    %71 = vector.broadcast %70 : vector<1x1xf32> to vector<1x256xf32>
    %72 = arith.addf %69, %71 : vector<1x256xf32>
    %c0_32 = arith.constant 0 : index
    %c0_33 = arith.constant 0 : index
    %73 = vector.load %arg7[%c0_32, %c0_33] : memref<1x256xf32, #tpu.memory_space<vmem>>, vector<1x256xf32>
    tpu.vector_store %arg7[%c0_32, %c0_33], %72 {strides = array<i32>} : memref<1x256xf32, #tpu.memory_space<vmem>>, vector<1x256xf32>,
    return
  }
  func.func @transform_0(%arg0: i32) -> (i32, i32) {
    %c0_i32 = arith.constant 0 : i32
    %c0_i32_0 = arith.constant 0 : i32
    return %arg0, %c0_i32 : i32, i32
  }
  func.func @transform_1(%arg0: i32) -> (i32, i32) {
    %c0_i32 = arith.constant 0 : i32
    %c0_i32_0 = arith.constant 0 : i32
    %c0_i32_1 = arith.constant 0 : i32
    return %c0_i32, %c0_i32_0 : i32, i32
  }
  func.func @transform_2(%arg0: i32) -> (i32, i32) {
    %c0_i32 = arith.constant 0 : i32
    %c0_i32_0 = arith.constant 0 : i32
    %c0_i32_1 = arith.constant 0 : i32
    return %c0_i32, %c0_i32_0 : i32, i32
  }
  func.func @transform_3(%arg0: i32) -> (i32, i32) {
    %c0_i32 = arith.constant 0 : i32
    %c0_i32_0 = arith.constant 0 : i32
    %c0_i32_1 = arith.constant 0 : i32
    return %c0_i32, %c0_i32_0 : i32, i32
  }
  func.func @transform_4(%arg0: i32) -> (i32, i32) {
    %c0_i32 = arith.constant 0 : i32
    %c0_i32_0 = arith.constant 0 : i32
    %c0_i32_1 = arith.constant 0 : i32
    return %c0_i32, %c0_i32_0 : i32, i32
  }
  func.func @transform_5(%arg0: i32) -> (i32, i32) {
    %c0_i32 = arith.constant 0 : i32
    %c0_i32_0 = arith.constant 0 : i32
    %c0_i32_1 = arith.constant 0 : i32
    return %c0_i32, %c0_i32_0 : i32, i32
  }
  func.func @transform_6(%arg0: i32) -> (i32, i32) {
    %c0_i32 = arith.constant 0 : i32
    %c0_i32_0 = arith.constant 0 : i32
    return %c0_i32, %arg0 : i32, i32
  }
}

module attributes {stable_mosaic.version = 11 : i64} {
  func.func @_size_predict_kernel(%arg0: i32, %arg1: memref<256x32xbf16, #tpu.memory_space<vmem>>, %arg2: memref<32x128xbf16, #tpu.memory_space<vmem>>, %arg3: memref<128x128xbf16, #tpu.memory_space<vmem>>, %arg4: memref<6x128xf32, #tpu.memory_space<vmem>>, %arg5: memref<1x128xf32, #tpu.memory_space<vmem>>, %arg6: memref<1x1xf32, #tpu.memory_space<vmem>>, %arg7: memref<1x256xf32, #tpu.memory_space<vmem>>) attributes {dimension_semantics = [#tpu.dimension_semantics<parallel>], iteration_bounds = array<i64: 1>, scalar_prefetch = 0 : i64, scratch_operands = 0 : i64, tpu.core_type = #tpu.core_type<tc>, window_params = [{transform_indices = @transform_0, window_bounds = array<i64: 256, 32>}, {pipeline_mode = #tpu.pipeline_mode<synchronous>, transform_indices = @transform_1, window_bounds = array<i64: 32, 128>}, {pipeline_mode = #tpu.pipeline_mode<synchronous>, transform_indices = @transform_2, window_bounds = array<i64: 128, 128>}, {pipeline_mode = #tpu.pipeline_mode<synchronous>, transform_indices = @transform_3, window_bounds = array<i64: 6, 128>}, {pipeline_mode = #tpu.pipeline_mode<synchronous>, transform_indices = @transform_4, window_bounds = array<i64: 1, 128>}, {pipeline_mode = #tpu.pipeline_mode<synchronous>, transform_indices = @transform_5, window_bounds = array<i64: 1, 1>}, {transform_indices = @transform_6, window_bounds = array<i64: 1, 256>}]} {
    %c0 = arith.constant 0 : index
    %c0_0 = arith.constant 0 : index
    %0 = vector.load %arg1[%c0, %c0_0] : memref<256x32xbf16, #tpu.memory_space<vmem>>, vector<256x32xbf16>
    %c0_1 = arith.constant 0 : index
    %c0_2 = arith.constant 0 : index
    %1 = vector.load %arg2[%c0_1, %c0_2] : memref<32x128xbf16, #tpu.memory_space<vmem>>, vector<32x128xbf16>
    %cst = arith.constant dense<0.000000e+00> : vector<256x128xf32>
    %2 = tpu.matmul %0, %1, %cst {dimension_numbers = #tpu.dot_dimension_numbers<[1], [0], [0], [1], [0, 0, 1, 1], [], []>} : vector<256x32xbf16>, vector<32x128xbf16>, vector<256x128xf32> -> vector<256x128xf32>
    %c0_3 = arith.constant 0 : index
    %c0_4 = arith.constant 0 : index
    %3 = vector.load %arg4[%c0_3, %c0_4] : memref<6x128xf32, #tpu.memory_space<vmem>>, vector<1x128xf32>
    %4 = vector.broadcast %3 : vector<1x128xf32> to vector<256x128xf32>
    %5 = arith.addf %2, %4 : vector<256x128xf32>
    %cst_5 = arith.constant dense<0.000000e+00> : vector<256xf32>
    %6 = vector.multi_reduction <add>, %5, %cst_5 [1] : vector<256x128xf32> to vector<256xf32>
    %7 = vector.shape_cast %6 : vector<256xf32> to vector<256x1xf32>
    %cst_6 = arith.constant 1.280000e+02 : f32
    %8 = vector.broadcast %cst_6 : f32 to vector<256x1xf32>
    %9 = arith.divf %7, %8 : vector<256x1xf32>
    %10 = arith.mulf %5, %5 : vector<256x128xf32>
    %cst_7 = arith.constant dense<0.000000e+00> : vector<256xf32>
    %11 = vector.multi_reduction <add>, %10, %cst_7 [1] : vector<256x128xf32> to vector<256xf32>
    %12 = vector.shape_cast %11 : vector<256xf32> to vector<256x1xf32>
    %cst_8 = arith.constant 1.280000e+02 : f32
    %13 = vector.broadcast %cst_8 : f32 to vector<256x1xf32>
    %14 = arith.divf %12, %13 : vector<256x1xf32>
    %15 = arith.mulf %9, %9 : vector<256x1xf32>
    %16 = arith.subf %14, %15 : vector<256x1xf32>
    %cst_9 = arith.constant 0.000000e+00 : f32
    %17 = vector.broadcast %cst_9 : f32 to vector<256x1xf32>
    %18 = arith.maximumf %16, %17 : vector<256x1xf32>
    %19 = vector.broadcast %9 : vector<256x1xf32> to vector<256x128xf32>
    %20 = arith.subf %5, %19 : vector<256x128xf32>
    %cst_10 = arith.constant 9.99999974E-6 : f32
    %21 = vector.broadcast %cst_10 : f32 to vector<256x1xf32>
    %22 = arith.addf %18, %21 : vector<256x1xf32>
    %23 = math.rsqrt %22 : vector<256x1xf32>
    %24 = vector.broadcast %23 : vector<256x1xf32> to vector<256x128xf32>
    %25 = arith.mulf %20, %24 : vector<256x128xf32>
    %c1 = arith.constant 1 : index
    %c0_11 = arith.constant 0 : index
    %26 = vector.load %arg4[%c1, %c0_11] : memref<6x128xf32, #tpu.memory_space<vmem>>, vector<1x128xf32>
    %27 = vector.broadcast %26 : vector<1x128xf32> to vector<256x128xf32>
    %28 = arith.mulf %25, %27 : vector<256x128xf32>
    %c2 = arith.constant 2 : index
    %c0_12 = arith.constant 0 : index
    %29 = vector.load %arg4[%c2, %c0_12] : memref<6x128xf32, #tpu.memory_space<vmem>>, vector<1x128xf32>
    %30 = vector.broadcast %29 : vector<1x128xf32> to vector<256x128xf32>
    %31 = arith.addf %28, %30 : vector<256x128xf32>
    %cst_13 = arith.constant 0.000000e+00 : f32
    %32 = vector.broadcast %cst_13 : f32 to vector<256x128xf32>
    %33 = arith.maximumf %31, %32 : vector<256x128xf32>
    %34 = arith.truncf %33 : vector<256x128xf32> to vector<256x128xbf16>
    %c0_14 = arith.constant 0 : index
    %c0_15 = arith.constant 0 : index
    %35 = vector.load %arg3[%c0_14, %c0_15] : memref<128x128xbf16, #tpu.memory_space<vmem>>, vector<128x128xbf16>
    %cst_16 = arith.constant dense<0.000000e+00> : vector<256x128xf32>
    %36 = tpu.matmul %34, %35, %cst_16 {dimension_numbers = #tpu.dot_dimension_numbers<[1], [0], [0], [1], [0, 0, 1, 1], [], []>} : vector<256x128xbf16>, vector<128x128xbf16>, vector<256x128xf32> -> vector<256x128xf32>
    %c3 = arith.constant 3 : index
    %c0_17 = arith.constant 0 : index
    %37 = vector.load %arg4[%c3, %c0_17] : memref<6x128xf32, #tpu.memory_space<vmem>>, vector<1x128xf32>
    %38 = vector.broadcast %37 : vector<1x128xf32> to vector<256x128xf32>
    %39 = arith.addf %36, %38 : vector<256x128xf32>
    %cst_18 = arith.constant dense<0.000000e+00> : vector<256xf32>
    %40 = vector.multi_reduction <add>, %39, %cst_18 [1] : vector<256x128xf32> to vector<256xf32>
    %41 = vector.shape_cast %40 : vector<256xf32> to vector<256x1xf32>
    %cst_19 = arith.constant 1.280000e+02 : f32
    %42 = vector.broadcast %cst_19 : f32 to vector<256x1xf32>
    %43 = arith.divf %41, %42 : vector<256x1xf32>
    %44 = arith.mulf %39, %39 : vector<256x128xf32>
    %cst_20 = arith.constant dense<0.000000e+00> : vector<256xf32>
    %45 = vector.multi_reduction <add>, %44, %cst_20 [1] : vector<256x128xf32> to vector<256xf32>
    %46 = vector.shape_cast %45 : vector<256xf32> to vector<256x1xf32>
    %cst_21 = arith.constant 1.280000e+02 : f32
    %47 = vector.broadcast %cst_21 : f32 to vector<256x1xf32>
    %48 = arith.divf %46, %47 : vector<256x1xf32>
    %49 = arith.mulf %43, %43 : vector<256x1xf32>
    %50 = arith.subf %48, %49 : vector<256x1xf32>
    %cst_22 = arith.constant 0.000000e+00 : f32
    %51 = vector.broadcast %cst_22 : f32 to vector<256x1xf32>
    %52 = arith.maximumf %50, %51 : vector<256x1xf32>
    %53 = vector.broadcast %43 : vector<256x1xf32> to vector<256x128xf32>
    %54 = arith.subf %39, %53 : vector<256x128xf32>
    %cst_23 = arith.constant 9.99999974E-6 : f32
    %55 = vector.broadcast %cst_23 : f32 to vector<256x1xf32>
    %56 = arith.addf %52, %55 : vector<256x1xf32>
    %57 = math.rsqrt %56 : vector<256x1xf32>
    %58 = vector.broadcast %57 : vector<256x1xf32> to vector<256x128xf32>
    %59 = arith.mulf %54, %58 : vector<256x128xf32>
    %c4 = arith.constant 4 : index
    %c0_24 = arith.constant 0 : index
    %60 = vector.load %arg4[%c4, %c0_24] : memref<6x128xf32, #tpu.memory_space<vmem>>, vector<1x128xf32>
    %61 = vector.broadcast %60 : vector<1x128xf32> to vector<256x128xf32>
    %62 = arith.mulf %59, %61 : vector<256x128xf32>
    %c5 = arith.constant 5 : index
    %c0_25 = arith.constant 0 : index
    %63 = vector.load %arg4[%c5, %c0_25] : memref<6x128xf32, #tpu.memory_space<vmem>>, vector<1x128xf32>
    %64 = vector.broadcast %63 : vector<1x128xf32> to vector<256x128xf32>
    %65 = arith.addf %62, %64 : vector<256x128xf32>
    %cst_26 = arith.constant 0.000000e+00 : f32
    %66 = vector.broadcast %cst_26 : f32 to vector<256x128xf32>
    %67 = arith.maximumf %65, %66 : vector<256x128xf32>
    %c0_27 = arith.constant 0 : index
    %c0_28 = arith.constant 0 : index
    %68 = vector.load %arg5[%c0_27, %c0_28] : memref<1x128xf32, #tpu.memory_space<vmem>>, vector<1x128xf32>
    "tpu.trace_start"() <{level = 10 : i32, message = "tf,bf->tb"}> : () -> ()
    %cst_29 = arith.constant dense<0.000000e+00> : vector<1x256xf32>
    %69 = tpu.matmul %68, %67, %cst_29 {dimension_numbers = #tpu.dot_dimension_numbers<[1], [1], [0], [0], [0, 0, 1, 0], [], []>} : vector<1x128xf32>, vector<256x128xf32>, vector<1x256xf32> -> vector<1x256xf32>
    "tpu.trace_stop"() : () -> ()
    %c0_30 = arith.constant 0 : index
    %c0_31 = arith.constant 0 : index
    %70 = vector.load %arg6[%c0_30, %c0_31] : memref<1x1xf32, #tpu.memory_space<vmem>>, vector<1x1xf32>
    %71 = vector.broadcast %70 : vector<1x1xf32> to vector<1x256xf32>
    %72 = arith.addf %69, %71 : vector<1x256xf32>
    %c0_32 = arith.constant 0 : index
    %c0_33 = arith.constant 0 : index
    %73 = vector.load %arg7[%c0_32, %c0_33] : memref<1x256xf32, #tpu.memory_space<vmem>>, vector<1x256xf32>
    tpu.vector_store %arg7[%c0_32, %c0_33], %72 {strides = array<i32>} : memref<1x256xf32, #tpu.memory_space<vmem>>, vector<1x256xf32>,
    return
  }
  func.func @transform_0(%arg0: i32) -> (i32, i32) {
    %c0_i32 = arith.constant 0 : i32
    %c0_i32_0 = arith.constant 0 : i32
    return %arg0, %c0_i32 : i32, i32
  }
  func.func @transform_1(%arg0: i32) -> (i32, i32) {
    %c0_i32 = arith.constant 0 : i32
    %c0_i32_0 = arith.constant 0 : i32
    %c0_i32_1 = arith.constant 0 : i32
    return %c0_i32, %c0_i32_0 : i32, i32
  }
  func.func @transform_2(%arg0: i32) -> (i32, i32) {
    %c0_i32 = arith.constant 0 : i32
    %c0_i32_0 = arith.constant 0 : i32
    %c0_i32_1 = arith.constant 0 : i32
    return %c0_i32, %c0_i32_0 : i32, i32
  }
  func.func @transform_3(%arg0: i32) -> (i32, i32) {
    %c0_i32 = arith.constant 0 : i32
    %c0_i32_0 = arith.constant 0 : i32
    %c0_i32_1 = arith.constant 0 : i32
    return %c0_i32, %c0_i32_0 : i32, i32
  }
  func.func @transform_4(%arg0: i32) -> (i32, i32) {
    %c0_i32 = arith.constant 0 : i32
    %c0_i32_0 = arith.constant 0 : i32
    %c0_i32_1 = arith.constant 0 : i32
    return %c0_i32, %c0_i32_0 : i32, i32
  }
  func.func @transform_5(%arg0: i32) -> (i32, i32) {
    %c0_i32 = arith.constant 0 : i32
    %c0_i32_0 = arith.constant 0 : i32
    %c0_i32_1 = arith.constant 0 : i32
    return %c0_i32, %c0_i32_0 : i32, i32
  }
  func.func @transform_6(%arg0: i32) -> (i32, i32) {
    %c0_i32 = arith.constant 0 : i32
    %c0_i32_0 = arith.constant 0 : i32
    return %c0_i32, %arg0 : i32, i32
  }
}

</mosaic_0001>

<bundles_post_ra>
// kernel: tpu_custom_call.1
= control target key start
LH: loop header
LB: loop body
LE: loop exit
PB: predicated region body
PF: predicated region fallthrough
CT: control target
= control target key end

     0   :  { %s3390_s0 = inlined_call_operand.vmem [shape: bf16[256,32], index: 0, kind: input, shape index: {}]   ;;  %s3391_s1 = inlined_call_operand.vmem [shape: bf16[32,128], index: 1, kind: input, shape index: {}]   ;;  %s3392_s2 = inlined_call_operand.vmem [shape: bf16[128,128], index: 2, kind: input, shape index: {}]   ;;  %s3393_s3 = inlined_call_operand.vmem [shape: f32[6,128], index: 3, kind: input, shape index: {}]   ;;  %s3394_s4 = inlined_call_operand.vmem [shape: f32[1,128], index: 4, kind: input, shape index: {}]   ;;  %s3395_s5 = inlined_call_operand.<no memory space> [shape: f32[1,1], index: 5, kind: input, shape index: {}]   ;;  %s3396_s6 = inlined_call_operand.hbm [shape: f32[1,256], index: 6, kind: output, shape index: {}]  }
   0x1   :  { %v11_v0 = vstv %s3395_s5 }
   0x2   :  { %12 = vst [vmem:[#allocation2] sm:$0x1] %v11_v0 }
   0x3   :  { %v2088_v1 = vld [vmem:[%s3391_s1] sm:$0xff]   ;;  %v2089_v2 = vld [vmem:[%s3391_s1 + $0x8] sm:$0xff]   ;;  %vm160_vm0 = vcmask 261120   ;;  %v2092_v5 = vld [vmem:[%s3390_s0 + $0x10] sm:$0xff]  }
   0x4   :  { %1968 = vmatprep.subr.bf16.mxu0 %v2088_v1  ;;  %v2090_v3 = vld [vmem:[%s3390_s0] sm:$0xff]   ;;  %v2091_v4 = vld [vmem:[%s3390_s0 + $0x8] sm:$0xff]   ;;  %v2093_v6 = vld [vmem:[%s3390_s0 + $0x18] sm:$0xff]  }
   0x5   :  { %1969 = vmatpush3.bf16.msra.mxu0 %v2088_v1  ;;  %1972 = vmatprep.mubr.msk.bf16.mxu0 %vm160_vm0, %v2090_v3  ;;  %v2094_v7 = vld [vmem:[%s3390_s0 + $0x20] sm:$0xff]   ;;  %v2095_v8 = vld [vmem:[%s3390_s0 + $0x28] sm:$0xff]   ;;  %v2096_v9 = vld [vmem:[%s3390_s0 + $0x30] sm:$0xff]  }
   0x6   :  { %1970 = vmatprep.subr.bf16.mxu0 %v2089_v2 }
   0x9   :  { %1971 = vmatpush3.bf16.msra.mxu0 %v2089_v2 }
   0xc   :  { %1973 = vmatmul.mubr.msk.bf16.vlgmr.msra.gmra.mrb[0].mxu0 %vm160_vm0, %v2091_v4 }
   0xd   :  { %1976 = vmatprep.mubr.msk.bf16.mxu0 %vm160_vm0, %v2092_v5 }
  0x14   :  { %1977 = vmatmul.mubr.msk.bf16.gmra.mrb[4].mxu0 %vm160_vm0, %v2093_v6 }
  0x15   :  { %1980 = vmatprep.mubr.msk.bf16.mxu0 %vm160_vm0, %v2094_v7 }
  0x16   :  { %13 = vsyncpa [#allocation4], 0  ;;  %v2097_v10 = vld [vmem:[%s3390_s0 + $0x38] sm:$0xff]   ;;  %v2098_v11 = vld [vmem:[%s3390_s0 + $0x40] sm:$0xff]  }
  0x17   :  { %v2099_v12 = vld [vmem:[%s3390_s0 + $0x48] sm:$0xff]   ;;  %v2100_v13 = vld [vmem:[%s3390_s0 + $0x50] sm:$0xff]   ;;  %v2101_v14 = vld [vmem:[%s3390_s0 + $0x58] sm:$0xff]  }
  0x18   :  { %v2102_v15 = vld [vmem:[%s3390_s0 + $0x60] sm:$0xff]   ;;  %v2103_v16 = vld [vmem:[%s3390_s0 + $0x68] sm:$0xff]   ;;  %v2104_v17 = vld [vmem:[%s3390_s0 + $0x70] sm:$0xff]  }
  0x19   :  { %v2105_v18 = vld [vmem:[%s3390_s0 + $0x78] sm:$0xff]   ;;  %v2380_v19 = vld [vmem:[%s3393_s3] ss:$0 sm:$0xff]  ;;  %v2107_v53 = vld [vmem:[%s3392_s2 + $0x8] sm:$0xff]  }
  0x1a   :  { %v2106_v49 = vld [vmem:[%s3392_s2] sm:$0xff]   ;;  %v2108_v61 = vld [vmem:[%s3392_s2 + $0x10] sm:$0xff]   ;;  %v2109_v3 = vld [vmem:[%s3392_s2 + $0x18] sm:$0xff]  }
  0x1b   :  { %2004 = vmatprep.subr.bf16.mxu1 %v2106_v49 }
  0x1c   :  { %1981 = vmatmul.mubr.msk.bf16.gmra.mrb[8].mxu0 %vm160_vm0, %v2095_v8  ;;  %2005 = vmatpush3.bf16.msra.mxu1 %v2106_v49 }
  0x1d   :  { %1984 = vmatprep.mubr.msk.bf16.mxu0 %vm160_vm0, %v2096_v9  ;;  %2006 = vmatprep.subr.bf16.mxu1 %v2107_v53 }
  0x20   :  { %2007 = vmatpush3.bf16.msra.mxu1 %v2107_v53 }
  0x21   :  { %2008 = vmatprep.subr.bf16.mxu1 %v2108_v61 }
  0x24   :  { %1985 = vmatmul.mubr.msk.bf16.gmra.mrb[12].mxu0 %vm160_vm0, %v2097_v10  ;;  %2009 = vmatpush3.bf16.msra.mxu1 %v2108_v61 }
  0x25   :  { %1988 = vmatprep.mubr.msk.bf16.mxu0 %vm160_vm0, %v2098_v11  ;;  %2010 = vmatprep.subr.bf16.mxu1 %v2109_v3  ;;  %v2110_v11 = vld [vmem:[%s3392_s2 + $0x20] sm:$0xff]  }
  0x28   :  { %2011 = vmatpush3.bf16.msra.mxu1 %v2109_v3 }
  0x29   :  { %2012 = vmatprep.subr.bf16.mxu1 %v2110_v11 }
  0x2c   :  { %1989 = vmatmul.mubr.msk.bf16.gmra.mrb[16].mxu0 %vm160_vm0, %v2099_v12  ;;  %2013 = vmatpush3.bf16.msra.mxu1 %v2110_v11 }
  0x2d   :  { %1992 = vmatprep.mubr.msk.bf16.mxu0 %vm160_vm0, %v2100_v13 }
  0x34   :  { %1993 = vmatmul.mubr.msk.bf16.gmra.mrb[20].mxu0 %vm160_vm0, %v2101_v14 }
  0x35   :  { %1996 = vmatprep.mubr.msk.bf16.mxu0 %vm160_vm0, %v2102_v15 }
  0x3c   :  { %1997 = vmatmul.mubr.msk.bf16.gmra.mrb[24].mxu0 %vm160_vm0, %v2103_v16 }
  0x3d   :  { %2000 = vmatprep.mubr.msk.bf16.mxu0 %vm160_vm0, %v2104_v17  ;;  %v2111_v17 = vld [vmem:[%s3392_s2 + $0x28] sm:$0xff]  }
  0x3e   :  { %2014 = vmatprep.subr.bf16.mxu1 %v2111_v17 }
  0x3f   :  { %2015 = vmatpush3.bf16.msra.mxu1 %v2111_v17 }
  0x44   :  { %2001 = vmatmul.mubr.msk.bf16.gmra.mrb[28].mxu0 %vm160_vm0, %v2105_v18 }
  0xdf   :  { %v1974_v20 = vpop.f32.mrb[0].mxu0 }
  0xe0   :  { %v2383_v21 = vadd.f32 %v1974_v20, %v2380_v19  ;;  %v243_v22 = vpop.f32.mrb[1].mxu0 }
  0xe1   :  { %v2386_v23 = vadd.f32 %v2380_v19, %v243_v22  ;;  %v1975_v24 = vpop.f32.mrb[2].mxu0 }
  0xe2   :  { %374 = vadd.xlane.f32.xlu1 %v2383_v21  ;;  %v246_v25 = vpop.f32.mrb[3].mxu0  ;;  %v2391_v26 = vadd.f32 %v1975_v24, %v2380_v19  ;;  %v469_v27 = vmul.f32 %v2383_v21, %v2383_v21 }
  0xe3   :  { %370 = vadd.xlane.f32.xlu0 %v2386_v23  ;;  %v2397_v29 = vadd.f32 %v2380_v19, %v246_v25  ;;  %v467_v35 = vmul.f32 %v2386_v23, %v2386_v23 }
  0xe4   :  { %v470_v30 = vmul.f32 %v2391_v26, %v2391_v26 }
  0xe5   :  { %v468_v34 = vmul.f32 %v2397_v29, %v2397_v29 }
  0xe6   :  { %376 = vadd.xlane.f32.xlu1 %v2391_v26 }
  0xe7   :  { %503 = vadd.xlane.f32.xlu0 %v469_v27  ;;  %v1978_v28 = vpop.f32.mrb[4].mxu0 }
  0xe8   :  { %v259_v31 = vpop.f32.mrb[5].mxu0  ;;  %v2410_v39 = vadd.f32 %v1978_v28, %v2380_v19 }
  0xe9   :  { %v1979_v32 = vpop.f32.mrb[6].mxu0  ;;  %v2418_v43 = vadd.f32 %v2380_v19, %v259_v31 }
  0xea   :  { %505 = vadd.xlane.f32.xlu1 %v470_v30  ;;  %v262_v33 = vpop.f32.mrb[7].mxu0  ;;  %v2407_v36 = vadd.f32 %v1979_v32, %v2380_v19  ;;  %v473_v47 = vmul.f32 %v2410_v39, %v2410_v39  ;;  %v2112_v30 = vld [vmem:[%s3392_s2 + $0x30] sm:$0xff]  }
  0xeb   :  { %372 = vadd.xlane.f32.xlu0 %v2397_v29  ;;  %v2415_v42 = vadd.f32 %v2380_v19, %v262_v33  ;;  %v471_v52 = vmul.f32 %v2418_v43, %v2418_v43  ;;  %2016 = vmatprep.subr.bf16.mxu1 %v2112_v30 }
  0xec   :  { %v474_v45 = vmul.f32 %v2407_v36, %v2407_v36  ;;  %2017 = vmatpush3.bf16.msra.mxu1 %v2112_v30 }
  0xed   :  { %v472_v51 = vmul.f32 %v2415_v42, %v2415_v42 }
  0xee   :  { %501 = vadd.xlane.f32.xlu1 %v468_v34 }
  0xef   :  { %499 = vadd.xlane.f32.xlu0 %v467_v35  ;;  %v1982_v37 = vpop.f32.mrb[8].mxu0 }
  0xf0   :  { %v275_v38 = vpop.f32.mrb[9].mxu0  ;;  %v2449_v58 = vadd.f32 %v1982_v37, %v2380_v19  ;;  %v2113_v37 = vld [vmem:[%s3392_s2 + $0x38] sm:$0xff]  }
  0xf1   :  { %v1983_v40 = vpop.f32.mrb[10].mxu0  ;;  %v2469_v2 = vadd.f32 %v2380_v19, %v275_v38  ;;  %2018 = vmatprep.subr.bf16.mxu1 %v2113_v37 }
  0xf2   :  { %384 = vadd.xlane.f32.xlu1 %v2407_v36  ;;  %v278_v41 = vpop.f32.mrb[11].mxu0  ;;  %v2443_v54 = vadd.f32 %v1983_v40, %v2380_v19  ;;  %v477_v8 = vmul.f32 %v2449_v58, %v2449_v58  ;;  %2019 = vmatpush3.bf16.msra.mxu1 %v2113_v37 }
  0xf3   :  { %382 = vadd.xlane.f32.xlu0 %v2410_v39  ;;  %v2466_v1 = vadd.f32 %v2380_v19, %v278_v41  ;;  %v475_v16 = vmul.f32 %v2469_v2, %v2469_v2 }
  0xf4   :  { %v478_v5 = vmul.f32 %v2443_v54, %v2443_v54 }
  0xf5   :  { %v476_v15 = vmul.f32 %v2466_v1, %v2466_v1 }
  0xf6   :  { %380 = vadd.xlane.f32.xlu1 %v2415_v42 }
  0xf7   :  { %378 = vadd.xlane.f32.xlu0 %v2418_v43  ;;  %v2422_v44 = vpop.f32.mrb[12].mxu0 }
  0xf8   :  { %v2426_v46 = vpop.f32.mrb[13].mxu0  ;;  %v2510_v25 = vadd.f32 %v2422_v44, %v2380_v19 }
  0xf9   :  { %v1987_v48 = vpop.f32.mrb[14].mxu0  ;;  %v2532_v35 = vadd.f32 %v2380_v19, %v2426_v46 }
  0xfa   :  { %513 = vadd.xlane.f32.xlu1 %v474_v45  ;;  %v2433_v50 = vpop.f32.mrb[15].mxu0  ;;  %v2503_v18 = vadd.f32 %v1987_v48, %v2380_v19  ;;  %v481_v45 = vmul.f32 %v2510_v25, %v2510_v25 }
  0xfb   :  { %511 = vadd.xlane.f32.xlu0 %v473_v47  ;;  %v2528_v34 = vadd.f32 %v2380_v19, %v2433_v50 }
  0xfc   :  { %v482_v40 = vmul.f32 %v2503_v18, %v2503_v18 }
  0xfe   :  { %509 = vadd.xlane.f32.xlu1 %v472_v51  ;;  %v480_v51 = vmul.f32 %v2528_v34, %v2528_v34 }
  0xff   :  { %507 = vadd.xlane.f32.xlu0 %v471_v52  ;;  %v1990_v55 = vpop.f32.mrb[16].mxu0  ;;  %v479_v52 = vmul.f32 %v2532_v35, %v2532_v35 }
 0x100   :  { %v2446_v56 = vadd.f32 %v1990_v55, %v2380_v19  ;;  %v307_v57 = vpop.f32.mrb[17].mxu0 }
 0x101   :  { %v2452_v59 = vadd.f32 %v2380_v19, %v307_v57  ;;  %v1991_v60 = vpop.f32.mrb[18].mxu0 }
 0x102   :  { %392 = vadd.xlane.f32.xlu1 %v2443_v54  ;;  %v2459_v62 = vadd.f32 %v1991_v60, %v2380_v19  ;;  %v310_v63 = vpop.f32.mrb[19].mxu0  ;;  %v485_v57 = vmul.f32 %v2446_v56, %v2446_v56 }
 0x103   :  { %390 = vadd.xlane.f32.xlu0 %v2449_v58  ;;  %v2463_v0 = vadd.f32 %v2380_v19, %v310_v63  ;;  %v483_v53 = vmul.f32 %v2452_v59, %v2452_v59 }
 0x104   :  { %v486_v55 = vmul.f32 %v2459_v62, %v2459_v62 }
 0x106   :  { %388 = vadd.xlane.f32.xlu1 %v2466_v1 }
 0x107   :  { %386 = vadd.xlane.f32.xlu0 %v2469_v2  ;;  %v1994_v4 = vpop.f32.mrb[20].mxu0 }
 0x108   :  { %v2479_v6 = vadd.f32 %v1994_v4, %v2380_v19  ;;  %v323_v7 = vpop.f32.mrb[21].mxu0 }
 0x109   :  { %v2484_v9 = vadd.f32 %v2380_v19, %v323_v7  ;;  %v1995_v10 = vpop.f32.mrb[22].mxu0 }
 0x10a   :  { %521 = vadd.xlane.f32.xlu1 %v478_v5  ;;  %v2490_v12 = vadd.f32 %v1995_v10, %v2380_v19  ;;  %v326_v13 = vpop.f32.mrb[23].mxu0  ;;  %v489_v3 = vmul.f32 %v2479_v6, %v2479_v6 }
 0x10b   :  { %519 = vadd.xlane.f32.xlu0 %v477_v8  ;;  %v2493_v14 = vadd.f32 %v2380_v19, %v326_v13  ;;  %v487_v61 = vmul.f32 %v2484_v9, %v2484_v9 }
 0x10c   :  { %v490_v63 = vmul.f32 %v2490_v12, %v2490_v12 }
 0x10d   :  { %v488_v60 = vmul.f32 %v2493_v14, %v2493_v14 }
 0x10e   :  { %517 = vadd.xlane.f32.xlu1 %v476_v15 }
 0x10f   :  { %515 = vadd.xlane.f32.xlu0 %v475_v16  ;;  %v1998_v20 = vpop.f32.mrb[24].mxu0 }
 0x110   :  { %v2506_v22 = vadd.f32 %v1998_v20, %v2380_v19  ;;  %v339_v24 = vpop.f32.mrb[25].mxu0 }
 0x111   :  { %v2513_v27 = vadd.f32 %v2380_v19, %v339_v24  ;;  %v1999_v28 = vpop.f32.mrb[26].mxu0 }
 0x112   :  { %400 = vadd.xlane.f32.xlu1 %v2503_v18  ;;  %v2520_v31 = vadd.f32 %v1999_v28, %v2380_v19  ;;  %v342_v32 = vpop.f32.mrb[27].mxu0  ;;  %v493_v8 = vmul.f32 %v2506_v22, %v2506_v22 }
 0x113   :  { %398 = vadd.xlane.f32.xlu0 %v2510_v25  ;;  %v2524_v33 = vadd.f32 %v2380_v19, %v342_v32  ;;  %v491_v5 = vmul.f32 %v2513_v27, %v2513_v27 }
 0x114   :  { %v494_v7 = vmul.f32 %v2520_v31, %v2520_v31 }
 0x115   :  { %v492_v4 = vmul.f32 %v2524_v33, %v2524_v33 }
 0x116   :  { %396 = vadd.xlane.f32.xlu1 %v2528_v34 }
 0x117   :  { %394 = vadd.xlane.f32.xlu0 %v2532_v35  ;;  %v2002_v38 = vpop.f32.mrb[28].mxu0 }
 0x118   :  { %v2542_v41 = vadd.f32 %v2002_v38, %v2380_v19  ;;  %v355_v44 = vpop.f32.mrb[29].mxu0 }
 0x119   :  { %v2547_v46 = vadd.f32 %v2380_v19, %v355_v44  ;;  %v2003_v47 = vpop.f32.mrb[30].mxu0 }
 0x11a   :  { %529 = vadd.xlane.f32.xlu1 %v482_v40  ;;  %v2550_v48 = vadd.f32 %v2003_v47, %v2380_v19  ;;  %v358_v49 = vpop.f32.mrb[31].mxu0  ;;  %v497_v15 = vmul.f32 %v2542_v41, %v2542_v41 }
 0x11b   :  { %527 = vadd.xlane.f32.xlu0 %v481_v45  ;;  %v2553_v50 = vadd.f32 %v2380_v19, %v358_v49  ;;  %v484_v19 = vmul.f32 %v2463_v0, %v2463_v0  ;;  %v495_v11 = vmul.f32 %v2547_v46, %v2547_v46 }
 0x11c   :  { %v498_v13 = vmul.f32 %v2550_v48, %v2550_v48 }
 0x11d   :  { %v496_v10 = vmul.f32 %v2553_v50, %v2553_v50 }
 0x11e   :  { %525 = vadd.xlane.f32.xlu1 %v480_v51 }
 0x11f   :  { %523 = vadd.xlane.f32.xlu0 %v479_v52 }
 0x122   :  { %408 = vadd.xlane.f32.xlu1 %v2459_v62 }
 0x123   :  { %406 = vadd.xlane.f32.xlu0 %v2446_v56 }
 0x126   :  { %404 = vadd.xlane.f32.xlu1 %v2463_v0 }
 0x127   :  { %402 = vadd.xlane.f32.xlu0 %v2452_v59 }
 0x12a   :  { %533 = vadd.xlane.f32.xlu1 %v484_v19 }
 0x12b   :  { %531 = vadd.xlane.f32.xlu0 %v483_v53 }
 0x12e   :  { %537 = vadd.xlane.f32.xlu1 %v486_v55 }
 0x12f   :  { %535 = vadd.xlane.f32.xlu0 %v485_v57 }
 0x132   :  { %416 = vadd.xlane.f32.xlu1 %v2490_v12 }
 0x133   :  { %414 = vadd.xlane.f32.xlu0 %v2479_v6 }
 0x136   :  { %412 = vadd.xlane.f32.xlu1 %v2493_v14 }
 0x137   :  { %410 = vadd.xlane.f32.xlu0 %v2484_v9 }
 0x13a   :  { %541 = vadd.xlane.f32.xlu1 %v488_v60 }
 0x13b   :  { %539 = vadd.xlane.f32.xlu0 %v487_v61 }
 0x13e   :  { %545 = vadd.xlane.f32.xlu1 %v490_v63 }
 0x13f   :  { %543 = vadd.xlane.f32.xlu0 %v489_v3 }
 0x142   :  { %424 = vadd.xlane.f32.xlu1 %v2520_v31 }
 0x143   :  { %422 = vadd.xlane.f32.xlu0 %v2506_v22 }
 0x146   :  { %420 = vadd.xlane.f32.xlu1 %v2524_v33 }
 0x147   :  { %418 = vadd.xlane.f32.xlu0 %v2513_v27 }
 0x14a   :  { %549 = vadd.xlane.f32.xlu1 %v492_v4 }
 0x14b   :  { %547 = vadd.xlane.f32.xlu0 %v491_v5 }
 0x14e   :  { %553 = vadd.xlane.f32.xlu1 %v494_v7 }
 0x14f   :  { %551 = vadd.xlane.f32.xlu0 %v493_v8 }
 0x152   :  { %432 = vadd.xlane.f32.xlu1 %v2550_v48 }
 0x153   :  { %430 = vadd.xlane.f32.xlu0 %v2542_v41 }
 0x156   :  { %428 = vadd.xlane.f32.xlu1 %v2553_v50 }
 0x157   :  { %426 = vadd.xlane.f32.xlu0 %v2547_v46 }
 0x15a   :  { %557 = vadd.xlane.f32.xlu1 %v496_v10 }
 0x15b   :  { %555 = vadd.xlane.f32.xlu0 %v495_v11 }
 0x15e   :  { %561 = vadd.xlane.f32.xlu1 %v498_v13 }
 0x15f   :  { %559 = vadd.xlane.f32.xlu0 %v497_v15 }
 0x16f   :  { %v375_v16 = vpop.xlane.xlu1 %374 }
 0x170   :  { %v371_v17 = vpop.xlane.xlu0 %370  ;;  %v437_v20 = vmul.f32 0.0078125, %v375_v16 }
 0x171   :  { %v2607_v49 = vmul.f32 0.0078125, %v371_v17 }
 0x172   :  { %v597_v32 = vmul.f32 %v437_v20, %v437_v20 }
 0x173   :  { %v377_v24 = vpop.xlane.xlu1 %376  ;;  %v595_v3 = vmul.f32 %v2607_v49, %v2607_v49 }
 0x174   :  { %v438_v28 = vmul.f32 0.0078125, %v377_v24  ;;  %v504_v30 = vpop.xlane.xlu0 %503 }
 0x175   :  { %v565_v37 = vmul.f32 0.0078125, %v504_v30 }
 0x176   :  { %v598_v44 = vmul.f32 %v438_v28, %v438_v28 }
 0x177   :  { %v629_v38 = vsub.f32 %v565_v37, %v597_v32  ;;  %v506_v40 = vpop.xlane.xlu1 %505 }
 0x178   :  { %v566_v45 = vmul.f32 0.0078125, %v506_v40  ;;  %v373_v47 = vpop.xlane.xlu0 %372 }
 0x179   :  { %v661_v51 = vmax.f32 %v629_v38, 0.0  ;;  %v2609_v52 = vmul.f32 0.0078125, %v373_v47 }
 0x17a   :  { %v630_v19 = vsub.f32 %v566_v45, %v598_v44  ;;  %v693_v44 = vsub.f32 %v2383_v21, %v437_v20 }
 0x17b   :  { %v725_v53 = vadd.f32 1e-05, %v661_v51  ;;  %v596_v55 = vmul.f32 %v2609_v52, %v2609_v52  ;;  %v502_v57 = vpop.xlane.xlu1 %501 }
 0x17c   :  { %v662_v60 = vmax.f32 %v630_v19, 0.0  ;;  %v564_v61 = vmul.f32 0.0078125, %v502_v57  ;;  %v500_v63 = vpop.xlane.xlu0 %499 }
 0x17d   :  { %v563_v4 = vmul.f32 0.0078125, %v500_v63  ;;  %2114 = vrsqrt.f32 %v725_v53  ;;  %v694_v53 = vsub.f32 %v2391_v26, %v438_v28 }
 0x17e   :  { %v726_v5 = vadd.f32 1e-05, %v662_v60  ;;  %v628_v7 = vsub.f32 %v564_v61, %v596_v55 }
 0x17f   :  { %v627_v8 = vsub.f32 %v563_v4, %v595_v3  ;;  %v385_v10 = vpop.xlane.xlu1 %384 }
 0x180   :  { %2116 = vrsqrt.f32 %v726_v5  ;;  %v660_v11 = vmax.f32 %v628_v7, 0.0  ;;  %v383_v13 = vpop.xlane.xlu0 %382  ;;  %v2615_v30 = vmul.f32 0.0078125, %v385_v10  ;;  %v692_v5 = vsub.f32 %v2397_v29, %v2609_v52  ;;  %v2636_v10 = vld [vmem:[%s3393_s3 + $0x1] ss:$0 sm:$0xff] }
 0x181   :  { %v659_v15 = vmax.f32 %v627_v8, 0.0  ;;  %v2617_v37 = vmul.f32 0.0078125, %v383_v13  ;;  %v691_v29 = vsub.f32 %v2386_v23, %v2607_v49 }
 0x182   :  { %v724_v16 = vadd.f32 1e-05, %v660_v11  ;;  %v602_v45 = vmul.f32 %v2615_v30, %v2615_v30 }
 0x183   :  { %v723_v17 = vadd.f32 1e-05, %v659_v15  ;;  %v381_v24 = vpop.xlane.xlu1 %380  ;;  %v601_v55 = vmul.f32 %v2617_v37, %v2617_v37 }
 0x184   :  { %2118 = vrsqrt.f32 %v724_v16  ;;  %v379_v32 = vpop.xlane.xlu0 %378  ;;  %v2622_v47 = vmul.f32 0.0078125, %v381_v24 }
 0x185   :  { %2120 = vrsqrt.f32 %v723_v17  ;;  %v2627_v57 = vmul.f32 0.0078125, %v379_v32 }
 0x186   :  { %v600_v7 = vmul.f32 %v2622_v47, %v2622_v47 }
 0x187   :  { %v514_v38 = vpop.xlane.xlu1 %513  ;;  %v2115_v40 = vpop.eup %2114  ;;  %v599_v11 = vmul.f32 %v2627_v57, %v2627_v57 }
 0x188   :  { %v570_v51 = vmul.f32 0.0078125, %v514_v38  ;;  %v512_v19 = vpop.xlane.xlu0 %511  ;;  %v789_v21 = vmul.f32 %v2115_v40, %v693_v44 }
 0x189   :  { %v569_v60 = vmul.f32 0.0078125, %v512_v19 }
 0x18a   :  { %v2117_v61 = vpop.eup %2116  ;;  %v634_v63 = vsub.f32 %v570_v51, %v602_v45  ;;  %v826_v51 = vmul.f32 %v2636_v10, %v789_v21 }
 0x18b   :  { %v633_v3 = vsub.f32 %v569_v60, %v601_v55  ;;  %v510_v4 = vpop.xlane.xlu1 %509  ;;  %v790_v20 = vmul.f32 %v2117_v61, %v694_v53  ;;  %v2647_v60 = vld [vmem:[%s3393_s3 + $0x2] ss:$0 sm:$0xff] }
 0x18c   :  { %v666_v8 = vmax.f32 %v634_v63, 0.0  ;;  %v568_v26 = vmul.f32 0.0078125, %v510_v4  ;;  %v508_v28 = vpop.xlane.xlu0 %507 }
 0x18d   :  { %v665_v13 = vmax.f32 %v633_v3, 0.0  ;;  %v567_v15 = vmul.f32 0.0078125, %v508_v28  ;;  %v827_v16 = vmul.f32 %v2636_v10, %v790_v20 }
 0x18e   :  { %v2119_v17 = vpop.eup %2118  ;;  %v730_v52 = vadd.f32 1e-05, %v666_v8  ;;  %v632_v24 = vsub.f32 %v568_v26, %v600_v7 }
 0x18f   :  { %v2121_v32 = vpop.eup %2120  ;;  %v729_v38 = vadd.f32 1e-05, %v665_v13  ;;  %v631_v40 = vsub.f32 %v567_v15, %v599_v11  ;;  %v393_v44 = vpop.xlane.xlu1 %392  ;;  %v788_v45 = vmul.f32 %v2119_v17, %v692_v5  ;;  %v864_v61 = vadd.f32 %v2647_v60, %v827_v16 }
 0x190   :  { %2122 = vrsqrt.f32 %v730_v52  ;;  %v664_v19 = vmax.f32 %v632_v24, 0.0  ;;  %v391_v53 = vpop.xlane.xlu0 %390  ;;  %v787_v55 = vmul.f32 %v2121_v32, %v691_v29  ;;  %v863_v5 = vadd.f32 %v2647_v60, %v826_v51 }
 0x191   :  { %2124 = vrsqrt.f32 %v729_v38  ;;  %v663_v23 = vmax.f32 %v631_v40, 0.0  ;;  %v825_v49 = vmul.f32 %v2636_v10, %v788_v45  ;;  %v2654_v7 = vmul.f32 0.0078125, %v393_v44 }
 0x192   :  { %v728_v63 = vadd.f32 1e-05, %v664_v19  ;;  %v824_v3 = vmul.f32 %v2636_v10, %v787_v55  ;;  %v2657_v28 = vmul.f32 0.0078125, %v391_v53  ;;  %v896_v13 = vmax.f32 %v864_v61, 0.0 }
 0x193   :  { %v727_v4 = vadd.f32 1e-05, %v663_v23  ;;  %v389_v21 = vpop.xlane.xlu1 %388  ;;  %v862_v20 = vadd.f32 %v2647_v60, %v825_v49  ;;  %v698_v16 = vsub.f32 %v2407_v36, %v2615_v30  ;;  %v895_v29 = vmax.f32 %v863_v5, 0.0 }
 0x194   :  { %2126 = vrsqrt.f32 %v728_v63  ;;  %v387_v8 = vpop.xlane.xlu0 %386  ;;  %v861_v26 = vadd.f32 %v2647_v60, %v824_v3  ;;  %v606_v52 = vmul.f32 %v2654_v7, %v2654_v7  ;;  %v2663_v24 = vmul.f32 0.0078125, %v389_v21 }
 0x195   :  { %2128 = vrsqrt.f32 %v727_v4  ;;  %v894_v11 = vmax.f32 %v862_v20, 0.0  ;;  %v605_v44 = vmul.f32 %v2657_v28, %v2657_v28  ;;  %v2667_v45 = vmul.f32 0.0078125, %v387_v8 }
 0x196   :  { %v893_v15 = vmax.f32 %v861_v26, 0.0  ;;  %v926_v19 = vpack.c.bf16 %v896_v13, %v895_v29  ;;  %v697_v36 = vsub.f32 %v2410_v39, %v2617_v37  ;;  %v696_v23 = vsub.f32 %v2415_v42, %v2622_v47 }
 0x197   :  { %v522_v17 = vpop.xlane.xlu1 %521  ;;  %v604_v3 = vmul.f32 %v2663_v24, %v2663_v24  ;;  %v603_v39 = vmul.f32 %v2667_v45, %v2667_v45  ;;  %v695_v42 = vsub.f32 %v2418_v43, %v2627_v57 }
 0x198   :  { %v574_v32 = vmul.f32 0.0078125, %v522_v17  ;;  %v520_v38 = vpop.xlane.xlu0 %519  ;;  %v925_v40 = vpack.c.bf16 %v894_v11, %v893_v15 }
 0x199   :  { %v573_v51 = vmul.f32 0.0078125, %v520_v38 }
 0x19a   :  { %v2123_v53 = vpop.eup %2122  ;;  %v638_v30 = vsub.f32 %v574_v32, %v606_v52  ;;  %2020 = vmatprep.mubr.bf16.mxu1 %v925_v40 }
 0x19b   :  { %v2125_v55 = vpop.eup %2124  ;;  %v637_v49 = vsub.f32 %v573_v51, %v605_v44  ;;  %v518_v61 = vpop.xlane.xlu1 %517  ;;  %2021 = vmatmul.mubr.bf16.vlgmr.msra.gmra.mrb[0].mxu1 %v926_v19  ;;  %v794_v63 = vmul.f32 %v2123_v53, %v698_v16 }
 0x19c   :  { %v670_v4 = vmax.f32 %v638_v30, 0.0  ;;  %v572_v21 = vmul.f32 0.0078125, %v518_v61  ;;  %v516_v20 = vpop.xlane.xlu0 %515  ;;  %v793_v5 = vmul.f32 %v2125_v55, %v697_v36 }
 0x19d   :  { %v669_v37 = vmax.f32 %v637_v49, 0.0  ;;  %v571_v8 = vmul.f32 0.0078125, %v516_v20  ;;  %v831_v26 = vmul.f32 %v2636_v10, %v794_v63 }
 0x19e   :  { %v2127_v11 = vpop.eup %2126  ;;  %v734_v47 = vadd.f32 1e-05, %v670_v4  ;;  %v636_v13 = vsub.f32 %v572_v21, %v604_v3  ;;  %v830_v44 = vmul.f32 %v2636_v10, %v793_v5 }
 0x19f   :  { %v2129_v15 = vpop.eup %2128  ;;  %v733_v16 = vadd.f32 1e-05, %v669_v37  ;;  %v635_v17 = vsub.f32 %v571_v8, %v603_v39  ;;  %v401_v29 = vpop.xlane.xlu1 %400  ;;  %v792_v52 = vmul.f32 %v2127_v11, %v696_v23  ;;  %v868_v53 = vadd.f32 %v2647_v60, %v831_v26 }
 0x1a0   :  { %2130 = vrsqrt.f32 %v734_v47  ;;  %v668_v32 = vmax.f32 %v636_v13, 0.0  ;;  %v399_v38 = vpop.xlane.xlu0 %398  ;;  %v791_v40 = vmul.f32 %v2129_v15, %v695_v42  ;;  %v2685_v23 = vmul.f32 0.0078125, %v401_v29 }
 0x1a1   :  { %2132 = vrsqrt.f32 %v733_v16  ;;  %v667_v51 = vmax.f32 %v635_v17, 0.0  ;;  %v829_v19 = vmul.f32 %v2636_v10, %v792_v52  ;;  %v867_v63 = vadd.f32 %v2647_v60, %v830_v44 }
 0x1a2   :  { %v732_v43 = vadd.f32 1e-05, %v668_v32  ;;  %v828_v57 = vmul.f32 %v2636_v10, %v791_v40  ;;  %v2689_v3 = vmul.f32 0.0078125, %v399_v38  ;;  %v900_v21 = vmax.f32 %v868_v53, 0.0 }
 0x1a3   :  { %v731_v36 = vadd.f32 1e-05, %v667_v51  ;;  %v397_v30 = vpop.xlane.xlu1 %396  ;;  %v866_v55 = vadd.f32 %v2647_v60, %v829_v19  ;;  %v899_v5 = vmax.f32 %v867_v63, 0.0  ;;  %v702_v39 = vsub.f32 %v2443_v54, %v2654_v7 }
 0x1a4   :  { %2134 = vrsqrt.f32 %v732_v43  ;;  %v395_v49 = vpop.xlane.xlu0 %394  ;;  %v865_v61 = vadd.f32 %v2647_v60, %v828_v57  ;;  %v610_v8 = vmul.f32 %v2685_v23, %v2685_v23  ;;  %v2695_v26 = vmul.f32 0.0078125, %v397_v30 }
 0x1a5   :  { %2136 = vrsqrt.f32 %v731_v36  ;;  %v898_v4 = vmax.f32 %v866_v55, 0.0  ;;  %v609_v13 = vmul.f32 %v2689_v3, %v2689_v3  ;;  %v2699_v15 = vmul.f32 0.0078125, %v395_v49 }
 0x1a6   :  { %v897_v20 = vmax.f32 %v865_v61, 0.0  ;;  %v928_v17 = vpack.c.bf16 %v900_v21, %v899_v5  ;;  %v701_v54 = vsub.f32 %v2449_v58, %v2657_v28  ;;  %v700_v32 = vsub.f32 %v2466_v1, %v2663_v24 }
 0x1a7   :  { %v530_v37 = vpop.xlane.xlu1 %529  ;;  %v608_v51 = vmul.f32 %v2695_v26, %v2695_v26  ;;  %v607_v58 = vmul.f32 %v2699_v15, %v2699_v15  ;;  %v699_v1 = vsub.f32 %v2469_v2, %v2667_v45 }
 0x1a8   :  { %v578_v11 = vmul.f32 0.0078125, %v530_v37  ;;  %v528_v42 = vpop.xlane.xlu0 %527  ;;  %v927_v47 = vpack.c.bf16 %v898_v4, %v897_v20 }
 0x1a9   :  { %v577_v16 = vmul.f32 0.0078125, %v528_v42 }
 0x1aa   :  { %v2131_v29 = vpop.eup %2130  ;;  %v642_v7 = vsub.f32 %v578_v11, %v610_v8  ;;  %2024 = vmatprep.mubr.bf16.mxu1 %v927_v47 }
 0x1ab   :  { %v2133_v52 = vpop.eup %2132  ;;  %v641_v38 = vsub.f32 %v577_v16, %v609_v13  ;;  %v526_v40 = vpop.xlane.xlu1 %525  ;;  %2025 = vmatmul.mubr.bf16.gmra.mrb[4].mxu1 %v928_v17  ;;  %v798_v44 = vmul.f32 %v2131_v29, %v702_v39 }
 0x1ac   :  { %v674_v19 = vmax.f32 %v642_v7, 0.0  ;;  %v576_v53 = vmul.f32 0.0078125, %v526_v40  ;;  %v524_v43 = vpop.xlane.xlu0 %523  ;;  %v797_v57 = vmul.f32 %v2133_v52, %v701_v54 }
 0x1ad   :  { %v673_v28 = vmax.f32 %v641_v38, 0.0  ;;  %v575_v36 = vmul.f32 0.0078125, %v524_v43  ;;  %v835_v30 = vmul.f32 %v2636_v10, %v798_v44 }
 0x1ae   :  { %v2135_v55 = vpop.eup %2134  ;;  %v738_v24 = vadd.f32 1e-05, %v674_v19  ;;  %v640_v49 = vsub.f32 %v576_v53, %v608_v51  ;;  %v834_v8 = vmul.f32 %v2636_v10, %v797_v57  ;;  %v706_v19 = vsub.f32 %v2503_v18, %v2685_v23 }
 0x1af   :  { %v2137_v61 = vpop.eup %2136  ;;  %v737_v63 = vadd.f32 1e-05, %v673_v28  ;;  %v639_v4 = vsub.f32 %v575_v36, %v607_v58  ;;  %v409_v21 = vpop.xlane.xlu1 %408  ;;  %v796_v20 = vmul.f32 %v2135_v55, %v700_v32  ;;  %v872_v47 = vadd.f32 %v2647_v60, %v835_v30 }
 0x1b0   :  { %2138 = vrsqrt.f32 %v738_v24  ;;  %v672_v5 = vmax.f32 %v640_v49, 0.0  ;;  %v407_v39 = vpop.xlane.xlu0 %406  ;;  %v795_v37 = vmul.f32 %v2137_v61, %v699_v1  ;;  %v871_v52 = vadd.f32 %v2647_v60, %v834_v8 }
 0x1b1   :  { %2140 = vrsqrt.f32 %v737_v63  ;;  %v671_v11 = vmax.f32 %v639_v4, 0.0  ;;  %v833_v42 = vmul.f32 %v2636_v10, %v796_v20  ;;  %v904_v40 = vmax.f32 %v872_v47, 0.0 }
 0x1b2   :  { %v736_v2 = vadd.f32 1e-05, %v672_v5  ;;  %v832_v45 = vmul.f32 %v2636_v10, %v795_v37  ;;  %v903_v51 = vmax.f32 %v871_v52, 0.0  ;;  %v2725_v43 = vmul.f32 0.0078125, %v409_v21 }
 0x1b3   :  { %v735_v13 = vadd.f32 1e-05, %v671_v11  ;;  %v405_v16 = vpop.xlane.xlu1 %404  ;;  %v870_v17 = vadd.f32 %v2647_v60, %v833_v42  ;;  %v2729_v30 = vmul.f32 0.0078125, %v407_v39  ;;  %v705_v18 = vsub.f32 %v2510_v25, %v2689_v3 }
 0x1b4   :  { %2142 = vrsqrt.f32 %v736_v2  ;;  %v2717_v29 = vmul.f32 0.0078125, %v405_v16  ;;  %v403_v54 = vpop.xlane.xlu0 %402  ;;  %v869_v7 = vadd.f32 %v2647_v60, %v832_v45  ;;  %v930_v24 = vpack.c.bf16 %v904_v40, %v903_v51 }
 0x1b5   :  { %2144 = vrsqrt.f32 %v735_v13  ;;  %v2721_v32 = vmul.f32 0.0078125, %v403_v54  ;;  %v902_v38 = vmax.f32 %v870_v17, 0.0  ;;  %v704_v63 = vsub.f32 %v2528_v34, %v2695_v26 }
 0x1b6   :  { %v901_v44 = vmax.f32 %v869_v7, 0.0  ;;  %v612_v57 = vmul.f32 %v2717_v29, %v2717_v29  ;;  %v614_v5 = vmul.f32 %v2725_v43, %v2725_v43  ;;  %v613_v25 = vmul.f32 %v2729_v30, %v2729_v30 }
 0x1b7   :  { %v534_v53 = vpop.xlane.xlu1 %533  ;;  %v611_v55 = vmul.f32 %v2721_v32, %v2721_v32  ;;  %v703_v34 = vsub.f32 %v2532_v35, %v2699_v15 }
 0x1b8   :  { %v580_v58 = vmul.f32 0.0078125, %v534_v53  ;;  %v532_v28 = vpop.xlane.xlu0 %531  ;;  %v929_v36 = vpack.c.bf16 %v902_v38, %v901_v44 }
 0x1b9   :  { %v579_v1 = vmul.f32 0.0078125, %v532_v28 }
 0x1ba   :  { %v2139_v49 = vpop.eup %2138  ;;  %v644_v23 = vsub.f32 %v580_v58, %v612_v57  ;;  %2028 = vmatprep.mubr.bf16.mxu1 %v929_v36 }
 0x1bb   :  { %v2141_v61 = vpop.eup %2140  ;;  %v643_v4 = vsub.f32 %v579_v1, %v611_v55  ;;  %v538_v21 = vpop.xlane.xlu1 %537  ;;  %2029 = vmatmul.mubr.bf16.gmra.mrb[8].mxu1 %v930_v24  ;;  %v802_v20 = vmul.f32 %v2139_v49, %v706_v19 }
 0x1bc   :  { %v676_v39 = vmax.f32 %v644_v23, 0.0  ;;  %v582_v37 = vmul.f32 0.0078125, %v538_v21  ;;  %v536_v8 = vpop.xlane.xlu0 %535  ;;  %v801_v11 = vmul.f32 %v2141_v61, %v705_v18 }
 0x1bd   :  { %v675_v3 = vmax.f32 %v643_v4, 0.0  ;;  %v581_v42 = vmul.f32 0.0078125, %v536_v8  ;;  %v839_v47 = vmul.f32 %v2636_v10, %v802_v20  ;;  %v708_v4 = vsub.f32 %v2463_v0, %v2717_v29 }
 0x1be   :  { %v2143_v2 = vpop.eup %2142  ;;  %v740_v26 = vadd.f32 1e-05, %v676_v39  ;;  %v646_v45 = vsub.f32 %v582_v37, %v614_v5  ;;  %v838_v44 = vmul.f32 %v2636_v10, %v801_v11  ;;  %v707_v0 = vsub.f32 %v2452_v59, %v2721_v32 }
 0x1bf   :  { %v2145_v13 = vpop.eup %2144  ;;  %v739_v16 = vadd.f32 1e-05, %v675_v3  ;;  %v645_v17 = vsub.f32 %v581_v42, %v613_v25  ;;  %v417_v54 = vpop.xlane.xlu1 %416  ;;  %v800_v7 = vmul.f32 %v2143_v2, %v704_v63  ;;  %v876_v53 = vadd.f32 %v2647_v60, %v839_v47 }
 0x1c0   :  { %2146 = vrsqrt.f32 %v740_v26  ;;  %v678_v52 = vmax.f32 %v646_v45, 0.0  ;;  %v415_v38 = vpop.xlane.xlu0 %414  ;;  %v799_v40 = vmul.f32 %v2145_v13, %v703_v34  ;;  %v875_v24 = vadd.f32 %v2647_v60, %v838_v44 }
 0x1c1   :  { %2148 = vrsqrt.f32 %v739_v16  ;;  %v677_v51 = vmax.f32 %v645_v17, 0.0  ;;  %v837_v19 = vmul.f32 %v2636_v10, %v800_v7  ;;  %v908_v23 = vmax.f32 %v876_v53, 0.0 }
 0x1c2   :  { %v742_v35 = vadd.f32 1e-05, %v678_v52  ;;  %v836_v15 = vmul.f32 %v2636_v10, %v799_v40  ;;  %v907_v63 = vmax.f32 %v875_v24, 0.0  ;;  %v2757_v20 = vmul.f32 0.0078125, %v417_v54 }
 0x1c3   :  { %v741_v57 = vadd.f32 1e-05, %v677_v51  ;;  %v413_v58 = vpop.xlane.xlu1 %412  ;;  %v874_v28 = vadd.f32 %v2647_v60, %v837_v19  ;;  %v2761_v11 = vmul.f32 0.0078125, %v415_v38  ;;  %v710_v44 = vsub.f32 %v2459_v62, %v2725_v43 }
 0x1c4   :  { %2150 = vrsqrt.f32 %v742_v35  ;;  %v2749_v36 = vmul.f32 0.0078125, %v413_v58  ;;  %v411_v55 = vpop.xlane.xlu0 %410  ;;  %v873_v1 = vadd.f32 %v2647_v60, %v836_v15  ;;  %v932_v42 = vpack.c.bf16 %v908_v23, %v907_v63 }
 0x1c5   :  { %v2753_v49 = vmul.f32 0.0078125, %v411_v55  ;;  %v906_v18 = vmax.f32 %v874_v28, 0.0  ;;  %2152 = vrsqrt.f32 %v741_v57  ;;  %v618_v13 = vmul.f32 %v2757_v20, %v2757_v20 }
 0x1c6   :  { %v905_v61 = vmax.f32 %v873_v1, 0.0  ;;  %v616_v5 = vmul.f32 %v2749_v36, %v2749_v36  ;;  %v617_v52 = vmul.f32 %v2761_v11, %v2761_v11  ;;  %v709_v23 = vsub.f32 %v2446_v56, %v2729_v30 }
 0x1c7   :  { %v542_v21 = vpop.xlane.xlu1 %541  ;;  %v615_v25 = vmul.f32 %v2753_v49, %v2753_v49  ;;  %v712_v30 = vsub.f32 %v2493_v14, %v2749_v36  ;;  %v711_v14 = vsub.f32 %v2484_v9, %v2753_v49 }
 0x1c8   :  { %v584_v39 = vmul.f32 0.0078125, %v542_v21  ;;  %v540_v37 = vpop.xlane.xlu0 %539  ;;  %v931_v8 = vpack.c.bf16 %v906_v18, %v905_v61 }
 0x1c9   :  { %v583_v3 = vmul.f32 0.0078125, %v540_v37 }
 0x1ca   :  { %v2147_v47 = vpop.eup %2146  ;;  %v648_v29 = vsub.f32 %v584_v39, %v616_v5  ;;  %2032 = vmatprep.mubr.bf16.mxu1 %v931_v8 }
 0x1cb   :  { %v2149_v2 = vpop.eup %2148  ;;  %v647_v34 = vsub.f32 %v583_v3, %v615_v25  ;;  %v546_v26 = vpop.xlane.xlu1 %545  ;;  %2033 = vmatmul.mubr.bf16.gmra.mrb[12].mxu1 %v932_v42  ;;  %v804_v45 = vmul.f32 %v2147_v47, %v708_v4 }
 0x1cc   :  { %v680_v16 = vmax.f32 %v648_v29, 0.0  ;;  %v586_v17 = vmul.f32 0.0078125, %v546_v26  ;;  %v544_v54 = vpop.xlane.xlu0 %543  ;;  %v803_v7 = vmul.f32 %v2149_v2, %v707_v0 }
 0x1cd   :  { %v679_v38 = vmax.f32 %v647_v34, 0.0  ;;  %v585_v40 = vmul.f32 0.0078125, %v544_v54  ;;  %v841_v59 = vmul.f32 %v2636_v10, %v804_v45 }
 0x1ce   :  { %v2151_v32 = vpop.eup %2150  ;;  %v744_v51 = vadd.f32 1e-05, %v680_v16  ;;  %v650_v19 = vsub.f32 %v586_v17, %v618_v13  ;;  %v840_v53 = vmul.f32 %v2636_v10, %v803_v7 }
 0x1cf   :  { %v743_v35 = vadd.f32 1e-05, %v679_v38  ;;  %v649_v15 = vsub.f32 %v585_v40, %v617_v52  ;;  %v425_v57 = vpop.xlane.xlu1 %424  ;;  %v878_v58 = vadd.f32 %v2647_v60, %v841_v59  ;;  %v2153_v28 = vpop.eup %2152  ;;  %v806_v18 = vmul.f32 %v2151_v32, %v710_v44 }
 0x1d0   :  { %2154 = vrsqrt.f32 %v744_v51  ;;  %v682_v55 = vmax.f32 %v650_v19, 0.0  ;;  %v423_v1 = vpop.xlane.xlu0 %422  ;;  %v877_v24 = vadd.f32 %v2647_v60, %v840_v53  ;;  %v805_v5 = vmul.f32 %v2153_v28, %v709_v23 }
 0x1d1   :  { %2156 = vrsqrt.f32 %v743_v35  ;;  %v681_v62 = vmax.f32 %v649_v15, 0.0  ;;  %v910_v43 = vmax.f32 %v878_v58, 0.0  ;;  %v843_v25 = vmul.f32 %v2636_v10, %v806_v18 }
 0x1d2   :  { %v746_v61 = vadd.f32 1e-05, %v682_v55  ;;  %v909_v63 = vmax.f32 %v877_v24, 0.0  ;;  %v842_v42 = vmul.f32 %v2636_v10, %v805_v5  ;;  %v2789_v29 = vmul.f32 0.0078125, %v425_v57 }
 0x1d3   :  { %v745_v4 = vadd.f32 1e-05, %v681_v62  ;;  %v421_v21 = vpop.xlane.xlu1 %420  ;;  %v880_v56 = vadd.f32 %v2647_v60, %v843_v25  ;;  %v2793_v13 = vmul.f32 0.0078125, %v423_v1  ;;  %v714_v28 = vsub.f32 %v2490_v12, %v2757_v20 }
 0x1d4   :  { %2158 = vrsqrt.f32 %v746_v61  ;;  %v2779_v39 = vmul.f32 0.0078125, %v421_v21  ;;  %v419_v37 = vpop.xlane.xlu0 %418  ;;  %v933_v8 = vpack.c.bf16 %v910_v43, %v909_v63  ;;  %v879_v0 = vadd.f32 %v2647_v60, %v842_v42 }
 0x1d5   :  { %v2782_v3 = vmul.f32 0.0078125, %v419_v37  ;;  %2160 = vrsqrt.f32 %v745_v4  ;;  %v912_v45 = vmax.f32 %v880_v56, 0.0  ;;  %v622_v44 = vmul.f32 %v2789_v29, %v2789_v29 }
 0x1d6   :  { %2036 = vmatprep.mubr.bf16.mxu1 %v933_v8  ;;  %v620_v2 = vmul.f32 %v2779_v39, %v2779_v39  ;;  %v911_v54 = vmax.f32 %v879_v0, 0.0  ;;  %v621_v15 = vmul.f32 %v2793_v13, %v2793_v13  ;;  %v713_v37 = vsub.f32 %v2479_v6, %v2761_v11 }
 0x1d7   :  { %v550_v47 = vpop.xlane.xlu1 %549  ;;  %v619_v16 = vmul.f32 %v2782_v3, %v2782_v3 }
 0x1d8   :  { %v588_v34 = vmul.f32 0.0078125, %v550_v47  ;;  %v548_v26 = vpop.xlane.xlu0 %547  ;;  %v934_v40 = vpack.c.bf16 %v912_v45, %v911_v54 }
 0x1d9   :  { %v587_v17 = vmul.f32 0.0078125, %v548_v26 }
 0x1da   :  { %v2155_v7 = vpop.eup %2154  ;;  %v652_v36 = vsub.f32 %v588_v34, %v620_v2  ;;  %2037 = vmatmul.mubr.bf16.gmra.mrb[16].mxu1 %v934_v40 }
 0x1db   :  { %v2157_v52 = vpop.eup %2156  ;;  %v651_v38 = vsub.f32 %v587_v17, %v619_v16  ;;  %v554_v59 = vpop.xlane.xlu1 %553  ;;  %v808_v32 = vmul.f32 %v2155_v7, %v712_v30 }
 0x1dc   :  { %v684_v51 = vmax.f32 %v652_v36, 0.0  ;;  %v590_v19 = vmul.f32 0.0078125, %v554_v59  ;;  %v552_v53 = vpop.xlane.xlu0 %551  ;;  %v807_v35 = vmul.f32 %v2157_v52, %v711_v14  ;;  %v716_v36 = vsub.f32 %v2524_v33, %v2779_v39 }
 0x1dd   :  { %v683_v57 = vmax.f32 %v651_v38, 0.0  ;;  %v589_v58 = vmul.f32 0.0078125, %v552_v53  ;;  %v845_v9 = vmul.f32 %v2636_v10, %v808_v32  ;;  %v718_v32 = vsub.f32 %v2520_v31, %v2789_v29 }
 0x1de   :  { %v2159_v49 = vpop.eup %2158  ;;  %v748_v55 = vadd.f32 1e-05, %v684_v51  ;;  %v654_v1 = vsub.f32 %v590_v19, %v622_v44  ;;  %v844_v24 = vmul.f32 %v2636_v10, %v807_v35  ;;  %v715_v44 = vsub.f32 %v2513_v27, %v2782_v3 }
 0x1df   :  { %v747_v18 = vadd.f32 1e-05, %v683_v57  ;;  %v653_v23 = vsub.f32 %v589_v58, %v621_v15  ;;  %v433_v62 = vpop.xlane.xlu1 %432  ;;  %v882_v43 = vadd.f32 %v2647_v60, %v845_v9  ;;  %v2161_v61 = vpop.eup %2160  ;;  %v810_v5 = vmul.f32 %v2159_v49, %v714_v28 }
 0x1e0   :  { %2162 = vrsqrt.f32 %v748_v55  ;;  %v686_v63 = vmax.f32 %v654_v1, 0.0  ;;  %v431_v4 = vpop.xlane.xlu0 %430  ;;  %v881_v21 = vadd.f32 %v2647_v60, %v844_v24  ;;  %v809_v30 = vmul.f32 %v2161_v61, %v713_v37 }
 0x1e1   :  { %2164 = vrsqrt.f32 %v747_v18  ;;  %v685_v12 = vmax.f32 %v653_v23, 0.0  ;;  %v914_v20 = vmax.f32 %v882_v43, 0.0  ;;  %v847_v34 = vmul.f32 %v2636_v10, %v810_v5 }
 0x1e2   :  { %v750_v8 = vadd.f32 1e-05, %v686_v63  ;;  %v913_v25 = vmax.f32 %v881_v21, 0.0  ;;  %v846_v6 = vmul.f32 %v2636_v10, %v809_v30  ;;  %v2829_v51 = vmul.f32 0.0078125, %v433_v62 }
 0x1e3   :  { %v749_v42 = vadd.f32 1e-05, %v685_v12  ;;  %v429_v56 = vpop.xlane.xlu1 %428  ;;  %v884_v11 = vadd.f32 %v2647_v60, %v847_v34  ;;  %v2831_v35 = vmul.f32 0.0078125, %v431_v4  ;;  %v717_v24 = vsub.f32 %v2506_v22, %v2793_v13 }
 0x1e4   :  { %2166 = vrsqrt.f32 %v750_v8  ;;  %v2811_v47 = vmul.f32 0.0078125, %v429_v56  ;;  %v427_v0 = vpop.xlane.xlu0 %426  ;;  %v935_v2 = vpack.c.bf16 %v914_v20, %v913_v25  ;;  %v883_v16 = vadd.f32 %v2647_v60, %v846_v6 }
 0x1e5   :  { %2168 = vrsqrt.f32 %v749_v42  ;;  %v2814_v26 = vmul.f32 0.0078125, %v427_v0  ;;  %v916_v14 = vmax.f32 %v884_v11, 0.0  ;;  %v626_v58 = vmul.f32 %v2829_v51, %v2829_v51 }
 0x1e6   :  { %2040 = vmatprep.mubr.bf16.mxu1 %v935_v2  ;;  %v624_v17 = vmul.f32 %v2811_v47, %v2811_v47  ;;  %v915_v40 = vmax.f32 %v883_v16, 0.0  ;;  %v625_v27 = vmul.f32 %v2831_v35, %v2831_v35 }
 0x1e7   :  { %v558_v45 = vpop.xlane.xlu1 %557  ;;  %v623_v52 = vmul.f32 %v2814_v26, %v2814_v26 }
 0x1e8   :  { %v592_v54 = vmul.f32 0.0078125, %v558_v45  ;;  %v556_v7 = vpop.xlane.xlu0 %555  ;;  %v936_v33 = vpack.c.bf16 %v916_v14, %v915_v40  ;;  %v720_v45 = vsub.f32 %v2553_v50, %v2811_v47  ;;  %v721_v40 = vsub.f32 %v2542_v41, %v2831_v35 }
 0x1e9   :  { %v591_v38 = vmul.f32 0.0078125, %v556_v7 }
 0x1ea   :  { %v2163_v59 = vpop.eup %2162  ;;  %v656_v19 = vsub.f32 %v592_v54, %v624_v17  ;;  %2041 = vmatmul.mubr.bf16.gmra.mrb[20].mxu1 %v936_v33  ;;  %v719_v17 = vsub.f32 %v2547_v46, %v2814_v26 }
 0x1eb   :  { %v2165_v53 = vpop.eup %2164  ;;  %v655_v15 = vsub.f32 %v591_v38, %v623_v52  ;;  %v562_v39 = vpop.xlane.xlu1 %561  ;;  %v812_v57 = vmul.f32 %v2163_v59, %v716_v36  ;;  %v722_v36 = vsub.f32 %v2550_v48, %v2829_v51 }
 0x1ec   :  { %v688_v9 = vmax.f32 %v656_v19, 0.0  ;;  %v594_v49 = vmul.f32 0.0078125, %v562_v39  ;;  %v560_v28 = vpop.xlane.xlu0 %559  ;;  %v811_v31 = vmul.f32 %v2165_v53, %v715_v44 }
 0x1ed   :  { %v687_v3 = vmax.f32 %v655_v15, 0.0  ;;  %v593_v29 = vmul.f32 0.0078125, %v560_v28  ;;  %v849_v55 = vmul.f32 %v2636_v10, %v812_v57  ;;  %v2866_v57 = vld [vmem:[%s3393_s3 + $0x3] ss:$0 sm:$0xff] }
 0x1ee   :  { %v2167_v1 = vpop.eup %2166  ;;  %v752_v18 = vadd.f32 1e-05, %v688_v9  ;;  %v658_v23 = vsub.f32 %v594_v49, %v626_v58  ;;  %v848_v62 = vmul.f32 %v2636_v10, %v811_v31 }
 0x1ef   :  { %v2169_v43 = vpop.eup %2168  ;;  %v751_v61 = vadd.f32 1e-05, %v687_v3  ;;  %v657_v63 = vsub.f32 %v593_v29, %v625_v27  ;;  %v886_v4 = vadd.f32 %v2647_v60, %v849_v55  ;;  %v814_v21 = vmul.f32 %v2167_v1, %v718_v32 }
 0x1f0   :  { %2170 = vrsqrt.f32 %v752_v18  ;;  %v690_v5 = vmax.f32 %v658_v23, 0.0  ;;  %v885_v37 = vadd.f32 %v2647_v60, %v848_v62  ;;  %v813_v12 = vmul.f32 %v2169_v43, %v717_v24 }
 0x1f1   :  { %2172 = vrsqrt.f32 %v751_v61  ;;  %v689_v20 = vmax.f32 %v657_v63, 0.0  ;;  %v918_v8 = vmax.f32 %v886_v4, 0.0  ;;  %v851_v22 = vmul.f32 %v2636_v10, %v814_v21 }
 0x1f2   :  { %v754_v13 = vadd.f32 1e-05, %v690_v5  ;;  %v917_v25 = vmax.f32 %v885_v37, 0.0  ;;  %v850_v42 = vmul.f32 %v2636_v10, %v813_v12 }
 0x1f3   :  { %v753_v56 = vadd.f32 1e-05, %v689_v20  ;;  %v888_v30 = vadd.f32 %v2647_v60, %v851_v22 }
 0x1f4   :  { %2174 = vrsqrt.f32 %v754_v13  ;;  %v937_v0 = vpack.c.bf16 %v918_v8, %v917_v25  ;;  %v887_v2 = vadd.f32 %v2647_v60, %v850_v42 }
 0x1f5   :  { %2176 = vrsqrt.f32 %v753_v56  ;;  %v920_v34 = vmax.f32 %v888_v30, 0.0 }
 0x1f6   :  { %2044 = vmatprep.mubr.bf16.mxu1 %v937_v0  ;;  %v919_v6 = vmax.f32 %v887_v2, 0.0 }
 0x1f8   :  { %v938_v11 = vpack.c.bf16 %v920_v34, %v919_v6 }
 0x1fa   :  { %v2171_v16 = vpop.eup %2170  ;;  %2045 = vmatmul.mubr.bf16.gmra.mrb[24].mxu1 %v938_v11 }
 0x1fb   :  { %v2173_v54 = vpop.eup %2172  ;;  %v816_v7 = vmul.f32 %v2171_v16, %v720_v45 }
 0x1fc   :  { %v815_v14 = vmul.f32 %v2173_v54, %v719_v17 }
 0x1fd   :  { %v853_v52 = vmul.f32 %v2636_v10, %v816_v7 }
 0x1fe   :  { %v2175_v38 = vpop.eup %2174  ;;  %v852_v59 = vmul.f32 %v2636_v10, %v815_v14 }
 0x1ff   :  { %v2177_v50 = vpop.eup %2176  ;;  %v890_v47 = vadd.f32 %v2647_v60, %v853_v52  ;;  %v818_v32 = vmul.f32 %v2175_v38, %v722_v36 }
 0x200   :  { %v889_v46 = vadd.f32 %v2647_v60, %v852_v59  ;;  %v817_v26 = vmul.f32 %v2177_v50, %v721_v40 }
 0x201   :  { %v922_v44 = vmax.f32 %v890_v47, 0.0  ;;  %v855_v19 = vmul.f32 %v2636_v10, %v818_v32 }
 0x202   :  { %v921_v53 = vmax.f32 %v889_v46, 0.0  ;;  %v854_v48 = vmul.f32 %v2636_v10, %v817_v26 }
 0x203   :  { %v892_v51 = vadd.f32 %v2647_v60, %v855_v19 }
 0x204   :  { %v939_v15 = vpack.c.bf16 %v922_v44, %v921_v53  ;;  %v891_v41 = vadd.f32 %v2647_v60, %v854_v48 }
 0x205   :  { %v924_v35 = vmax.f32 %v892_v51, 0.0 }
 0x206   :  { %2048 = vmatprep.mubr.bf16.mxu1 %v939_v15  ;;  %v923_v33 = vmax.f32 %v891_v41, 0.0 }
 0x208   :  { %v940_v39 = vpack.c.bf16 %v924_v35, %v923_v33 }
 0x20a   :  { %2049 = vmatmul.mubr.bf16.gmra.mrb[28].mxu1 %v940_v39 }
 0x26e   :  { %v2022_v58 = vpop.f32.mrb[0].mxu1 }
 0x26f   :  { %v2869_v9 = vadd.f32 %v2022_v58, %v2866_v57  ;;  %v1044_v10 = vpop.f32.mrb[1].mxu1 }
 0x270   :  { %v2023_v49 = vpop.f32.mrb[2].mxu1  ;;  %v2876_v31 = vadd.f32 %v2866_v57, %v1044_v10 }
 0x271   :  { %v2872_v28 = vadd.f32 %v2023_v49, %v2866_v57  ;;  %1175 = vadd.xlane.f32.xlu0 %v2869_v9  ;;  %v1047_v60 = vpop.f32.mrb[3].mxu1  ;;  %v1269_v3 = vmul.f32 %v2869_v9, %v2869_v9 }
 0x272   :  { %v2880_v27 = vadd.f32 %v2866_v57, %v1047_v60  ;;  %v1267_v55 = vmul.f32 %v2876_v31, %v2876_v31 }
 0x273   :  { %1177 = vadd.xlane.f32.xlu1 %v2872_v28  ;;  %v1270_v29 = vmul.f32 %v2872_v28, %v2872_v28 }
 0x274   :  { %v1268_v1 = vmul.f32 %v2880_v27, %v2880_v27 }
 0x275   :  { %1171 = vadd.xlane.f32.xlu0 %v2876_v31 }
 0x277   :  { %1173 = vadd.xlane.f32.xlu1 %v2880_v27 }
 0x279   :  { %1303 = vadd.xlane.f32.xlu0 %v1269_v3 }
 0x27b   :  { %1305 = vadd.xlane.f32.xlu1 %v1270_v29 }
 0x27d   :  { %1299 = vadd.xlane.f32.xlu0 %v1267_v55 }
 0x27e   :  { %v2026_v24 = vpop.f32.mrb[4].mxu1 }
 0x27f   :  { %v2893_v18 = vadd.f32 %v2026_v24, %v2866_v57  ;;  %1301 = vadd.xlane.f32.xlu1 %v1268_v1  ;;  %v1060_v23 = vpop.f32.mrb[5].mxu1 }
 0x280   :  { %v2027_v62 = vpop.f32.mrb[6].mxu1  ;;  %v2900_v63 = vadd.f32 %v2866_v57, %v1060_v23 }
 0x281   :  { %v2896_v43 = vadd.f32 %v2027_v62, %v2866_v57  ;;  %1183 = vadd.xlane.f32.xlu0 %v2893_v18  ;;  %v1063_v61 = vpop.f32.mrb[7].mxu1  ;;  %v1273_v21 = vmul.f32 %v2893_v18, %v2893_v18 }
 0x282   :  { %v2904_v4 = vadd.f32 %v2866_v57, %v1063_v61  ;;  %v1271_v37 = vmul.f32 %v2900_v63, %v2900_v63 }
 0x283   :  { %1185 = vadd.xlane.f32.xlu1 %v2896_v43  ;;  %v1274_v5 = vmul.f32 %v2896_v43, %v2896_v43 }
 0x284   :  { %v1272_v12 = vmul.f32 %v2904_v4, %v2904_v4 }
 0x285   :  { %1179 = vadd.xlane.f32.xlu0 %v2900_v63 }
 0x287   :  { %1181 = vadd.xlane.f32.xlu1 %v2904_v4 }
 0x289   :  { %1311 = vadd.xlane.f32.xlu0 %v1273_v21 }
 0x28b   :  { %1313 = vadd.xlane.f32.xlu1 %v1274_v5 }
 0x28d   :  { %1307 = vadd.xlane.f32.xlu0 %v1271_v37 }
 0x28e   :  { %v2030_v20 = vpop.f32.mrb[8].mxu1 }
 0x28f   :  { %v2917_v8 = vadd.f32 %v2030_v20, %v2866_v57  ;;  %1309 = vadd.xlane.f32.xlu1 %v1272_v12  ;;  %v1076_v22 = vpop.f32.mrb[9].mxu1 }
 0x290   :  { %v2031_v13 = vpop.f32.mrb[10].mxu1  ;;  %v2924_v56 = vadd.f32 %v2866_v57, %v1076_v22 }
 0x291   :  { %v2920_v25 = vadd.f32 %v2031_v13, %v2866_v57  ;;  %1191 = vadd.xlane.f32.xlu0 %v2917_v8  ;;  %v1079_v42 = vpop.f32.mrb[11].mxu1  ;;  %v1277_v0 = vmul.f32 %v2917_v8, %v2917_v8 }
 0x292   :  { %v2928_v30 = vadd.f32 %v2866_v57, %v1079_v42  ;;  %v1275_v34 = vmul.f32 %v2924_v56, %v2924_v56 }
 0x293   :  { %1193 = vadd.xlane.f32.xlu1 %v2920_v25  ;;  %v1278_v2 = vmul.f32 %v2920_v25, %v2920_v25 }
 0x294   :  { %v1276_v6 = vmul.f32 %v2928_v30, %v2928_v30 }
 0x295   :  { %1187 = vadd.xlane.f32.xlu0 %v2924_v56 }
 0x297   :  { %1189 = vadd.xlane.f32.xlu1 %v2928_v30 }
 0x299   :  { %1319 = vadd.xlane.f32.xlu0 %v1277_v0 }
 0x29b   :  { %1321 = vadd.xlane.f32.xlu1 %v1278_v2 }
 0x29d   :  { %1315 = vadd.xlane.f32.xlu0 %v1275_v34 }
 0x29e   :  { %v2940_v11 = vpop.f32.mrb[12].mxu1 }
 0x29f   :  { %1317 = vadd.xlane.f32.xlu1 %v1276_v6  ;;  %v1092_v45 = vpop.f32.mrb[13].mxu1 }
 0x2a0   :  { %v2943_v16 = vadd.f32 %v2866_v57, %v1092_v45  ;;  %v2945_v17 = vpop.f32.mrb[14].mxu1 }
 0x2a1   :  { %v1095_v54 = vpop.f32.mrb[15].mxu1 }
 0x2a2   :  { %v2948_v7 = vadd.f32 %v2866_v57, %v1095_v54  ;;  %1195 = vadd.xlane.f32.xlu0 %v2943_v16  ;;  %v1279_v42 = vmul.f32 %v2943_v16, %v2943_v16 }
 0x2a4   :  { %1197 = vadd.xlane.f32.xlu1 %v2948_v7  ;;  %v1280_v0 = vmul.f32 %v2948_v7, %v2948_v7 }
 0x2ad   :  { %v2038_v14 = vpop.f32.mrb[16].mxu1 }
 0x2ae   :  { %v2953_v36 = vadd.f32 %v2038_v14, %v2866_v57  ;;  %v1108_v52 = vpop.f32.mrb[17].mxu1 }
 0x2af   :  { %v2039_v38 = vpop.f32.mrb[18].mxu1  ;;  %v2960_v50 = vadd.f32 %v2866_v57, %v1108_v52  ;;  %v3050_v52 = vadd.f32 %v2940_v11, %v2866_v57 }
 0x2b0   :  { %v2956_v40 = vadd.f32 %v2039_v38, %v2866_v57  ;;  %1207 = vadd.xlane.f32.xlu0 %v2953_v36  ;;  %v1111_v59 = vpop.f32.mrb[19].mxu1  ;;  %v1285_v32 = vmul.f32 %v2953_v36, %v2953_v36  ;;  %v3054_v38 = vadd.f32 %v2945_v17, %v2866_v57 }
 0x2b1   :  { %v2964_v47 = vadd.f32 %v2866_v57, %v1111_v59  ;;  %v1283_v26 = vmul.f32 %v2960_v50, %v2960_v50  ;;  %3402 = vst [vmem:[#allocation7_spill] sm:$0xff] %v3050_v52  ;;  %v1281_v11 = vmul.f32 %v3050_v52, %v3050_v52 }
 0x2b2   :  { %1209 = vadd.xlane.f32.xlu1 %v2956_v40  ;;  %v1286_v46 = vmul.f32 %v2956_v40, %v2956_v40  ;;  %3403 = vst [vmem:[#allocation8_spill] sm:$0xff] %v3054_v38 }
 0x2b3   :  { %v1284_v44 = vmul.f32 %v2964_v47, %v2964_v47 }
 0x2b4   :  { %1203 = vadd.xlane.f32.xlu0 %v2960_v50 }
 0x2b6   :  { %1205 = vadd.xlane.f32.xlu1 %v2964_v47 }
 0x2b8   :  { %1335 = vadd.xlane.f32.xlu0 %v1285_v32 }
 0x2ba   :  { %1337 = vadd.xlane.f32.xlu1 %v1286_v46 }
 0x2bc   :  { %1331 = vadd.xlane.f32.xlu0 %v1283_v26 }
 0x2bd   :  { %v2042_v19 = vpop.f32.mrb[20].mxu1 }
 0x2be   :  { %v2977_v53 = vadd.f32 %v2042_v19, %v2866_v57  ;;  %1333 = vadd.xlane.f32.xlu1 %v1284_v44  ;;  %v1124_v48 = vpop.f32.mrb[21].mxu1 }
 0x2bf   :  { %v2043_v51 = vpop.f32.mrb[22].mxu1  ;;  %v2984_v35 = vadd.f32 %v2866_v57, %v1124_v48 }
 0x2c0   :  { %v2980_v15 = vadd.f32 %v2043_v51, %v2866_v57  ;;  %1215 = vadd.xlane.f32.xlu0 %v2977_v53  ;;  %v1127_v41 = vpop.f32.mrb[23].mxu1  ;;  %v1289_v39 = vmul.f32 %v2977_v53, %v2977_v53 }
 0x2c1   :  { %v2988_v33 = vadd.f32 %v2866_v57, %v1127_v41  ;;  %v1287_v10 = vmul.f32 %v2984_v35, %v2984_v35 }
 0x2c2   :  { %1217 = vadd.xlane.f32.xlu1 %v2980_v15  ;;  %v1290_v58 = vmul.f32 %v2980_v15, %v2980_v15 }
 0x2c3   :  { %v1288_v29 = vmul.f32 %v2988_v33, %v2988_v33 }
 0x2c4   :  { %1211 = vadd.xlane.f32.xlu0 %v2984_v35 }
 0x2c6   :  { %1213 = vadd.xlane.f32.xlu1 %v2988_v33 }
 0x2c8   :  { %1343 = vadd.xlane.f32.xlu0 %v1289_v39 }
 0x2ca   :  { %1345 = vadd.xlane.f32.xlu1 %v1290_v58 }
 0x2cc   :  { %1339 = vadd.xlane.f32.xlu0 %v1287_v10 }
 0x2cd   :  { %v2046_v49 = vpop.f32.mrb[24].mxu1 }
 0x2ce   :  { %v1140_v60 = vpop.f32.mrb[25].mxu1  ;;  %v2999_v3 = vadd.f32 %v2046_v49, %v2866_v57  ;;  %1341 = vadd.xlane.f32.xlu1 %v1288_v29 }
 0x2cf   :  { %v2047_v55 = vpop.f32.mrb[26].mxu1  ;;  %v3008_v23 = vadd.f32 %v2866_v57, %v1140_v60 }
 0x2d0   :  { %v1143_v1 = vpop.f32.mrb[27].mxu1  ;;  %v3004_v24 = vadd.f32 %v2047_v55, %v2866_v57  ;;  %1223 = vadd.xlane.f32.xlu0 %v2999_v3  ;;  %v1293_v61 = vmul.f32 %v2999_v3, %v2999_v3 }
 0x2d1   :  { %v3012_v62 = vadd.f32 %v2866_v57, %v1143_v1  ;;  %v1291_v5 = vmul.f32 %v3008_v23, %v3008_v23 }
 0x2d2   :  { %1225 = vadd.xlane.f32.xlu1 %v3004_v24  ;;  %v1294_v21 = vmul.f32 %v3004_v24, %v3004_v24 }
 0x2d3   :  { %v1292_v20 = vmul.f32 %v3012_v62, %v3012_v62 }
 0x2d4   :  { %1219 = vadd.xlane.f32.xlu0 %v3008_v23 }
 0x2d6   :  { %1221 = vadd.xlane.f32.xlu1 %v3012_v62 }
 0x2d8   :  { %1351 = vadd.xlane.f32.xlu0 %v1293_v61 }
 0x2da   :  { %1353 = vadd.xlane.f32.xlu1 %v1294_v21 }
 0x2dc   :  { %1347 = vadd.xlane.f32.xlu0 %v1291_v5 }
 0x2dd   :  { %v2050_v37 = vpop.f32.mrb[28].mxu1 }
 0x2de   :  { %v1156_v12 = vpop.f32.mrb[29].mxu1  ;;  %1349 = vadd.xlane.f32.xlu1 %v1292_v20  ;;  %v3029_v2 = vadd.f32 %v2050_v37, %v2866_v57 }
 0x2df   :  { %v2051_v22 = vpop.f32.mrb[30].mxu1  ;;  %v3036_v6 = vadd.f32 %v2866_v57, %v1156_v12 }
 0x2e0   :  { %v1159_v13 = vpop.f32.mrb[31].mxu1  ;;  %1323 = vadd.xlane.f32.xlu0 %v1279_v42  ;;  %v3032_v34 = vadd.f32 %v2051_v22, %v2866_v57  ;;  %v1297_v59 = vmul.f32 %v3029_v2, %v3029_v2 }
 0x2e1   :  { %v3040_v45 = vadd.f32 %v2866_v57, %v1159_v13  ;;  %v1295_v54 = vmul.f32 %v3036_v6, %v3036_v6  ;;  %v1282_v57 = vmul.f32 %v3054_v38, %v3054_v38 }
 0x2e2   :  { %1325 = vadd.xlane.f32.xlu1 %v1280_v0  ;;  %3401 = vst [vmem:[#allocation6_spill] sm:$0xff] %v3032_v34  ;;  %v1298_v32 = vmul.f32 %v3032_v34, %v3032_v34 }
 0x2e3   :  { %v1296_v14 = vmul.f32 %v3040_v45, %v3040_v45 }
 0x2e4   :  { %1231 = vadd.xlane.f32.xlu0 %v3029_v2 }
 0x2e6   :  { %1233 = vadd.xlane.f32.xlu1 %v3032_v34 }
 0x2e8   :  { %1227 = vadd.xlane.f32.xlu0 %v3036_v6 }
 0x2ea   :  { %1229 = vadd.xlane.f32.xlu1 %v3040_v45 }
 0x2ec   :  { %1355 = vadd.xlane.f32.xlu0 %v1295_v54 }
 0x2ee   :  { %1357 = vadd.xlane.f32.xlu1 %v1296_v14 }
 0x2f0   :  { %1199 = vadd.xlane.f32.xlu0 %v3050_v52 }
 0x2f2   :  { %1201 = vadd.xlane.f32.xlu1 %v3054_v38 }
 0x2f4   :  { %1359 = vadd.xlane.f32.xlu0 %v1297_v59 }
 0x2f6   :  { %1361 = vadd.xlane.f32.xlu1 %v1298_v32 }
 0x2f8   :  { %1327 = vadd.xlane.f32.xlu0 %v1281_v11 }
 0x2fa   :  { %1329 = vadd.xlane.f32.xlu1 %v1282_v57 }
 0x2fe   :  { %v1176_v17 = vpop.xlane.xlu0 %1175 }
 0x2ff   :  { %v1237_v44 = vmul.f32 0.0078125, %v1176_v17 }
 0x300   :  { %v1178_v46 = vpop.xlane.xlu1 %1177 }
 0x301   :  { %v1238_v48 = vmul.f32 0.0078125, %v1178_v46  ;;  %v1397_v41 = vmul.f32 %v1237_v44, %v1237_v44  ;;  %v1493_v32 = vsub.f32 %v2869_v9, %v1237_v44 }
 0x302   :  { %v3066_v26 = vpop.xlane.xlu0 %1171 }
 0x303   :  { %v1398_v10 = vmul.f32 %v1238_v48, %v1238_v48 }
 0x304   :  { %v3068_v19 = vpop.xlane.xlu1 %1173 }
 0x305   :  { %v3117_v38 = vmul.f32 0.0078125, %v3068_v19 }
 0x306   :  { %v1304_v51 = vpop.xlane.xlu0 %1303 }
 0x307   :  { %v1365_v39 = vmul.f32 0.0078125, %v1304_v51  ;;  %v1396_v19 = vmul.f32 %v3117_v38, %v3117_v38 }
 0x308   :  { %v1306_v58 = vpop.xlane.xlu1 %1305 }
 0x309   :  { %v1429_v49 = vsub.f32 %v1365_v39, %v1397_v41  ;;  %v1366_v60 = vmul.f32 0.0078125, %v1306_v58  ;;  %v1494_v41 = vsub.f32 %v2872_v28, %v1238_v48  ;;  %v3085_v58 = vld [vmem:[%s3393_s3 + $0x4] ss:$0 sm:$0xff]  ;;  %v3093_v28 = vld [vmem:[%s3393_s3 + $0x5] ss:$0 sm:$0xff] }
 0x30a   :  { %v3070_v29 = vpop.xlane.xlu0 %1299 }
 0x30b   :  { %v1461_v55 = vmax.f32 %v1429_v49, 0.0  ;;  %v1430_v1 = vsub.f32 %v1366_v60, %v1398_v10 }
 0x30c   :  { %v3072_v61 = vpop.xlane.xlu1 %1301 }
 0x30d   :  { %v1525_v21 = vadd.f32 1e-05, %v1461_v55  ;;  %v1462_v5 = vmax.f32 %v1430_v1, 0.0 }
 0x30e   :  { %v1184_v37 = vpop.xlane.xlu0 %1183 }
 0x30f   :  { %2178 = vrsqrt.f32 %v1525_v21  ;;  %v1526_v12 = vadd.f32 1e-05, %v1462_v5  ;;  %v1241_v13 = vmul.f32 0.0078125, %v1184_v37 }
 0x310   :  { %v1186_v20 = vpop.xlane.xlu1 %1185 }
 0x311   :  { %2180 = vrsqrt.f32 %v1526_v12  ;;  %v1242_v0 = vmul.f32 0.0078125, %v1186_v20  ;;  %v1401_v14 = vmul.f32 %v1241_v13, %v1241_v13 }
 0x312   :  { %v3074_v22 = vpop.xlane.xlu0 %1179 }
 0x313   :  { %v1402_v17 = vmul.f32 %v1242_v0, %v1242_v0 }
 0x314   :  { %v3076_v42 = vpop.xlane.xlu1 %1181 }
 0x316   :  { %v1312_v54 = vpop.xlane.xlu0 %1311 }
 0x317   :  { %v1369_v59 = vmul.f32 0.0078125, %v1312_v54 }
 0x318   :  { %v1314_v11 = vpop.xlane.xlu1 %1313 }
 0x319   :  { %v2179_v57 = vpop.eup %2178  ;;  %v1433_v46 = vsub.f32 %v1369_v59, %v1401_v14  ;;  %v1370_v51 = vmul.f32 0.0078125, %v1314_v11 }
 0x31a   :  { %v3080_v39 = vpop.xlane.xlu0 %1307  ;;  %v1589_v10 = vmul.f32 %v2179_v57, %v1493_v32 }
 0x31b   :  { %v2181_v49 = vpop.eup %2180  ;;  %v1465_v60 = vmax.f32 %v1433_v46, 0.0  ;;  %v1434_v55 = vsub.f32 %v1370_v51, %v1402_v17 }
 0x31c   :  { %v3087_v1 = vpop.xlane.xlu1 %1309  ;;  %v1590_v9 = vmul.f32 %v2181_v49, %v1494_v41  ;;  %v1626_v5 = vmul.f32 %v3085_v58, %v1589_v10 }
 0x31d   :  { %v1529_v44 = vadd.f32 1e-05, %v1465_v60  ;;  %v1466_v21 = vmax.f32 %v1434_v55, 0.0  ;;  %v1497_v60 = vsub.f32 %v2893_v18, %v1241_v13  ;;  %v3114_v13 = vmul.f32 0.0078125, %v3066_v26 }
 0x31e   :  { %v1192_v37 = vpop.xlane.xlu0 %1191  ;;  %v1627_v48 = vmul.f32 %v3085_v58, %v1590_v9  ;;  %v1663_v54 = vadd.f32 %v3093_v28, %v1626_v5  ;;  %v3108_v9 = vld [vmem:[%s3394_s4] sm:$0x1]  ;;  %v1364_v26 = vmul.f32 0.0078125, %v3072_v61  ;;  %s2268_s4 = smov [#allocation3]  }
 0x31f   :  { %2182 = vrsqrt.f32 %v1529_v44  ;;  %v1530_v12 = vadd.f32 1e-05, %v1466_v21  ;;  %v1245_v32 = vmul.f32 0.0078125, %v1192_v37  ;;  %3404 = vst [vmem:[#allocation9_spill] sm:$0xff] %v3108_v9  ;;  %1966 = vmatprep.mubr.f32.mxu0 %v3108_v9  ;;  %s1836_s8 = sshll.u32 %s2268_s4, 4  ;;  %s1837_s8 = int_to_ptr.vmem [resolvable:$true] %s1836_s8 }
 0x320   :  { %v1194_v20 = vpop.xlane.xlu1 %1193  ;;  %v1664_v14 = vadd.f32 %v3093_v28, %v1627_v48  ;;  %v1695_v17 = vmax.f32 %v1663_v54, 0.0  ;;  %v1498_v48 = vsub.f32 %v2896_v43, %v1242_v0  ;;  %s2242_s0 = scalar_lea.vmem %s1837_s8, 32  ;;  %p2247_p1 = scmp.lt.s32.totalorder %s1837_s8, %s1837_s8 }
 0x321   :  { %2184 = vrsqrt.f32 %v1530_v12  ;;  %v1246_v57 = vmul.f32 0.0078125, %v1194_v20  ;;  %v1405_v41 = vmul.f32 %v1245_v32, %v1245_v32  ;;  %p2243_p0 = scmp.ne.s32.totalorder %s1837_s8, %s2242_s0  ;;  %p2248_p2 = scmp.lt.s32.totalorder %s2242_s0, %s2242_s0 }
 0x322   :  { %v3098_v59 = vpop.xlane.xlu0 %1187  ;;  %v1696_v46 = vmax.f32 %v1664_v14, 0.0 }
 0x323   :  { %v1406_v21 = vmul.f32 %v1246_v57, %v1246_v57  ;;  %p2249_p3 = por %p2248_p2, %p2247_p1 }
 0x324   :  { %v3100_v11 = vpop.xlane.xlu1 %1189  ;;  %v3102_v49 = vpack.c.bf16 %v1696_v46, %v1695_v17 }
 0x325   :  { %p2250_p4 = pnand %p2249_p3, %p2243_p0 }
 0x326   :  { %v1320_v51 = vpop.xlane.xlu0 %1319 }
 0x327   :  { %v1373_v10 = vmul.f32 0.0078125, %v1320_v51 }
 0x328   :  { %v1322_v55 = vpop.xlane.xlu1 %1321 }
 0x329   :  { %v2183_v44 = vpop.eup %2182  ;;  %v1437_v5 = vsub.f32 %v1373_v10, %v1405_v41  ;;  %v1374_v37 = vmul.f32 0.0078125, %v1322_v55  ;;  %v1363_v10 = vmul.f32 0.0078125, %v3070_v29  ;;  %v1395_v55 = vmul.f32 %v3114_v13, %v3114_v13 }
 0x32a   :  { %v1593_v12 = vmul.f32 %v2183_v44, %v1497_v60  ;;  %v1428_v29 = vsub.f32 %v1364_v26, %v1396_v19 }
 0x32b   :  { %v2185_v20 = vpop.eup %2184  ;;  %v1469_v54 = vmax.f32 %v1437_v5, 0.0  ;;  %v1438_v14 = vsub.f32 %v1374_v37, %v1406_v21  ;;  %v1427_v44 = vsub.f32 %v1363_v10, %v1395_v55  ;;  %v1726_v37 = vld [vmem:[#allocation2] sm:$0x1] }
 0x32c   :  { %v1594_v17 = vmul.f32 %v2185_v20, %v1498_v48  ;;  %v1630_v18 = vmul.f32 %v3085_v58, %v1593_v12  ;;  %v2266_v12 = vmov 0   ;;  %v3130_v20 = vpop.xlane.xlu0 %1315  ;;  %v3133_v61 = vpop.xlane.xlu1 %1317 }
 0x32d   :  { %v1533_v46 = vadd.f32 1e-05, %v1469_v54  ;;  %v1470_v51 = vmax.f32 %v1438_v14, 0.0  ;;  %2087 = vset.pattern.permute.xlu0 %v2266_v12  ;;  %v1459_v54 = vmax.f32 %v1427_v44, 0.0  ;;  %v1501_v14 = vsub.f32 %v2917_v8, %v1245_v32 }
 0x32e   :  { %v1631_v41 = vmul.f32 %v3085_v58, %v1594_v17  ;;  %v1667_v0 = vadd.f32 %v3093_v28, %v1630_v18  ;;  %1729 = vperm.xlu0 %2087, %v1726_v37   ;;  %v1460_v18 = vmax.f32 %v1428_v29, 0.0  ;;  %v1367_v8 = vmul.f32 0.0078125, %v3080_v39 }
 0x32f   :  { %2186 = vrsqrt.f32 %v1533_v46  ;;  %v1534_v43 = vadd.f32 1e-05, %v1470_v51  ;;  %v1502_v46 = vsub.f32 %v2920_v25, %v1246_v57  ;;  %v1523_v10 = vadd.f32 1e-05, %v1459_v54 }
 0x330   :  { %v1668_v60 = vadd.f32 %v3093_v28, %v1631_v41  ;;  %v1699_v21 = vmax.f32 %v1667_v0, 0.0  ;;  %v3139_v0 = vpop.xlane.xlu0 %1195  ;;  %v1524_v26 = vadd.f32 1e-05, %v1460_v18 }
 0x331   :  { %2188 = vrsqrt.f32 %v1534_v43  ;;  %v3137_v43 = vmul.f32 0.0078125, %v3074_v22  ;;  %v3143_v32 = vpop.xlane.xlu1 %1197 }
 0x332   :  { %v1700_v5 = vmax.f32 %v1668_v60, 0.0  ;;  %2190 = vrsqrt.f32 %v1523_v10 }
 0x333   :  { %v1399_v57 = vmul.f32 %v3137_v43, %v3137_v43  ;;  %2192 = vrsqrt.f32 %v1524_v26 }
 0x334   :  { %v3128_v48 = vpack.c.bf16 %v1700_v5, %v1699_v21 }
 0x335   :  { %v1431_v21 = vsub.f32 %v1367_v8, %v1399_v57  ;;  %v1491_v8 = vsub.f32 %v2876_v31, %v3114_v13 }
 0x339   :  { %v2187_v17 = vpop.eup %2186 }
 0x33a   :  { %v1597_v51 = vmul.f32 %v2187_v17, %v1501_v14  ;;  %v3155_v14 = vmul.f32 0.0078125, %v3076_v42  ;;  %v1463_v17 = vmax.f32 %v1431_v21, 0.0 }
 0x33b   :  { %v2189_v41 = vpop.eup %2188 }
 0x33c   :  { %v1598_v60 = vmul.f32 %v2189_v41, %v1502_v46  ;;  %v1634_v55 = vmul.f32 %v3085_v58, %v1597_v51  ;;  %v1368_v51 = vmul.f32 0.0078125, %v3087_v1  ;;  %v2191_v10 = vpop.eup %2190  ;;  %v1400_v42 = vmul.f32 %v3155_v14, %v3155_v14 }
 0x33d   :  { %v1208_v22 = vpop.xlane.xlu0 %1207 }
 0x33e   :  { %v1635_v19 = vmul.f32 %v3085_v58, %v1598_v60  ;;  %v1671_v25 = vadd.f32 %v3093_v28, %v1634_v55  ;;  %v3152_v54 = vmul.f32 0.0078125, %v1208_v22  ;;  %v2193_v22 = vpop.eup %2192 }
 0x33f   :  { %v1210_v5 = vpop.xlane.xlu1 %1209 }
 0x340   :  { %v1672_v44 = vadd.f32 %v3093_v28, %v1635_v19  ;;  %v1703_v37 = vmax.f32 %v1671_v25, 0.0  ;;  %v3157_v46 = vmul.f32 0.0078125, %v1210_v5  ;;  %v1413_v60 = vmul.f32 %v3152_v54, %v3152_v54 }
 0x341   :  { %v1204_v12 = vpop.xlane.xlu0 %1203  ;;  %v1527_v19 = vadd.f32 1e-05, %v1463_v17  ;;  %v1492_v5 = vsub.f32 %v2880_v27, %v3117_v38 }
 0x342   :  { %v1704_v29 = vmax.f32 %v1672_v44, 0.0  ;;  %v3162_v55 = vmul.f32 0.0078125, %v1204_v12  ;;  %v1414_v1 = vmul.f32 %v3157_v46, %v3157_v46  ;;  %v1587_v12 = vmul.f32 %v2191_v10, %v1491_v8 }
 0x343   :  { %v1206_v18 = vpop.xlane.xlu1 %1205  ;;  %2194 = vrsqrt.f32 %v1527_v19  ;;  %v1588_v52 = vmul.f32 %v2193_v22, %v1492_v5 }
 0x344   :  { %v3150_v39 = vpack.c.bf16 %v1704_v29, %v1703_v37  ;;  %v3168_v25 = vmul.f32 0.0078125, %v1206_v18  ;;  %v1432_v37 = vsub.f32 %v1368_v51, %v1400_v42  ;;  %v1411_v31 = vmul.f32 %v3162_v55, %v3162_v55 }
 0x345   :  { %v1336_v41 = vpop.xlane.xlu0 %1335  ;;  %v1624_v51 = vmul.f32 %v3085_v58, %v1587_v12  ;;  %v1625_v19 = vmul.f32 %v3085_v58, %v1588_v52 }
 0x346   :  { %v1381_v26 = vmul.f32 0.0078125, %v1336_v41  ;;  %v1412_v41 = vmul.f32 %v3168_v25, %v3168_v25  ;;  %v1464_v27 = vmax.f32 %v1432_v37, 0.0 }
 0x347   :  { %v1338_v57 = vpop.xlane.xlu1 %1337  ;;  %v3181_v5 = vadd.f32 %v3093_v28, %v1624_v51  ;;  %v3192_v52 = vadd.f32 %v3093_v28, %v1625_v19 }
 0x348   :  { %v1445_v44 = vsub.f32 %v1381_v26, %v1413_v60  ;;  %v1382_v21 = vmul.f32 0.0078125, %v1338_v57 }
 0x349   :  { %v1332_v29 = vpop.xlane.xlu0 %1331 }
 0x34a   :  { %v1477_v13 = vmax.f32 %v1445_v44, 0.0  ;;  %v1446_v17 = vsub.f32 %v1382_v21, %v1414_v1  ;;  %v1379_v18 = vmul.f32 0.0078125, %v1332_v29  ;;  %v1528_v29 = vadd.f32 1e-05, %v1464_v27 }
 0x34b   :  { %v1334_v9 = vpop.xlane.xlu1 %1333 }
 0x34c   :  { %v1541_v60 = vadd.f32 1e-05, %v1477_v13  ;;  %v1478_v26 = vmax.f32 %v1446_v17, 0.0  ;;  %v1443_v57 = vsub.f32 %v1379_v18, %v1411_v31  ;;  %v1380_v34 = vmul.f32 0.0078125, %v1334_v9 }
 0x34d   :  { %v1216_v38 = vpop.xlane.xlu0 %1215  ;;  %v3184_v9 = vmul.f32 0.0078125, %v3098_v59  ;;  %v1495_v13 = vsub.f32 %v2900_v63, %v3137_v43  ;;  %v1371_v17 = vmul.f32 0.0078125, %v3130_v20  ;;  %v2195_v59 = vpop.eup %2194 }
 0x34e   :  { %2196 = vrsqrt.f32 %v1541_v60  ;;  %v1542_v10 = vadd.f32 1e-05, %v1478_v26  ;;  %v1475_v8 = vmax.f32 %v1443_v57, 0.0  ;;  %v1444_v42 = vsub.f32 %v1380_v34, %v1412_v41 }
 0x34f   :  { %v1218_v1 = vpop.xlane.xlu1 %1217  ;;  %v3186_v12 = vmul.f32 0.0078125, %v1216_v38  ;;  %v3189_v34 = vmul.f32 0.0078125, %v3100_v11  ;;  %v1372_v11 = vmul.f32 0.0078125, %v3133_v61  ;;  %v1693_v26 = vmax.f32 %v3181_v5, 0.0 }
 0x350   :  { %2198 = vrsqrt.f32 %v1542_v10  ;;  %v1539_v44 = vadd.f32 1e-05, %v1475_v8  ;;  %v1476_v21 = vmax.f32 %v1444_v42, 0.0  ;;  %v3197_v18 = vmul.f32 0.0078125, %v1218_v1 }
 0x351   :  { %v1212_v22 = vpop.xlane.xlu0 %1211  ;;  %v1403_v57 = vmul.f32 %v3184_v9, %v3184_v9  ;;  %v1417_v63 = vmul.f32 %v3186_v12, %v3186_v12  ;;  %v1404_v27 = vmul.f32 %v3189_v34, %v3189_v34  ;;  %v1694_v10 = vmax.f32 %v3192_v52, 0.0 }
 0x352   :  { %2200 = vrsqrt.f32 %v1539_v44  ;;  %v1540_v37 = vadd.f32 1e-05, %v1476_v21  ;;  %v3207_v20 = vmul.f32 0.0078125, %v1212_v22  ;;  %v1418_v1 = vmul.f32 %v3197_v18, %v3197_v18 }
 0x353   :  { %v1214_v31 = vpop.xlane.xlu1 %1213  ;;  %v1435_v42 = vsub.f32 %v1371_v17, %v1403_v57  ;;  %v1436_v21 = vsub.f32 %v1372_v11, %v1404_v27  ;;  %v1510_v22 = vsub.f32 %v2956_v40, %v3157_v46 }
 0x354   :  { %2202 = vrsqrt.f32 %v1540_v37  ;;  %v3213_v51 = vmul.f32 0.0078125, %v1214_v31  ;;  %v1591_v37 = vmul.f32 %v2195_v59, %v1495_v13  ;;  %v1415_v52 = vmul.f32 %v3207_v20, %v3207_v20 }
 0x355   :  { %2204 = vrsqrt.f32 %v1528_v29  ;;  %v1344_v60 = vpop.xlane.xlu0 %1343  ;;  %v1509_v29 = vsub.f32 %v2953_v36, %v3152_v54 }
 0x356   :  { %v1385_v43 = vmul.f32 0.0078125, %v1344_v60  ;;  %v1416_v11 = vmul.f32 %v3213_v51, %v3213_v51 }
 0x357   :  { %v1346_v61 = vpop.xlane.xlu1 %1345 }
 0x358   :  { %v2197_v8 = vpop.eup %2196  ;;  %v1449_v19 = vsub.f32 %v1385_v43, %v1417_v63  ;;  %v1386_v44 = vmul.f32 0.0078125, %v1346_v61  ;;  %v1507_v63 = vsub.f32 %v2960_v50, %v3162_v55  ;;  %v1468_v61 = vmax.f32 %v1436_v21, 0.0 }
 0x359   :  { %v1340_v5 = vpop.xlane.xlu0 %1339  ;;  %v1605_v36 = vmul.f32 %v2197_v8, %v1509_v29  ;;  %v1467_v29 = vmax.f32 %v1435_v42, 0.0 }
 0x35a   :  { %v2199_v31 = vpop.eup %2198  ;;  %v1481_v60 = vmax.f32 %v1449_v19, 0.0  ;;  %v1450_v17 = vsub.f32 %v1386_v44, %v1418_v1  ;;  %v1383_v57 = vmul.f32 0.0078125, %v1340_v5  ;;  %v1508_v19 = vsub.f32 %v2964_v47, %v3168_v25 }
 0x35b   :  { %v1342_v43 = vpop.xlane.xlu1 %1341  ;;  %v1606_v54 = vmul.f32 %v2199_v31, %v1510_v22  ;;  %v1642_v21 = vmul.f32 %v3085_v58, %v1605_v36 }
 0x35c   :  { %v2201_v27 = vpop.eup %2200  ;;  %v1545_v40 = vadd.f32 1e-05, %v1481_v60  ;;  %v1482_v46 = vmax.f32 %v1450_v17, 0.0  ;;  %v1447_v13 = vsub.f32 %v1383_v57, %v1415_v52  ;;  %v1384_v59 = vmul.f32 0.0078125, %v1342_v43 }
 0x35d   :  { %v1224_v1 = vpop.xlane.xlu0 %1223  ;;  %v1603_v44 = vmul.f32 %v2201_v27, %v1507_v63  ;;  %v1643_v5 = vmul.f32 %v3085_v58, %v1606_v54  ;;  %v3234_v60 = vmul.f32 0.0078125, %v3139_v0  ;;  %v1532_v43 = vadd.f32 1e-05, %v1468_v61 }
 0x35e   :  { %v2203_v50 = vpop.eup %2202  ;;  %2206 = vrsqrt.f32 %v1545_v40  ;;  %v1546_v55 = vadd.f32 1e-05, %v1482_v46  ;;  %v1479_v38 = vmax.f32 %v1447_v13, 0.0  ;;  %v1448_v41 = vsub.f32 %v1384_v59, %v1416_v11 }
 0x35f   :  { %v2205_v8 = vpop.eup %2204  ;;  %v1226_v22 = vpop.xlane.xlu1 %1225  ;;  %v1604_v31 = vmul.f32 %v2203_v50, %v1508_v19  ;;  %v1640_v52 = vmul.f32 %v3085_v58, %v1603_v44  ;;  %v2054_v11 = vpack.c.bf16 %v1694_v10, %v1693_v26  ;;  %v1680_v42 = vadd.f32 %v3093_v28, %v1643_v5 }
 0x360   :  { %2208 = vrsqrt.f32 %v1546_v55  ;;  %v1543_v47 = vadd.f32 1e-05, %v1479_v38  ;;  %v1480_v25 = vmax.f32 %v1448_v41, 0.0  ;;  %v3239_v27 = vmul.f32 0.0078125, %v1224_v1 }
 0x361   :  { %v1220_v17 = vpop.xlane.xlu0 %1219  ;;  %v1641_v57 = vmul.f32 %v3085_v58, %v1604_v31  ;;  %v1677_v63 = vadd.f32 %v3093_v28, %v1640_v52  ;;  %v1679_v40 = vadd.f32 %v3093_v28, %v1642_v21  ;;  %v3405_v41 = vsub.f32 %v2904_v4, %v3155_v14 }
 0x362   :  { %2210 = vrsqrt.f32 %v1543_v47  ;;  %v1544_v54 = vadd.f32 1e-05, %v1480_v25  ;;  %v3247_v46 = vmul.f32 %v3085_v58, %v1591_v37  ;;  %v1531_v26 = vadd.f32 1e-05, %v1467_v29 }
 0x363   :  { %v1222_v36 = vpop.xlane.xlu1 %1221  ;;  %v1678_v0 = vadd.f32 %v3093_v28, %v1641_v57  ;;  %v1592_v38 = vmul.f32 %v2205_v8, %v3405_v41  ;;  %v3251_v10 = vmul.f32 %v3234_v60, %v3234_v60  ;;  %v3253_v13 = vmul.f32 0.0078125, %v1226_v22 }
 0x364   :  { %2212 = vrsqrt.f32 %v1544_v54  ;;  %v3256_v59 = vmul.f32 0.0078125, %v3143_v32  ;;  %v1709_v19 = vmax.f32 %v1677_v63, 0.0  ;;  %v1712_v44 = vmax.f32 %v1680_v42, 0.0 }
 0x365   :  { %v1352_v61 = vpop.xlane.xlu0 %1351  ;;  %v1710_v1 = vmax.f32 %v1678_v0, 0.0  ;;  %2214 = vrsqrt.f32 %v1532_v43  ;;  %v1421_v4 = vmul.f32 %v3239_v27, %v3239_v27  ;;  %v3260_v14 = vmul.f32 0.0078125, %v1220_v17 }
 0x366   :  { %v1389_v37 = vmul.f32 0.0078125, %v1352_v61  ;;  %v3262_v5 = vmul.f32 0.0078125, %v1222_v36  ;;  %v1711_v8 = vmax.f32 %v1679_v40, 0.0  ;;  %v1629_v29 = vmul.f32 %v3085_v58, %v1592_v38 }
 0x367   :  { %v1354_v50 = vpop.xlane.xlu1 %1353  ;;  %v2052_v55 = vpack.c.bf16 %v1710_v1, %v1709_v19  ;;  %2216 = vrsqrt.f32 %v1531_v26  ;;  %v1422_v22 = vmul.f32 %v3253_v13, %v3253_v13  ;;  %v1408_v21 = vmul.f32 %v3256_v59, %v3256_v59 }
 0x368   :  { %v2207_v32 = vpop.eup %2206  ;;  %v1453_v31 = vsub.f32 %v1389_v37, %v1421_v4  ;;  %v1390_v52 = vmul.f32 0.0078125, %v1354_v50  ;;  %v1513_v47 = vsub.f32 %v2977_v53, %v3186_v12  ;;  %v1514_v25 = vsub.f32 %v2980_v15, %v3197_v18 }
 0x369   :  { %2053 = vmatprep.subr.bf16.mxu0 %v2052_v55  ;;  %v1348_v17 = vpop.xlane.xlu0 %1347  ;;  %v2056_v57 = vpack.c.bf16 %v1712_v44, %v1711_v8  ;;  %v1419_v42 = vmul.f32 %v3260_v14, %v3260_v14  ;;  %v1511_v0 = vsub.f32 %v2984_v35, %v3207_v20  ;;  %v1420_v53 = vmul.f32 %v3262_v5, %v3262_v5 }
 0x36a   :  { %v2209_v63 = vpop.eup %2208  ;;  %v1485_v43 = vmax.f32 %v1453_v31, 0.0  ;;  %v1454_v54 = vsub.f32 %v1390_v52, %v1422_v22  ;;  %v1387_v36 = vmul.f32 0.0078125, %v1348_v17  ;;  %2055 = vmatpush3.bf16.xpose.msra.mxu0 %v2054_v11  ;;  %v1609_v15 = vmul.f32 %v2207_v32, %v1513_v47 }
 0x36b   :  { %v1350_v12 = vpop.xlane.xlu1 %1349  ;;  %2057 = vmatprep.subr.bf16.mxu0 %v2056_v57  ;;  %v1610_v18 = vmul.f32 %v2209_v63, %v1514_v25  ;;  %v1512_v19 = vsub.f32 %v2988_v33, %v3213_v51  ;;  %v1666_v44 = vadd.f32 %v3093_v28, %v1629_v29 }
 0x36c   :  { %v2211_v40 = vpop.eup %2210  ;;  %v1549_v41 = vadd.f32 1e-05, %v1485_v43  ;;  %v1486_v38 = vmax.f32 %v1454_v54, 0.0  ;;  %v1451_v26 = vsub.f32 %v1387_v36, %v1419_v42  ;;  %v1388_v61 = vmul.f32 0.0078125, %v1350_v12 }
 0x36d   :  { %v1324_v1 = vpop.xlane.xlu0 %1323  ;;  %v1607_v11 = vmul.f32 %v2211_v40, %v1511_v0  ;;  %v1647_v35 = vmul.f32 %v3085_v58, %v1610_v18  ;;  %v1646_v31 = vmul.f32 %v3085_v58, %v1609_v15  ;;  %v1665_v36 = vadd.f32 %v3093_v28, %v3247_v46 }
 0x36e   :  { %v2213_v20 = vpop.eup %2212  ;;  %2218 = vrsqrt.f32 %v1549_v41  ;;  %v1550_v4 = vadd.f32 1e-05, %v1486_v38  ;;  %v1483_v37 = vmax.f32 %v1451_v26, 0.0  ;;  %v1452_v50 = vsub.f32 %v1388_v61, %v1420_v53 }
 0x36f   :  { %v1375_v55 = vmul.f32 0.0078125, %v1324_v1  ;;  %v1326_v8 = vpop.xlane.xlu1 %1325  ;;  %v1608_v32 = vmul.f32 %v2213_v20, %v1512_v19  ;;  %v1644_v22 = vmul.f32 %v3085_v58, %v1607_v11  ;;  %v2215_v52 = vpop.eup %2214  ;;  %v1684_v63 = vadd.f32 %v3093_v28, %v1647_v35 }
 0x370   :  { %2220 = vrsqrt.f32 %v1550_v4  ;;  %v1547_v33 = vadd.f32 1e-05, %v1483_v37  ;;  %v1484_v51 = vmax.f32 %v1452_v50, 0.0  ;;  %v1376_v47 = vmul.f32 0.0078125, %v1326_v8 }
 0x371   :  { %v1439_v29 = vsub.f32 %v1375_v55, %v3251_v10  ;;  %v1232_v25 = vpop.xlane.xlu0 %1231  ;;  %v1645_v17 = vmul.f32 %v3085_v58, %v1608_v32  ;;  %v1681_v57 = vadd.f32 %v3093_v28, %v1644_v22  ;;  %v2217_v42 = vpop.eup %2216  ;;  %v1499_v0 = vsub.f32 %v2924_v56, %v3184_v9 }
 0x372   :  { %2222 = vrsqrt.f32 %v1547_v33  ;;  %v1548_v43 = vadd.f32 1e-05, %v1484_v51  ;;  %v1440_v54 = vsub.f32 %v1376_v47, %v1408_v21  ;;  %2059 = vmatpush3.bf16.xpose.msra.mxu0 %v3102_v49  ;;  %v1683_v12 = vadd.f32 %v3093_v28, %v1646_v31 }
 0x373   :  { %v1234_v10 = vpop.xlane.xlu1 %1233  ;;  %v1682_v53 = vadd.f32 %v3093_v28, %v1645_v17  ;;  %v3406_v15 = vsub.f32 %v2928_v30, %v3189_v34  ;;  %v1471_v40 = vmax.f32 %v1439_v29, 0.0  ;;  %v1698_v41 = vmax.f32 %v1666_v44, 0.0 }
 0x374   :  { %2224 = vrsqrt.f32 %v1548_v43  ;;  %v1472_v21 = vmax.f32 %v1440_v54, 0.0  ;;  %v1713_v38 = vmax.f32 %v1681_v57, 0.0  ;;  %v1716_v46 = vmax.f32 %v1684_v63, 0.0 }
 0x375   :  { %v1596_v18 = vmul.f32 %v2215_v52, %v3406_v15  ;;  %v1228_v49 = vpop.xlane.xlu0 %1227  ;;  %v1714_v26 = vmax.f32 %v1682_v53, 0.0  ;;  %v1697_v56 = vmax.f32 %v1665_v36, 0.0  ;;  %v1595_v9 = vmul.f32 %v2217_v42, %v1499_v0 }
 0x376   :  { %v1536_v61 = vadd.f32 1e-05, %v1472_v21  ;;  %v3299_v19 = vmul.f32 0.0078125, %v1228_v49  ;;  %v1715_v35 = vmax.f32 %v1683_v12, 0.0  ;;  %v1535_v34 = vadd.f32 1e-05, %v1471_v40 }
 0x377   :  { %v1230_v1 = vpop.xlane.xlu1 %1229  ;;  %v2060_v11 = vpack.c.bf16 %v1714_v26, %v1713_v38  ;;  %v1633_v20 = vmul.f32 %v3085_v58, %v1596_v18  ;;  %v2062_v37 = vpack.c.bf16 %v1698_v41, %v1697_v56  ;;  %v1517_v44 = vsub.f32 %v2999_v3, %v3239_v27 }
 0x378   :  { %v2219_v30 = vpop.eup %2218  ;;  %v3302_v4 = vmul.f32 0.0078125, %v1230_v1  ;;  %v1518_v50 = vsub.f32 %v3004_v24, %v3253_v13  ;;  %v2064_v8 = vpack.c.bf16 %v1716_v46, %v1715_v35  ;;  %2226 = vrsqrt.f32 %v1536_v61 }
 0x379   :  { %2061 = vmatprep.subr.bf16.mxu0 %v2060_v11  ;;  %v1356_v55 = vpop.xlane.xlu0 %1355  ;;  %v1423_v22 = vmul.f32 %v3299_v19, %v3299_v19  ;;  %v1632_v52 = vmul.f32 %v3085_v58, %v1595_v9  ;;  %v1515_v33 = vsub.f32 %v3008_v23, %v3260_v14  ;;  %v1670_v3 = vadd.f32 %v3093_v28, %v1633_v20 }
 0x37a   :  { %v2221_v32 = vpop.eup %2220  ;;  %v1391_v31 = vmul.f32 0.0078125, %v1356_v55  ;;  %2063 = vmatpush3.bf16.xpose.msra.mxu0 %v2062_v37  ;;  %v1613_v24 = vmul.f32 %v2219_v30, %v1517_v44  ;;  %2228 = vrsqrt.f32 %v1535_v34  ;;  %v1424_v47 = vmul.f32 %v3302_v4, %v3302_v4 }
 0x37b   :  { %v1358_v51 = vpop.xlane.xlu1 %1357  ;;  %2065 = vmatprep.subr.bf16.mxu0 %v2064_v8  ;;  %v1614_v27 = vmul.f32 %v2221_v32, %v1518_v50  ;;  %v1516_v57 = vsub.f32 %v3012_v62, %v3262_v5  ;;  %v3318_v63 = vmul.f32 0.0078125, %v1232_v25  ;;  %v1503_v54 = vsub.f32 %v2943_v16, %v3234_v60 }
 0x37c   :  { %v2223_v13 = vpop.eup %2222  ;;  %v1455_v29 = vsub.f32 %v1391_v31, %v1423_v22  ;;  %v1392_v17 = vmul.f32 0.0078125, %v1358_v51  ;;  %v1504_v36 = vsub.f32 %v2948_v7, %v3256_v59  ;;  %v1669_v62 = vadd.f32 %v3093_v28, %v1632_v52 }
 0x37d   :  { %v1200_v42 = vpop.xlane.xlu0 %1199  ;;  %v1611_v23 = vmul.f32 %v2223_v13, %v1515_v33  ;;  %v1651_v14 = vmul.f32 %v3085_v58, %v1614_v27  ;;  %v1650_v5 = vmul.f32 %v3085_v58, %v1613_v24  ;;  %v3328_v25 = vmul.f32 0.0078125, %v1234_v10 }
 0x37e   :  { %v2225_v43 = vpop.eup %2224  ;;  %v1487_v0 = vmax.f32 %v1455_v29, 0.0  ;;  %v1456_v53 = vsub.f32 %v1392_v17, %v1424_v47  ;;  %v1702_v41 = vmax.f32 %v1670_v3, 0.0  ;;  %v1425_v16 = vmul.f32 %v3318_v63, %v3318_v63 }
 0x37f   :  { %v1202_v12 = vpop.xlane.xlu1 %1201  ;;  %v1612_v15 = vmul.f32 %v2225_v43, %v1516_v57  ;;  %v1648_v18 = vmul.f32 %v3085_v58, %v1611_v23  ;;  %v1688_v49 = vadd.f32 %v3093_v28, %v1651_v14  ;;  %v3335_v26 = vmul.f32 0.0078125, %v1200_v42 }
 0x380   :  { %v1551_v40 = vadd.f32 1e-05, %v1487_v0  ;;  %v1488_v21 = vmax.f32 %v1456_v53, 0.0  ;;  %v3338_v10 = vmul.f32 0.0078125, %v1202_v12  ;;  %v1701_v9 = vmax.f32 %v1669_v62, 0.0 }
 0x381   :  { %v1360_v60 = vpop.xlane.xlu0 %1359  ;;  %v1649_v7 = vmul.f32 %v3085_v58, %v1612_v15  ;;  %v1685_v59 = vadd.f32 %v3093_v28, %v1648_v18  ;;  %v1687_v1 = vadd.f32 %v3093_v28, %v1650_v5  ;;  %v1426_v35 = vmul.f32 %v3328_v25, %v3328_v25 }
 0x382   :  { %2230 = vrsqrt.f32 %v1551_v40  ;;  %v1552_v38 = vadd.f32 1e-05, %v1488_v21  ;;  %v1393_v46 = vmul.f32 0.0078125, %v1360_v60  ;;  %2067 = vmatpush3.bf16.xpose.msra.mxu0 %v3128_v48  ;;  %v2227_v11 = vpop.eup %2226  ;;  %v2070_v50 = vpack.c.bf16 %v1702_v41, %v1701_v9 }
 0x383   :  { %v1362_v61 = vpop.xlane.xlu1 %1361  ;;  %v1686_v56 = vadd.f32 %v3093_v28, %v1649_v7  ;;  %v1717_v37 = vmax.f32 %v1685_v59, 0.0  ;;  %v1720_v48 = vmax.f32 %v1688_v49, 0.0  ;;  %v1409_v8 = vmul.f32 %v3335_v26, %v3335_v26  ;;  %v3407_v59 = vld [vmem:[#allocation6_spill] sm:$0xff] }
 0x384   :  { %2232 = vrsqrt.f32 %v1552_v38  ;;  %v1457_v20 = vsub.f32 %v1393_v46, %v1425_v16  ;;  %v1394_v30 = vmul.f32 0.0078125, %v1362_v61  ;;  %v2229_v55 = vpop.eup %2228  ;;  %v1410_v52 = vmul.f32 %v3338_v10, %v3338_v10 }
 0x385   :  { %v1328_v34 = vpop.xlane.xlu0 %1327  ;;  %v1718_v44 = vmax.f32 %v1686_v56, 0.0  ;;  %v1719_v3 = vmax.f32 %v1687_v1, 0.0  ;;  %v1600_v24 = vmul.f32 %v2227_v11, %v1504_v36  ;;  %v1599_v57 = vmul.f32 %v2229_v55, %v1503_v54  ;;  %v3408_v1 = vld [vmem:[#allocation7_spill] sm:$0xff] }
 0x386   :  { %v1489_v32 = vmax.f32 %v1457_v20, 0.0  ;;  %v1458_v22 = vsub.f32 %v1394_v30, %v1426_v35  ;;  %v1377_v31 = vmul.f32 0.0078125, %v1328_v34  ;;  %v1519_v43 = vsub.f32 %v3036_v6, %v3299_v19  ;;  %v3409_v30 = vld [vmem:[#allocation8_spill] sm:$0xff] }
 0x387   :  { %v1330_v33 = vpop.xlane.xlu1 %1329  ;;  %v2068_v51 = vpack.c.bf16 %v1718_v44, %v1717_v37  ;;  %v2072_v17 = vpack.c.bf16 %v1720_v48, %v1719_v3  ;;  %v1637_v12 = vmul.f32 %v3085_v58, %v1600_v24  ;;  %v1520_v15 = vsub.f32 %v3040_v45, %v3302_v4  ;;  %v3410_v24 = vld [vmem:[#allocation9_spill] sm:$0xff] }
 0x388   :  { %v1553_v27 = vadd.f32 1e-05, %v1489_v32  ;;  %v1490_v13 = vmax.f32 %v1458_v22, 0.0  ;;  %v1441_v47 = vsub.f32 %v1377_v31, %v1409_v8  ;;  %v1378_v29 = vmul.f32 0.0078125, %v1330_v33 }
 0x389   :  { %2069 = vmatprep.subr.bf16.mxu0 %v2068_v51  ;;  %v1636_v5 = vmul.f32 %v3085_v58, %v1599_v57  ;;  %v1674_v6 = vadd.f32 %v3093_v28, %v1637_v12  ;;  %v1521_v4 = vsub.f32 %v3029_v2, %v3318_v63  ;;  %v1522_v49 = vsub.f32 %v3407_v59, %v3328_v25 }
 0x38a   :  { %2234 = vrsqrt.f32 %v1553_v27  ;;  %v1554_v42 = vadd.f32 1e-05, %v1490_v13  ;;  %v1473_v23 = vmax.f32 %v1441_v47, 0.0  ;;  %v1442_v14 = vsub.f32 %v1378_v29, %v1410_v52  ;;  %2071 = vmatpush3.bf16.xpose.msra.mxu0 %v2070_v50 }
 0x38b   :  { %2073 = vmatprep.subr.bf16.mxu0 %v2072_v17  ;;  %v1673_v45 = vadd.f32 %v3093_v28, %v1636_v5  ;;  %v1706_v7 = vmax.f32 %v1674_v6, 0.0  ;;  %v1506_v34 = vsub.f32 %v3409_v30, %v3338_v10  ;;  %v1732_v27 = vlaneseq }
 0x38c   :  { %v2231_v0 = vpop.eup %2230  ;;  %2236 = vrsqrt.f32 %v1554_v42  ;;  %v1537_v53 = vadd.f32 1e-05, %v1473_v23  ;;  %v1474_v36 = vmax.f32 %v1442_v14, 0.0  ;;  %v2267_v17 = vmov 1966171168  }
 0x38d   :  { %v1615_v18 = vmul.f32 %v2231_v0, %v1519_v43  ;;  %v1705_v9 = vmax.f32 %v1673_v45, 0.0  ;;  %v1733_v13 = vshrl.u32 %v1732_v27, 7  ;;  %v1811_v57 = vunpack.c.l.s4 %v2267_v17 }
 0x38e   :  { %v2233_v54 = vpop.eup %2232  ;;  %2238 = vrsqrt.f32 %v1537_v53  ;;  %v1538_v62 = vadd.f32 1e-05, %v1474_v36  ;;  %vm1827_vm1 = vcmp.lt.s32.totalorder %v1732_v27, 256 }
 0x38f   :  { %v1616_v40 = vmul.f32 %v2233_v54, %v1520_v15  ;;  %v1652_v21 = vmul.f32 %v3085_v58, %v1615_v18  ;;  %v2078_v63 = vpack.c.bf16 %v1706_v7, %v1705_v9  ;;  %v1734_v47 = vsub.s32 0, %v1733_v13 }
 0x390   :  { %2240 = vrsqrt.f32 %v1538_v62 }
 0x391   :  { %v1653_v19 = vmul.f32 %v3085_v58, %v1616_v40  ;;  %v1689_v41 = vadd.f32 %v3093_v28, %v1652_v21 }
 0x392   :  { %2075 = vmatpush3.bf16.xpose.msra.mxu0 %v3150_v39  ;;  %v1505_v39 = vsub.f32 %v3408_v1, %v3335_v26 }
 0x393   :  { %v1690_v16 = vadd.f32 %v3093_v28, %v1653_v19  ;;  %v1721_v38 = vmax.f32 %v1689_v41, 0.0 }
 0x394   :  { %v2235_v60 = vpop.eup %2234 }
 0x395   :  { %v1722_v46 = vmax.f32 %v1690_v16, 0.0  ;;  %v1617_v61 = vmul.f32 %v2235_v60, %v1521_v4 }
 0x396   :  { %v2237_v56 = vpop.eup %2236 }
 0x397   :  { %v2076_v11 = vpack.c.bf16 %v1722_v46, %v1721_v38  ;;  %v1618_v35 = vmul.f32 %v2237_v56, %v1522_v49  ;;  %v1654_v20 = vmul.f32 %v3085_v58, %v1617_v61 }
 0x398   :  { %v2239_v2 = vpop.eup %2238 }
 0x399   :  { %2077 = vmatprep.subr.bf16.mxu0 %v2076_v11  ;;  %v1655_v25 = vmul.f32 %v3085_v58, %v1618_v35  ;;  %v1691_v37 = vadd.f32 %v3093_v28, %v1654_v20  ;;  %v1601_v44 = vmul.f32 %v2239_v2, %v1505_v39 }
 0x39a   :  { %v2241_v50 = vpop.eup %2240  ;;  %2079 = vmatpush3.bf16.xpose.msra.mxu0 %v2078_v63 }
 0x39b   :  { %v1692_v48 = vadd.f32 %v3093_v28, %v1655_v25  ;;  %v1602_v26 = vmul.f32 %v2241_v50, %v1506_v34  ;;  %v1638_v55 = vmul.f32 %v3085_v58, %v1601_v44  ;;  %v1723_v8 = vmax.f32 %v1691_v37, 0.0 }
 0x39d   :  { %v1724_v32 = vmax.f32 %v1692_v48, 0.0  ;;  %v1639_v22 = vmul.f32 %v3085_v58, %v1602_v26  ;;  %v1675_v31 = vadd.f32 %v3093_v28, %v1638_v55  ;;  %v1812_v58 = vunpack.c.0.s8 %v1811_v57 }
 0x39f   :  { %v2080_v10 = vpack.c.bf16 %v1724_v32, %v1723_v8  ;;  %v1676_v52 = vadd.f32 %v3093_v28, %v1639_v22  ;;  %v1707_v33 = vmax.f32 %v1675_v31, 0.0  ;;  %v1815_v28 = vsub.s32 %v1812_v58, %v1733_v13 }
 0x3a1   :  { %2081 = vmatprep.subr.bf16.mxu0 %v2080_v10  ;;  %v1708_v51 = vmax.f32 %v1676_v52, 0.0 }
 0x3a3   :  { %v2082_v3 = vpack.c.bf16 %v1708_v51, %v1707_v33 }
 0x3a5   :  { %2083 = vmatpush3.bf16.xpose.msra.mxu0 %v2082_v3 }
 0x3ac   :  { %1967 = vmatmul.mubr.f32.vlgmr.msra.gmra.mrb[32].mxu0 %v3410_v24 }
 0x3ad   :  { %v1730_v29 = vpop.permute.xlu0 %1729 }
 0x3ae   :  { %v1735_v42 = vrot.slane %v1730_v29, %v1734_v47 }
 0x47f   :  { %v1802_v23 = vpop.f32.mrb[32].mxu0 }
 0x480   :  { %v1803_v14 = vadd.f32 %v1802_v23, %v1735_v42  ;;  %v1804_v43 = vpop.f32.mrb[33].mxu0 }
 0x481   :  { %v1805_v0 = vadd.f32 %v1804_v43, %v1735_v42 }
 0x483   :  { %v1809_v53 = vcombine.low %v1803_v14, %v1805_v0 }
 0x485   :  { %v1816_v36 = vrot.slane %v1809_v53, %v1815_v28 }
 0x487   :  { %v1823_v12 = vrot.slane %v1816_v36, %v1815_v28 }
 0x489   :  { %1829 = vst.msk [vmem:[#allocation3] sm:$0x3] %vm1827_vm1, %v1823_v12 }
 0x48a   :  { %2253 = shalt.err (!%p2250_p4)
}
 0x48b   :  { %s2254_s11 = scalar_lea.hbm %s3396_s6, 32 }
 0x48c   :  { %p2255_p5 = scmp.ne.s32.totalorder %s3396_s6, %s2254_s11  ;;  %p2258_p6 = scmp.lt.u32.totalorder %s2254_s11, %s3396_s6 }
 0x48e   :  { %p2260_p7 = pnand %p2258_p6, %p2255_p5 }
 0x490   :  { %2263 = shalt.err (!%p2260_p7)
}
 0x491   :  { %1839 = dma.vmem_to_hbm [thread:$0]  %s1837_s8, 32, %s3396_s6, [#allocation4]  }
 0x492   :  { %2264 = dma.done.wait [#allocation4], 32  }
 0x493   :  { %2265 = vsyncadd [#allocation4], 4294967264 }
 0x494   :  { %1843 = vsyncpa [#allocation4], 1 }

// kernel: tpu_custom_call.1
= control target key start
LH: loop header
LB: loop body
LE: loop exit
PB: predicated region body
PF: predicated region fallthrough
CT: control target
= control target key end

     0   :  { %s3390_s0 = inlined_call_operand.vmem [shape: bf16[256,32], index: 0, kind: input, shape index: {}]   ;;  %s3391_s1 = inlined_call_operand.vmem [shape: bf16[32,128], index: 1, kind: input, shape index: {}]   ;;  %s3392_s2 = inlined_call_operand.vmem [shape: bf16[128,128], index: 2, kind: input, shape index: {}]   ;;  %s3393_s3 = inlined_call_operand.vmem [shape: f32[6,128], index: 3, kind: input, shape index: {}]   ;;  %s3394_s4 = inlined_call_operand.vmem [shape: f32[1,128], index: 4, kind: input, shape index: {}]   ;;  %s3395_s5 = inlined_call_operand.<no memory space> [shape: f32[1,1], index: 5, kind: input, shape index: {}]   ;;  %s3396_s6 = inlined_call_operand.hbm [shape: f32[1,256], index: 6, kind: output, shape index: {}]  }
   0x1   :  { %v11_v0 = vstv %s3395_s5 }
   0x2   :  { %12 = vst [vmem:[#allocation2] sm:$0x1] %v11_v0 }
   0x3   :  { %v2088_v1 = vld [vmem:[%s3391_s1] sm:$0xff]   ;;  %v2089_v2 = vld [vmem:[%s3391_s1 + $0x8] sm:$0xff]   ;;  %vm160_vm0 = vcmask 261120   ;;  %v2092_v5 = vld [vmem:[%s3390_s0 + $0x10] sm:$0xff]  }
   0x4   :  { %1968 = vmatprep.subr.bf16.mxu0 %v2088_v1  ;;  %v2090_v3 = vld [vmem:[%s3390_s0] sm:$0xff]   ;;  %v2091_v4 = vld [vmem:[%s3390_s0 + $0x8] sm:$0xff]   ;;  %v2093_v6 = vld [vmem:[%s3390_s0 + $0x18] sm:$0xff]  }
   0x5   :  { %1969 = vmatpush3.bf16.msra.mxu0 %v2088_v1  ;;  %1972 = vmatprep.mubr.msk.bf16.mxu0 %vm160_vm0, %v2090_v3  ;;  %v2094_v7 = vld [vmem:[%s3390_s0 + $0x20] sm:$0xff]   ;;  %v2095_v8 = vld [vmem:[%s3390_s0 + $0x28] sm:$0xff]   ;;  %v2096_v9 = vld [vmem:[%s3390_s0 + $0x30] sm:$0xff]  }
   0x6   :  { %1970 = vmatprep.subr.bf16.mxu0 %v2089_v2 }
   0x9   :  { %1971 = vmatpush3.bf16.msra.mxu0 %v2089_v2 }
   0xc   :  { %1973 = vmatmul.mubr.msk.bf16.vlgmr.msra.gmra.mrb[0].mxu0 %vm160_vm0, %v2091_v4 }
   0xd   :  { %1976 = vmatprep.mubr.msk.bf16.mxu0 %vm160_vm0, %v2092_v5 }
  0x14   :  { %1977 = vmatmul.mubr.msk.bf16.gmra.mrb[4].mxu0 %vm160_vm0, %v2093_v6 }
  0x15   :  { %1980 = vmatprep.mubr.msk.bf16.mxu0 %vm160_vm0, %v2094_v7 }
  0x16   :  { %13 = vsyncpa [#allocation4], 0  ;;  %v2097_v10 = vld [vmem:[%s3390_s0 + $0x38] sm:$0xff]   ;;  %v2098_v11 = vld [vmem:[%s3390_s0 + $0x40] sm:$0xff]  }
  0x17   :  { %v2099_v12 = vld [vmem:[%s3390_s0 + $0x48] sm:$0xff]   ;;  %v2100_v13 = vld [vmem:[%s3390_s0 + $0x50] sm:$0xff]   ;;  %v2101_v14 = vld [vmem:[%s3390_s0 + $0x58] sm:$0xff]  }
  0x18   :  { %v2102_v15 = vld [vmem:[%s3390_s0 + $0x60] sm:$0xff]   ;;  %v2103_v16 = vld [vmem:[%s3390_s0 + $0x68] sm:$0xff]   ;;  %v2104_v17 = vld [vmem:[%s3390_s0 + $0x70] sm:$0xff]  }
  0x19   :  { %v2105_v18 = vld [vmem:[%s3390_s0 + $0x78] sm:$0xff]   ;;  %v2380_v19 = vld [vmem:[%s3393_s3] ss:$0 sm:$0xff]  ;;  %v2107_v53 = vld [vmem:[%s3392_s2 + $0x8] sm:$0xff]  }
  0x1a   :  { %v2106_v49 = vld [vmem:[%s3392_s2] sm:$0xff]   ;;  %v2108_v61 = vld [vmem:[%s3392_s2 + $0x10] sm:$0xff]   ;;  %v2109_v3 = vld [vmem:[%s3392_s2 + $0x18] sm:$0xff]  }
  0x1b   :  { %2004 = vmatprep.subr.bf16.mxu1 %v2106_v49 }
  0x1c   :  { %1981 = vmatmul.mubr.msk.bf16.gmra.mrb[8].mxu0 %vm160_vm0, %v2095_v8  ;;  %2005 = vmatpush3.bf16.msra.mxu1 %v2106_v49 }
  0x1d   :  { %1984 = vmatprep.mubr.msk.bf16.mxu0 %vm160_vm0, %v2096_v9  ;;  %2006 = vmatprep.subr.bf16.mxu1 %v2107_v53 }
  0x20   :  { %2007 = vmatpush3.bf16.msra.mxu1 %v2107_v53 }
  0x21   :  { %2008 = vmatprep.subr.bf16.mxu1 %v2108_v61 }
  0x24   :  { %1985 = vmatmul.mubr.msk.bf16.gmra.mrb[12].mxu0 %vm160_vm0, %v2097_v10  ;;  %2009 = vmatpush3.bf16.msra.mxu1 %v2108_v61 }
  0x25   :  { %1988 = vmatprep.mubr.msk.bf16.mxu0 %vm160_vm0, %v2098_v11  ;;  %2010 = vmatprep.subr.bf16.mxu1 %v2109_v3  ;;  %v2110_v11 = vld [vmem:[%s3392_s2 + $0x20] sm:$0xff]  }
  0x28   :  { %2011 = vmatpush3.bf16.msra.mxu1 %v2109_v3 }
  0x29   :  { %2012 = vmatprep.subr.bf16.mxu1 %v2110_v11 }
  0x2c   :  { %1989 = vmatmul.mubr.msk.bf16.gmra.mrb[16].mxu0 %vm160_vm0, %v2099_v12  ;;  %2013 = vmatpush3.bf16.msra.mxu1 %v2110_v11 }
  0x2d   :  { %1992 = vmatprep.mubr.msk.bf16.mxu0 %vm160_vm0, %v2100_v13 }
  0x34   :  { %1993 = vmatmul.mubr.msk.bf16.gmra.mrb[20].mxu0 %vm160_vm0, %v2101_v14 }
  0x35   :  { %1996 = vmatprep.mubr.msk.bf16.mxu0 %vm160_vm0, %v2102_v15 }
  0x3c   :  { %1997 = vmatmul.mubr.msk.bf16.gmra.mrb[24].mxu0 %vm160_vm0, %v2103_v16 }
  0x3d   :  { %2000 = vmatprep.mubr.msk.bf16.mxu0 %vm160_vm0, %v2104_v17  ;;  %v2111_v17 = vld [vmem:[%s3392_s2 + $0x28] sm:$0xff]  }
  0x3e   :  { %2014 = vmatprep.subr.bf16.mxu1 %v2111_v17 }
  0x3f   :  { %2015 = vmatpush3.bf16.msra.mxu1 %v2111_v17 }
  0x44   :  { %2001 = vmatmul.mubr.msk.bf16.gmra.mrb[28].mxu0 %vm160_vm0, %v2105_v18 }
  0xdf   :  { %v1974_v20 = vpop.f32.mrb[0].mxu0 }
  0xe0   :  { %v2383_v21 = vadd.f32 %v1974_v20, %v2380_v19  ;;  %v243_v22 = vpop.f32.mrb[1].mxu0 }
  0xe1   :  { %v2386_v23 = vadd.f32 %v2380_v19, %v243_v22  ;;  %v1975_v24 = vpop.f32.mrb[2].mxu0 }
  0xe2   :  { %374 = vadd.xlane.f32.xlu1 %v2383_v21  ;;  %v246_v25 = vpop.f32.mrb[3].mxu0  ;;  %v2391_v26 = vadd.f32 %v1975_v24, %v2380_v19  ;;  %v469_v27 = vmul.f32 %v2383_v21, %v2383_v21 }
  0xe3   :  { %370 = vadd.xlane.f32.xlu0 %v2386_v23  ;;  %v2397_v29 = vadd.f32 %v2380_v19, %v246_v25  ;;  %v467_v35 = vmul.f32 %v2386_v23, %v2386_v23 }
  0xe4   :  { %v470_v30 = vmul.f32 %v2391_v26, %v2391_v26 }
  0xe5   :  { %v468_v34 = vmul.f32 %v2397_v29, %v2397_v29 }
  0xe6   :  { %376 = vadd.xlane.f32.xlu1 %v2391_v26 }
  0xe7   :  { %503 = vadd.xlane.f32.xlu0 %v469_v27  ;;  %v1978_v28 = vpop.f32.mrb[4].mxu0 }
  0xe8   :  { %v259_v31 = vpop.f32.mrb[5].mxu0  ;;  %v2410_v39 = vadd.f32 %v1978_v28, %v2380_v19 }
  0xe9   :  { %v1979_v32 = vpop.f32.mrb[6].mxu0  ;;  %v2418_v43 = vadd.f32 %v2380_v19, %v259_v31 }
  0xea   :  { %505 = vadd.xlane.f32.xlu1 %v470_v30  ;;  %v262_v33 = vpop.f32.mrb[7].mxu0  ;;  %v2407_v36 = vadd.f32 %v1979_v32, %v2380_v19  ;;  %v473_v47 = vmul.f32 %v2410_v39, %v2410_v39  ;;  %v2112_v30 = vld [vmem:[%s3392_s2 + $0x30] sm:$0xff]  }
  0xeb   :  { %372 = vadd.xlane.f32.xlu0 %v2397_v29  ;;  %v2415_v42 = vadd.f32 %v2380_v19, %v262_v33  ;;  %v471_v52 = vmul.f32 %v2418_v43, %v2418_v43  ;;  %2016 = vmatprep.subr.bf16.mxu1 %v2112_v30 }
  0xec   :  { %v474_v45 = vmul.f32 %v2407_v36, %v2407_v36  ;;  %2017 = vmatpush3.bf16.msra.mxu1 %v2112_v30 }
  0xed   :  { %v472_v51 = vmul.f32 %v2415_v42, %v2415_v42 }
  0xee   :  { %501 = vadd.xlane.f32.xlu1 %v468_v34 }
  0xef   :  { %499 = vadd.xlane.f32.xlu0 %v467_v35  ;;  %v1982_v37 = vpop.f32.mrb[8].mxu0 }
  0xf0   :  { %v275_v38 = vpop.f32.mrb[9].mxu0  ;;  %v2449_v58 = vadd.f32 %v1982_v37, %v2380_v19  ;;  %v2113_v37 = vld [vmem:[%s3392_s2 + $0x38] sm:$0xff]  }
  0xf1   :  { %v1983_v40 = vpop.f32.mrb[10].mxu0  ;;  %v2469_v2 = vadd.f32 %v2380_v19, %v275_v38  ;;  %2018 = vmatprep.subr.bf16.mxu1 %v2113_v37 }
  0xf2   :  { %384 = vadd.xlane.f32.xlu1 %v2407_v36  ;;  %v278_v41 = vpop.f32.mrb[11].mxu0  ;;  %v2443_v54 = vadd.f32 %v1983_v40, %v2380_v19  ;;  %v477_v8 = vmul.f32 %v2449_v58, %v2449_v58  ;;  %2019 = vmatpush3.bf16.msra.mxu1 %v2113_v37 }
  0xf3   :  { %382 = vadd.xlane.f32.xlu0 %v2410_v39  ;;  %v2466_v1 = vadd.f32 %v2380_v19, %v278_v41  ;;  %v475_v16 = vmul.f32 %v2469_v2, %v2469_v2 }
  0xf4   :  { %v478_v5 = vmul.f32 %v2443_v54, %v2443_v54 }
  0xf5   :  { %v476_v15 = vmul.f32 %v2466_v1, %v2466_v1 }
  0xf6   :  { %380 = vadd.xlane.f32.xlu1 %v2415_v42 }
  0xf7   :  { %378 = vadd.xlane.f32.xlu0 %v2418_v43  ;;  %v2422_v44 = vpop.f32.mrb[12].mxu0 }
  0xf8   :  { %v2426_v46 = vpop.f32.mrb[13].mxu0  ;;  %v2510_v25 = vadd.f32 %v2422_v44, %v2380_v19 }
  0xf9   :  { %v1987_v48 = vpop.f32.mrb[14].mxu0  ;;  %v2532_v35 = vadd.f32 %v2380_v19, %v2426_v46 }
  0xfa   :  { %513 = vadd.xlane.f32.xlu1 %v474_v45  ;;  %v2433_v50 = vpop.f32.mrb[15].mxu0  ;;  %v2503_v18 = vadd.f32 %v1987_v48, %v2380_v19  ;;  %v481_v45 = vmul.f32 %v2510_v25, %v2510_v25 }
  0xfb   :  { %511 = vadd.xlane.f32.xlu0 %v473_v47  ;;  %v2528_v34 = vadd.f32 %v2380_v19, %v2433_v50 }
  0xfc   :  { %v482_v40 = vmul.f32 %v2503_v18, %v2503_v18 }
  0xfe   :  { %509 = vadd.xlane.f32.xlu1 %v472_v51  ;;  %v480_v51 = vmul.f32 %v2528_v34, %v2528_v34 }
  0xff   :  { %507 = vadd.xlane.f32.xlu0 %v471_v52  ;;  %v1990_v55 = vpop.f32.mrb[16].mxu0  ;;  %v479_v52 = vmul.f32 %v2532_v35, %v2532_v35 }
 0x100   :  { %v2446_v56 = vadd.f32 %v1990_v55, %v2380_v19  ;;  %v307_v57 = vpop.f32.mrb[17].mxu0 }
 0x101   :  { %v2452_v59 = vadd.f32 %v2380_v19, %v307_v57  ;;  %v1991_v60 = vpop.f32.mrb[18].mxu0 }
 0x102   :  { %392 = vadd.xlane.f32.xlu1 %v2443_v54  ;;  %v2459_v62 = vadd.f32 %v1991_v60, %v2380_v19  ;;  %v310_v63 = vpop.f32.mrb[19].mxu0  ;;  %v485_v57 = vmul.f32 %v2446_v56, %v2446_v56 }
 0x103   :  { %390 = vadd.xlane.f32.xlu0 %v2449_v58  ;;  %v2463_v0 = vadd.f32 %v2380_v19, %v310_v63  ;;  %v483_v53 = vmul.f32 %v2452_v59, %v2452_v59 }
 0x104   :  { %v486_v55 = vmul.f32 %v2459_v62, %v2459_v62 }
 0x106   :  { %388 = vadd.xlane.f32.xlu1 %v2466_v1 }
 0x107   :  { %386 = vadd.xlane.f32.xlu0 %v2469_v2  ;;  %v1994_v4 = vpop.f32.mrb[20].mxu0 }
 0x108   :  { %v2479_v6 = vadd.f32 %v1994_v4, %v2380_v19  ;;  %v323_v7 = vpop.f32.mrb[21].mxu0 }
 0x109   :  { %v2484_v9 = vadd.f32 %v2380_v19, %v323_v7  ;;  %v1995_v10 = vpop.f32.mrb[22].mxu0 }
 0x10a   :  { %521 = vadd.xlane.f32.xlu1 %v478_v5  ;;  %v2490_v12 = vadd.f32 %v1995_v10, %v2380_v19  ;;  %v326_v13 = vpop.f32.mrb[23].mxu0  ;;  %v489_v3 = vmul.f32 %v2479_v6, %v2479_v6 }
 0x10b   :  { %519 = vadd.xlane.f32.xlu0 %v477_v8  ;;  %v2493_v14 = vadd.f32 %v2380_v19, %v326_v13  ;;  %v487_v61 = vmul.f32 %v2484_v9, %v2484_v9 }
 0x10c   :  { %v490_v63 = vmul.f32 %v2490_v12, %v2490_v12 }
 0x10d   :  { %v488_v60 = vmul.f32 %v2493_v14, %v2493_v14 }
 0x10e   :  { %517 = vadd.xlane.f32.xlu1 %v476_v15 }
 0x10f   :  { %515 = vadd.xlane.f32.xlu0 %v475_v16  ;;  %v1998_v20 = vpop.f32.mrb[24].mxu0 }
 0x110   :  { %v2506_v22 = vadd.f32 %v1998_v20, %v2380_v19  ;;  %v339_v24 = vpop.f32.mrb[25].mxu0 }
 0x111   :  { %v2513_v27 = vadd.f32 %v2380_v19, %v339_v24  ;;  %v1999_v28 = vpop.f32.mrb[26].mxu0 }
 0x112   :  { %400 = vadd.xlane.f32.xlu1 %v2503_v18  ;;  %v2520_v31 = vadd.f32 %v1999_v28, %v2380_v19  ;;  %v342_v32 = vpop.f32.mrb[27].mxu0  ;;  %v493_v8 = vmul.f32 %v2506_v22, %v2506_v22 }
 0x113   :  { %398 = vadd.xlane.f32.xlu0 %v2510_v25  ;;  %v2524_v33 = vadd.f32 %v2380_v19, %v342_v32  ;;  %v491_v5 = vmul.f32 %v2513_v27, %v2513_v27 }
 0x114   :  { %v494_v7 = vmul.f32 %v2520_v31, %v2520_v31 }
 0x115   :  { %v492_v4 = vmul.f32 %v2524_v33, %v2524_v33 }
 0x116   :  { %396 = vadd.xlane.f32.xlu1 %v2528_v34 }
 0x117   :  { %394 = vadd.xlane.f32.xlu0 %v2532_v35  ;;  %v2002_v38 = vpop.f32.mrb[28].mxu0 }
 0x118   :  { %v2542_v41 = vadd.f32 %v2002_v38, %v2380_v19  ;;  %v355_v44 = vpop.f32.mrb[29].mxu0 }
 0x119   :  { %v2547_v46 = vadd.f32 %v2380_v19, %v355_v44  ;;  %v2003_v47 = vpop.f32.mrb[30].mxu0 }
 0x11a   :  { %529 = vadd.xlane.f32.xlu1 %v482_v40  ;;  %v2550_v48 = vadd.f32 %v2003_v47, %v2380_v19  ;;  %v358_v49 = vpop.f32.mrb[31].mxu0  ;;  %v497_v15 = vmul.f32 %v2542_v41, %v2542_v41 }
 0x11b   :  { %527 = vadd.xlane.f32.xlu0 %v481_v45  ;;  %v2553_v50 = vadd.f32 %v2380_v19, %v358_v49  ;;  %v484_v19 = vmul.f32 %v2463_v0, %v2463_v0  ;;  %v495_v11 = vmul.f32 %v2547_v46, %v2547_v46 }
 0x11c   :  { %v498_v13 = vmul.f32 %v2550_v48, %v2550_v48 }
 0x11d   :  { %v496_v10 = vmul.f32 %v2553_v50, %v2553_v50 }
 0x11e   :  { %525 = vadd.xlane.f32.xlu1 %v480_v51 }
 0x11f   :  { %523 = vadd.xlane.f32.xlu0 %v479_v52 }
 0x122   :  { %408 = vadd.xlane.f32.xlu1 %v2459_v62 }
 0x123   :  { %406 = vadd.xlane.f32.xlu0 %v2446_v56 }
 0x126   :  { %404 = vadd.xlane.f32.xlu1 %v2463_v0 }
 0x127   :  { %402 = vadd.xlane.f32.xlu0 %v2452_v59 }
 0x12a   :  { %533 = vadd.xlane.f32.xlu1 %v484_v19 }
 0x12b   :  { %531 = vadd.xlane.f32.xlu0 %v483_v53 }
 0x12e   :  { %537 = vadd.xlane.f32.xlu1 %v486_v55 }
 0x12f   :  { %535 = vadd.xlane.f32.xlu0 %v485_v57 }
 0x132   :  { %416 = vadd.xlane.f32.xlu1 %v2490_v12 }
 0x133   :  { %414 = vadd.xlane.f32.xlu0 %v2479_v6 }
 0x136   :  { %412 = vadd.xlane.f32.xlu1 %v2493_v14 }
 0x137   :  { %410 = vadd.xlane.f32.xlu0 %v2484_v9 }
 0x13a   :  { %541 = vadd.xlane.f32.xlu1 %v488_v60 }
 0x13b   :  { %539 = vadd.xlane.f32.xlu0 %v487_v61 }
 0x13e   :  { %545 = vadd.xlane.f32.xlu1 %v490_v63 }
 0x13f   :  { %543 = vadd.xlane.f32.xlu0 %v489_v3 }
 0x142   :  { %424 = vadd.xlane.f32.xlu1 %v2520_v31 }
 0x143   :  { %422 = vadd.xlane.f32.xlu0 %v2506_v22 }
 0x146   :  { %420 = vadd.xlane.f32.xlu1 %v2524_v33 }
 0x147   :  { %418 = vadd.xlane.f32.xlu0 %v2513_v27 }
 0x14a   :  { %549 = vadd.xlane.f32.xlu1 %v492_v4 }
 0x14b   :  { %547 = vadd.xlane.f32.xlu0 %v491_v5 }
 0x14e   :  { %553 = vadd.xlane.f32.xlu1 %v494_v7 }
 0x14f   :  { %551 = vadd.xlane.f32.xlu0 %v493_v8 }
 0x152   :  { %432 = vadd.xlane.f32.xlu1 %v2550_v48 }
 0x153   :  { %430 = vadd.xlane.f32.xlu0 %v2542_v41 }
 0x156   :  { %428 = vadd.xlane.f32.xlu1 %v2553_v50 }
 0x157   :  { %426 = vadd.xlane.f32.xlu0 %v2547_v46 }
 0x15a   :  { %557 = vadd.xlane.f32.xlu1 %v496_v10 }
 0x15b   :  { %555 = vadd.xlane.f32.xlu0 %v495_v11 }
 0x15e   :  { %561 = vadd.xlane.f32.xlu1 %v498_v13 }
 0x15f   :  { %559 = vadd.xlane.f32.xlu0 %v497_v15 }
 0x16f   :  { %v375_v16 = vpop.xlane.xlu1 %374 }
 0x170   :  { %v371_v17 = vpop.xlane.xlu0 %370  ;;  %v437_v20 = vmul.f32 0.0078125, %v375_v16 }
 0x171   :  { %v2607_v49 = vmul.f32 0.0078125, %v371_v17 }
 0x172   :  { %v597_v32 = vmul.f32 %v437_v20, %v437_v20 }
 0x173   :  { %v377_v24 = vpop.xlane.xlu1 %376  ;;  %v595_v3 = vmul.f32 %v2607_v49, %v2607_v49 }
 0x174   :  { %v438_v28 = vmul.f32 0.0078125, %v377_v24  ;;  %v504_v30 = vpop.xlane.xlu0 %503 }
 0x175   :  { %v565_v37 = vmul.f32 0.0078125, %v504_v30 }
 0x176   :  { %v598_v44 = vmul.f32 %v438_v28, %v438_v28 }
 0x177   :  { %v629_v38 = vsub.f32 %v565_v37, %v597_v32  ;;  %v506_v40 = vpop.xlane.xlu1 %505 }
 0x178   :  { %v566_v45 = vmul.f32 0.0078125, %v506_v40  ;;  %v373_v47 = vpop.xlane.xlu0 %372 }
 0x179   :  { %v661_v51 = vmax.f32 %v629_v38, 0.0  ;;  %v2609_v52 = vmul.f32 0.0078125, %v373_v47 }
 0x17a   :  { %v630_v19 = vsub.f32 %v566_v45, %v598_v44  ;;  %v693_v44 = vsub.f32 %v2383_v21, %v437_v20 }
 0x17b   :  { %v725_v53 = vadd.f32 1e-05, %v661_v51  ;;  %v596_v55 = vmul.f32 %v2609_v52, %v2609_v52  ;;  %v502_v57 = vpop.xlane.xlu1 %501 }
 0x17c   :  { %v662_v60 = vmax.f32 %v630_v19, 0.0  ;;  %v564_v61 = vmul.f32 0.0078125, %v502_v57  ;;  %v500_v63 = vpop.xlane.xlu0 %499 }
 0x17d   :  { %v563_v4 = vmul.f32 0.0078125, %v500_v63  ;;  %2114 = vrsqrt.f32 %v725_v53  ;;  %v694_v53 = vsub.f32 %v2391_v26, %v438_v28 }
 0x17e   :  { %v726_v5 = vadd.f32 1e-05, %v662_v60  ;;  %v628_v7 = vsub.f32 %v564_v61, %v596_v55 }
 0x17f   :  { %v627_v8 = vsub.f32 %v563_v4, %v595_v3  ;;  %v385_v10 = vpop.xlane.xlu1 %384 }
 0x180   :  { %2116 = vrsqrt.f32 %v726_v5  ;;  %v660_v11 = vmax.f32 %v628_v7, 0.0  ;;  %v383_v13 = vpop.xlane.xlu0 %382  ;;  %v2615_v30 = vmul.f32 0.0078125, %v385_v10  ;;  %v692_v5 = vsub.f32 %v2397_v29, %v2609_v52  ;;  %v2636_v10 = vld [vmem:[%s3393_s3 + $0x1] ss:$0 sm:$0xff] }
 0x181   :  { %v659_v15 = vmax.f32 %v627_v8, 0.0  ;;  %v2617_v37 = vmul.f32 0.0078125, %v383_v13  ;;  %v691_v29 = vsub.f32 %v2386_v23, %v2607_v49 }
 0x182   :  { %v724_v16 = vadd.f32 1e-05, %v660_v11  ;;  %v602_v45 = vmul.f32 %v2615_v30, %v2615_v30 }
 0x183   :  { %v723_v17 = vadd.f32 1e-05, %v659_v15  ;;  %v381_v24 = vpop.xlane.xlu1 %380  ;;  %v601_v55 = vmul.f32 %v2617_v37, %v2617_v37 }
 0x184   :  { %2118 = vrsqrt.f32 %v724_v16  ;;  %v379_v32 = vpop.xlane.xlu0 %378  ;;  %v2622_v47 = vmul.f32 0.0078125, %v381_v24 }
 0x185   :  { %2120 = vrsqrt.f32 %v723_v17  ;;  %v2627_v57 = vmul.f32 0.0078125, %v379_v32 }
 0x186   :  { %v600_v7 = vmul.f32 %v2622_v47, %v2622_v47 }
 0x187   :  { %v514_v38 = vpop.xlane.xlu1 %513  ;;  %v2115_v40 = vpop.eup %2114  ;;  %v599_v11 = vmul.f32 %v2627_v57, %v2627_v57 }
 0x188   :  { %v570_v51 = vmul.f32 0.0078125, %v514_v38  ;;  %v512_v19 = vpop.xlane.xlu0 %511  ;;  %v789_v21 = vmul.f32 %v2115_v40, %v693_v44 }
 0x189   :  { %v569_v60 = vmul.f32 0.0078125, %v512_v19 }
 0x18a   :  { %v2117_v61 = vpop.eup %2116  ;;  %v634_v63 = vsub.f32 %v570_v51, %v602_v45  ;;  %v826_v51 = vmul.f32 %v2636_v10, %v789_v21 }
 0x18b   :  { %v633_v3 = vsub.f32 %v569_v60, %v601_v55  ;;  %v510_v4 = vpop.xlane.xlu1 %509  ;;  %v790_v20 = vmul.f32 %v2117_v61, %v694_v53  ;;  %v2647_v60 = vld [vmem:[%s3393_s3 + $0x2] ss:$0 sm:$0xff] }
 0x18c   :  { %v666_v8 = vmax.f32 %v634_v63, 0.0  ;;  %v568_v26 = vmul.f32 0.0078125, %v510_v4  ;;  %v508_v28 = vpop.xlane.xlu0 %507 }
 0x18d   :  { %v665_v13 = vmax.f32 %v633_v3, 0.0  ;;  %v567_v15 = vmul.f32 0.0078125, %v508_v28  ;;  %v827_v16 = vmul.f32 %v2636_v10, %v790_v20 }
 0x18e   :  { %v2119_v17 = vpop.eup %2118  ;;  %v730_v52 = vadd.f32 1e-05, %v666_v8  ;;  %v632_v24 = vsub.f32 %v568_v26, %v600_v7 }
 0x18f   :  { %v2121_v32 = vpop.eup %2120  ;;  %v729_v38 = vadd.f32 1e-05, %v665_v13  ;;  %v631_v40 = vsub.f32 %v567_v15, %v599_v11  ;;  %v393_v44 = vpop.xlane.xlu1 %392  ;;  %v788_v45 = vmul.f32 %v2119_v17, %v692_v5  ;;  %v864_v61 = vadd.f32 %v2647_v60, %v827_v16 }
 0x190   :  { %2122 = vrsqrt.f32 %v730_v52  ;;  %v664_v19 = vmax.f32 %v632_v24, 0.0  ;;  %v391_v53 = vpop.xlane.xlu0 %390  ;;  %v787_v55 = vmul.f32 %v2121_v32, %v691_v29  ;;  %v863_v5 = vadd.f32 %v2647_v60, %v826_v51 }
 0x191   :  { %2124 = vrsqrt.f32 %v729_v38  ;;  %v663_v23 = vmax.f32 %v631_v40, 0.0  ;;  %v825_v49 = vmul.f32 %v2636_v10, %v788_v45  ;;  %v2654_v7 = vmul.f32 0.0078125, %v393_v44 }
 0x192   :  { %v728_v63 = vadd.f32 1e-05, %v664_v19  ;;  %v824_v3 = vmul.f32 %v2636_v10, %v787_v55  ;;  %v2657_v28 = vmul.f32 0.0078125, %v391_v53  ;;  %v896_v13 = vmax.f32 %v864_v61, 0.0 }
 0x193   :  { %v727_v4 = vadd.f32 1e-05, %v663_v23  ;;  %v389_v21 = vpop.xlane.xlu1 %388  ;;  %v862_v20 = vadd.f32 %v2647_v60, %v825_v49  ;;  %v698_v16 = vsub.f32 %v2407_v36, %v2615_v30  ;;  %v895_v29 = vmax.f32 %v863_v5, 0.0 }
 0x194   :  { %2126 = vrsqrt.f32 %v728_v63  ;;  %v387_v8 = vpop.xlane.xlu0 %386  ;;  %v861_v26 = vadd.f32 %v2647_v60, %v824_v3  ;;  %v606_v52 = vmul.f32 %v2654_v7, %v2654_v7  ;;  %v2663_v24 = vmul.f32 0.0078125, %v389_v21 }
 0x195   :  { %2128 = vrsqrt.f32 %v727_v4  ;;  %v894_v11 = vmax.f32 %v862_v20, 0.0  ;;  %v605_v44 = vmul.f32 %v2657_v28, %v2657_v28  ;;  %v2667_v45 = vmul.f32 0.0078125, %v387_v8 }
 0x196   :  { %v893_v15 = vmax.f32 %v861_v26, 0.0  ;;  %v926_v19 = vpack.c.bf16 %v896_v13, %v895_v29  ;;  %v697_v36 = vsub.f32 %v2410_v39, %v2617_v37  ;;  %v696_v23 = vsub.f32 %v2415_v42, %v2622_v47 }
 0x197   :  { %v522_v17 = vpop.xlane.xlu1 %521  ;;  %v604_v3 = vmul.f32 %v2663_v24, %v2663_v24  ;;  %v603_v39 = vmul.f32 %v2667_v45, %v2667_v45  ;;  %v695_v42 = vsub.f32 %v2418_v43, %v2627_v57 }
 0x198   :  { %v574_v32 = vmul.f32 0.0078125, %v522_v17  ;;  %v520_v38 = vpop.xlane.xlu0 %519  ;;  %v925_v40 = vpack.c.bf16 %v894_v11, %v893_v15 }
 0x199   :  { %v573_v51 = vmul.f32 0.0078125, %v520_v38 }
 0x19a   :  { %v2123_v53 = vpop.eup %2122  ;;  %v638_v30 = vsub.f32 %v574_v32, %v606_v52  ;;  %2020 = vmatprep.mubr.bf16.mxu1 %v925_v40 }
 0x19b   :  { %v2125_v55 = vpop.eup %2124  ;;  %v637_v49 = vsub.f32 %v573_v51, %v605_v44  ;;  %v518_v61 = vpop.xlane.xlu1 %517  ;;  %2021 = vmatmul.mubr.bf16.vlgmr.msra.gmra.mrb[0].mxu1 %v926_v19  ;;  %v794_v63 = vmul.f32 %v2123_v53, %v698_v16 }
 0x19c   :  { %v670_v4 = vmax.f32 %v638_v30, 0.0  ;;  %v572_v21 = vmul.f32 0.0078125, %v518_v61  ;;  %v516_v20 = vpop.xlane.xlu0 %515  ;;  %v793_v5 = vmul.f32 %v2125_v55, %v697_v36 }
 0x19d   :  { %v669_v37 = vmax.f32 %v637_v49, 0.0  ;;  %v571_v8 = vmul.f32 0.0078125, %v516_v20  ;;  %v831_v26 = vmul.f32 %v2636_v10, %v794_v63 }
 0x19e   :  { %v2127_v11 = vpop.eup %2126  ;;  %v734_v47 = vadd.f32 1e-05, %v670_v4  ;;  %v636_v13 = vsub.f32 %v572_v21, %v604_v3  ;;  %v830_v44 = vmul.f32 %v2636_v10, %v793_v5 }
 0x19f   :  { %v2129_v15 = vpop.eup %2128  ;;  %v733_v16 = vadd.f32 1e-05, %v669_v37  ;;  %v635_v17 = vsub.f32 %v571_v8, %v603_v39  ;;  %v401_v29 = vpop.xlane.xlu1 %400  ;;  %v792_v52 = vmul.f32 %v2127_v11, %v696_v23  ;;  %v868_v53 = vadd.f32 %v2647_v60, %v831_v26 }
 0x1a0   :  { %2130 = vrsqrt.f32 %v734_v47  ;;  %v668_v32 = vmax.f32 %v636_v13, 0.0  ;;  %v399_v38 = vpop.xlane.xlu0 %398  ;;  %v791_v40 = vmul.f32 %v2129_v15, %v695_v42  ;;  %v2685_v23 = vmul.f32 0.0078125, %v401_v29 }
 0x1a1   :  { %2132 = vrsqrt.f32 %v733_v16  ;;  %v667_v51 = vmax.f32 %v635_v17, 0.0  ;;  %v829_v19 = vmul.f32 %v2636_v10, %v792_v52  ;;  %v867_v63 = vadd.f32 %v2647_v60, %v830_v44 }
 0x1a2   :  { %v732_v43 = vadd.f32 1e-05, %v668_v32  ;;  %v828_v57 = vmul.f32 %v2636_v10, %v791_v40  ;;  %v2689_v3 = vmul.f32 0.0078125, %v399_v38  ;;  %v900_v21 = vmax.f32 %v868_v53, 0.0 }
 0x1a3   :  { %v731_v36 = vadd.f32 1e-05, %v667_v51  ;;  %v397_v30 = vpop.xlane.xlu1 %396  ;;  %v866_v55 = vadd.f32 %v2647_v60, %v829_v19  ;;  %v899_v5 = vmax.f32 %v867_v63, 0.0  ;;  %v702_v39 = vsub.f32 %v2443_v54, %v2654_v7 }
 0x1a4   :  { %2134 = vrsqrt.f32 %v732_v43  ;;  %v395_v49 = vpop.xlane.xlu0 %394  ;;  %v865_v61 = vadd.f32 %v2647_v60, %v828_v57  ;;  %v610_v8 = vmul.f32 %v2685_v23, %v2685_v23  ;;  %v2695_v26 = vmul.f32 0.0078125, %v397_v30 }
 0x1a5   :  { %2136 = vrsqrt.f32 %v731_v36  ;;  %v898_v4 = vmax.f32 %v866_v55, 0.0  ;;  %v609_v13 = vmul.f32 %v2689_v3, %v2689_v3  ;;  %v2699_v15 = vmul.f32 0.0078125, %v395_v49 }
 0x1a6   :  { %v897_v20 = vmax.f32 %v865_v61, 0.0  ;;  %v928_v17 = vpack.c.bf16 %v900_v21, %v899_v5  ;;  %v701_v54 = vsub.f32 %v2449_v58, %v2657_v28  ;;  %v700_v32 = vsub.f32 %v2466_v1, %v2663_v24 }
 0x1a7   :  { %v530_v37 = vpop.xlane.xlu1 %529  ;;  %v608_v51 = vmul.f32 %v2695_v26, %v2695_v26  ;;  %v607_v58 = vmul.f32 %v2699_v15, %v2699_v15  ;;  %v699_v1 = vsub.f32 %v2469_v2, %v2667_v45 }
 0x1a8   :  { %v578_v11 = vmul.f32 0.0078125, %v530_v37  ;;  %v528_v42 = vpop.xlane.xlu0 %527  ;;  %v927_v47 = vpack.c.bf16 %v898_v4, %v897_v20 }
 0x1a9   :  { %v577_v16 = vmul.f32 0.0078125, %v528_v42 }
 0x1aa   :  { %v2131_v29 = vpop.eup %2130  ;;  %v642_v7 = vsub.f32 %v578_v11, %v610_v8  ;;  %2024 = vmatprep.mubr.bf16.mxu1 %v927_v47 }
 0x1ab   :  { %v2133_v52 = vpop.eup %2132  ;;  %v641_v38 = vsub.f32 %v577_v16, %v609_v13  ;;  %v526_v40 = vpop.xlane.xlu1 %525  ;;  %2025 = vmatmul.mubr.bf16.gmra.mrb[4].mxu1 %v928_v17  ;;  %v798_v44 = vmul.f32 %v2131_v29, %v702_v39 }
 0x1ac   :  { %v674_v19 = vmax.f32 %v642_v7, 0.0  ;;  %v576_v53 = vmul.f32 0.0078125, %v526_v40  ;;  %v524_v43 = vpop.xlane.xlu0 %523  ;;  %v797_v57 = vmul.f32 %v2133_v52, %v701_v54 }
 0x1ad   :  { %v673_v28 = vmax.f32 %v641_v38, 0.0  ;;  %v575_v36 = vmul.f32 0.0078125, %v524_v43  ;;  %v835_v30 = vmul.f32 %v2636_v10, %v798_v44 }
 0x1ae   :  { %v2135_v55 = vpop.eup %2134  ;;  %v738_v24 = vadd.f32 1e-05, %v674_v19  ;;  %v640_v49 = vsub.f32 %v576_v53, %v608_v51  ;;  %v834_v8 = vmul.f32 %v2636_v10, %v797_v57  ;;  %v706_v19 = vsub.f32 %v2503_v18, %v2685_v23 }
 0x1af   :  { %v2137_v61 = vpop.eup %2136  ;;  %v737_v63 = vadd.f32 1e-05, %v673_v28  ;;  %v639_v4 = vsub.f32 %v575_v36, %v607_v58  ;;  %v409_v21 = vpop.xlane.xlu1 %408  ;;  %v796_v20 = vmul.f32 %v2135_v55, %v700_v32  ;;  %v872_v47 = vadd.f32 %v2647_v60, %v835_v30 }
 0x1b0   :  { %2138 = vrsqrt.f32 %v738_v24  ;;  %v672_v5 = vmax.f32 %v640_v49, 0.0  ;;  %v407_v39 = vpop.xlane.xlu0 %406  ;;  %v795_v37 = vmul.f32 %v2137_v61, %v699_v1  ;;  %v871_v52 = vadd.f32 %v2647_v60, %v834_v8 }
 0x1b1   :  { %2140 = vrsqrt.f32 %v737_v63  ;;  %v671_v11 = vmax.f32 %v639_v4, 0.0  ;;  %v833_v42 = vmul.f32 %v2636_v10, %v796_v20  ;;  %v904_v40 = vmax.f32 %v872_v47, 0.0 }
 0x1b2   :  { %v736_v2 = vadd.f32 1e-05, %v672_v5  ;;  %v832_v45 = vmul.f32 %v2636_v10, %v795_v37  ;;  %v903_v51 = vmax.f32 %v871_v52, 0.0  ;;  %v2725_v43 = vmul.f32 0.0078125, %v409_v21 }
 0x1b3   :  { %v735_v13 = vadd.f32 1e-05, %v671_v11  ;;  %v405_v16 = vpop.xlane.xlu1 %404  ;;  %v870_v17 = vadd.f32 %v2647_v60, %v833_v42  ;;  %v2729_v30 = vmul.f32 0.0078125, %v407_v39  ;;  %v705_v18 = vsub.f32 %v2510_v25, %v2689_v3 }
 0x1b4   :  { %2142 = vrsqrt.f32 %v736_v2  ;;  %v2717_v29 = vmul.f32 0.0078125, %v405_v16  ;;  %v403_v54 = vpop.xlane.xlu0 %402  ;;  %v869_v7 = vadd.f32 %v2647_v60, %v832_v45  ;;  %v930_v24 = vpack.c.bf16 %v904_v40, %v903_v51 }
 0x1b5   :  { %2144 = vrsqrt.f32 %v735_v13  ;;  %v2721_v32 = vmul.f32 0.0078125, %v403_v54  ;;  %v902_v38 = vmax.f32 %v870_v17, 0.0  ;;  %v704_v63 = vsub.f32 %v2528_v34, %v2695_v26 }
 0x1b6   :  { %v901_v44 = vmax.f32 %v869_v7, 0.0  ;;  %v612_v57 = vmul.f32 %v2717_v29, %v2717_v29  ;;  %v614_v5 = vmul.f32 %v2725_v43, %v2725_v43  ;;  %v613_v25 = vmul.f32 %v2729_v30, %v2729_v30 }
 0x1b7   :  { %v534_v53 = vpop.xlane.xlu1 %533  ;;  %v611_v55 = vmul.f32 %v2721_v32, %v2721_v32  ;;  %v703_v34 = vsub.f32 %v2532_v35, %v2699_v15 }
 0x1b8   :  { %v580_v58 = vmul.f32 0.0078125, %v534_v53  ;;  %v532_v28 = vpop.xlane.xlu0 %531  ;;  %v929_v36 = vpack.c.bf16 %v902_v38, %v901_v44 }
 0x1b9   :  { %v579_v1 = vmul.f32 0.0078125, %v532_v28 }
 0x1ba   :  { %v2139_v49 = vpop.eup %2138  ;;  %v644_v23 = vsub.f32 %v580_v58, %v612_v57  ;;  %2028 = vmatprep.mubr.bf16.mxu1 %v929_v36 }
 0x1bb   :  { %v2141_v61 = vpop.eup %2140  ;;  %v643_v4 = vsub.f32 %v579_v1, %v611_v55  ;;  %v538_v21 = vpop.xlane.xlu1 %537  ;;  %2029 = vmatmul.mubr.bf16.gmra.mrb[8].mxu1 %v930_v24  ;;  %v802_v20 = vmul.f32 %v2139_v49, %v706_v19 }
 0x1bc   :  { %v676_v39 = vmax.f32 %v644_v23, 0.0  ;;  %v582_v37 = vmul.f32 0.0078125, %v538_v21  ;;  %v536_v8 = vpop.xlane.xlu0 %535  ;;  %v801_v11 = vmul.f32 %v2141_v61, %v705_v18 }
 0x1bd   :  { %v675_v3 = vmax.f32 %v643_v4, 0.0  ;;  %v581_v42 = vmul.f32 0.0078125, %v536_v8  ;;  %v839_v47 = vmul.f32 %v2636_v10, %v802_v20  ;;  %v708_v4 = vsub.f32 %v2463_v0, %v2717_v29 }
 0x1be   :  { %v2143_v2 = vpop.eup %2142  ;;  %v740_v26 = vadd.f32 1e-05, %v676_v39  ;;  %v646_v45 = vsub.f32 %v582_v37, %v614_v5  ;;  %v838_v44 = vmul.f32 %v2636_v10, %v801_v11  ;;  %v707_v0 = vsub.f32 %v2452_v59, %v2721_v32 }
 0x1bf   :  { %v2145_v13 = vpop.eup %2144  ;;  %v739_v16 = vadd.f32 1e-05, %v675_v3  ;;  %v645_v17 = vsub.f32 %v581_v42, %v613_v25  ;;  %v417_v54 = vpop.xlane.xlu1 %416  ;;  %v800_v7 = vmul.f32 %v2143_v2, %v704_v63  ;;  %v876_v53 = vadd.f32 %v2647_v60, %v839_v47 }
 0x1c0   :  { %2146 = vrsqrt.f32 %v740_v26  ;;  %v678_v52 = vmax.f32 %v646_v45, 0.0  ;;  %v415_v38 = vpop.xlane.xlu0 %414  ;;  %v799_v40 = vmul.f32 %v2145_v13, %v703_v34  ;;  %v875_v24 = vadd.f32 %v2647_v60, %v838_v44 }
 0x1c1   :  { %2148 = vrsqrt.f32 %v739_v16  ;;  %v677_v51 = vmax.f32 %v645_v17, 0.0  ;;  %v837_v19 = vmul.f32 %v2636_v10, %v800_v7  ;;  %v908_v23 = vmax.f32 %v876_v53, 0.0 }
 0x1c2   :  { %v742_v35 = vadd.f32 1e-05, %v678_v52  ;;  %v836_v15 = vmul.f32 %v2636_v10, %v799_v40  ;;  %v907_v63 = vmax.f32 %v875_v24, 0.0  ;;  %v2757_v20 = vmul.f32 0.0078125, %v417_v54 }
 0x1c3   :  { %v741_v57 = vadd.f32 1e-05, %v677_v51  ;;  %v413_v58 = vpop.xlane.xlu1 %412  ;;  %v874_v28 = vadd.f32 %v2647_v60, %v837_v19  ;;  %v2761_v11 = vmul.f32 0.0078125, %v415_v38  ;;  %v710_v44 = vsub.f32 %v2459_v62, %v2725_v43 }
 0x1c4   :  { %2150 = vrsqrt.f32 %v742_v35  ;;  %v2749_v36 = vmul.f32 0.0078125, %v413_v58  ;;  %v411_v55 = vpop.xlane.xlu0 %410  ;;  %v873_v1 = vadd.f32 %v2647_v60, %v836_v15  ;;  %v932_v42 = vpack.c.bf16 %v908_v23, %v907_v63 }
 0x1c5   :  { %v2753_v49 = vmul.f32 0.0078125, %v411_v55  ;;  %v906_v18 = vmax.f32 %v874_v28, 0.0  ;;  %2152 = vrsqrt.f32 %v741_v57  ;;  %v618_v13 = vmul.f32 %v2757_v20, %v2757_v20 }
 0x1c6   :  { %v905_v61 = vmax.f32 %v873_v1, 0.0  ;;  %v616_v5 = vmul.f32 %v2749_v36, %v2749_v36  ;;  %v617_v52 = vmul.f32 %v2761_v11, %v2761_v11  ;;  %v709_v23 = vsub.f32 %v2446_v56, %v2729_v30 }
 0x1c7   :  { %v542_v21 = vpop.xlane.xlu1 %541  ;;  %v615_v25 = vmul.f32 %v2753_v49, %v2753_v49  ;;  %v712_v30 = vsub.f32 %v2493_v14, %v2749_v36  ;;  %v711_v14 = vsub.f32 %v2484_v9, %v2753_v49 }
 0x1c8   :  { %v584_v39 = vmul.f32 0.0078125, %v542_v21  ;;  %v540_v37 = vpop.xlane.xlu0 %539  ;;  %v931_v8 = vpack.c.bf16 %v906_v18, %v905_v61 }
 0x1c9   :  { %v583_v3 = vmul.f32 0.0078125, %v540_v37 }
 0x1ca   :  { %v2147_v47 = vpop.eup %2146  ;;  %v648_v29 = vsub.f32 %v584_v39, %v616_v5  ;;  %2032 = vmatprep.mubr.bf16.mxu1 %v931_v8 }
 0x1cb   :  { %v2149_v2 = vpop.eup %2148  ;;  %v647_v34 = vsub.f32 %v583_v3, %v615_v25  ;;  %v546_v26 = vpop.xlane.xlu1 %545  ;;  %2033 = vmatmul.mubr.bf16.gmra.mrb[12].mxu1 %v932_v42  ;;  %v804_v45 = vmul.f32 %v2147_v47, %v708_v4 }
 0x1cc   :  { %v680_v16 = vmax.f32 %v648_v29, 0.0  ;;  %v586_v17 = vmul.f32 0.0078125, %v546_v26  ;;  %v544_v54 = vpop.xlane.xlu0 %543  ;;  %v803_v7 = vmul.f32 %v2149_v2, %v707_v0 }
 0x1cd   :  { %v679_v38 = vmax.f32 %v647_v34, 0.0  ;;  %v585_v40 = vmul.f32 0.0078125, %v544_v54  ;;  %v841_v59 = vmul.f32 %v2636_v10, %v804_v45 }
 0x1ce   :  { %v2151_v32 = vpop.eup %2150  ;;  %v744_v51 = vadd.f32 1e-05, %v680_v16  ;;  %v650_v19 = vsub.f32 %v586_v17, %v618_v13  ;;  %v840_v53 = vmul.f32 %v2636_v10, %v803_v7 }
 0x1cf   :  { %v743_v35 = vadd.f32 1e-05, %v679_v38  ;;  %v649_v15 = vsub.f32 %v585_v40, %v617_v52  ;;  %v425_v57 = vpop.xlane.xlu1 %424  ;;  %v878_v58 = vadd.f32 %v2647_v60, %v841_v59  ;;  %v2153_v28 = vpop.eup %2152  ;;  %v806_v18 = vmul.f32 %v2151_v32, %v710_v44 }
 0x1d0   :  { %2154 = vrsqrt.f32 %v744_v51  ;;  %v682_v55 = vmax.f32 %v650_v19, 0.0  ;;  %v423_v1 = vpop.xlane.xlu0 %422  ;;  %v877_v24 = vadd.f32 %v2647_v60, %v840_v53  ;;  %v805_v5 = vmul.f32 %v2153_v28, %v709_v23 }
 0x1d1   :  { %2156 = vrsqrt.f32 %v743_v35  ;;  %v681_v62 = vmax.f32 %v649_v15, 0.0  ;;  %v910_v43 = vmax.f32 %v878_v58, 0.0  ;;  %v843_v25 = vmul.f32 %v2636_v10, %v806_v18 }
 0x1d2   :  { %v746_v61 = vadd.f32 1e-05, %v682_v55  ;;  %v909_v63 = vmax.f32 %v877_v24, 0.0  ;;  %v842_v42 = vmul.f32 %v2636_v10, %v805_v5  ;;  %v2789_v29 = vmul.f32 0.0078125, %v425_v57 }
 0x1d3   :  { %v745_v4 = vadd.f32 1e-05, %v681_v62  ;;  %v421_v21 = vpop.xlane.xlu1 %420  ;;  %v880_v56 = vadd.f32 %v2647_v60, %v843_v25  ;;  %v2793_v13 = vmul.f32 0.0078125, %v423_v1  ;;  %v714_v28 = vsub.f32 %v2490_v12, %v2757_v20 }
 0x1d4   :  { %2158 = vrsqrt.f32 %v746_v61  ;;  %v2779_v39 = vmul.f32 0.0078125, %v421_v21  ;;  %v419_v37 = vpop.xlane.xlu0 %418  ;;  %v933_v8 = vpack.c.bf16 %v910_v43, %v909_v63  ;;  %v879_v0 = vadd.f32 %v2647_v60, %v842_v42 }
 0x1d5   :  { %v2782_v3 = vmul.f32 0.0078125, %v419_v37  ;;  %2160 = vrsqrt.f32 %v745_v4  ;;  %v912_v45 = vmax.f32 %v880_v56, 0.0  ;;  %v622_v44 = vmul.f32 %v2789_v29, %v2789_v29 }
 0x1d6   :  { %2036 = vmatprep.mubr.bf16.mxu1 %v933_v8  ;;  %v620_v2 = vmul.f32 %v2779_v39, %v2779_v39  ;;  %v911_v54 = vmax.f32 %v879_v0, 0.0  ;;  %v621_v15 = vmul.f32 %v2793_v13, %v2793_v13  ;;  %v713_v37 = vsub.f32 %v2479_v6, %v2761_v11 }
 0x1d7   :  { %v550_v47 = vpop.xlane.xlu1 %549  ;;  %v619_v16 = vmul.f32 %v2782_v3, %v2782_v3 }
 0x1d8   :  { %v588_v34 = vmul.f32 0.0078125, %v550_v47  ;;  %v548_v26 = vpop.xlane.xlu0 %547  ;;  %v934_v40 = vpack.c.bf16 %v912_v45, %v911_v54 }
 0x1d9   :  { %v587_v17 = vmul.f32 0.0078125, %v548_v26 }
 0x1da   :  { %v2155_v7 = vpop.eup %2154  ;;  %v652_v36 = vsub.f32 %v588_v34, %v620_v2  ;;  %2037 = vmatmul.mubr.bf16.gmra.mrb[16].mxu1 %v934_v40 }
 0x1db   :  { %v2157_v52 = vpop.eup %2156  ;;  %v651_v38 = vsub.f32 %v587_v17, %v619_v16  ;;  %v554_v59 = vpop.xlane.xlu1 %553  ;;  %v808_v32 = vmul.f32 %v2155_v7, %v712_v30 }
 0x1dc   :  { %v684_v51 = vmax.f32 %v652_v36, 0.0  ;;  %v590_v19 = vmul.f32 0.0078125, %v554_v59  ;;  %v552_v53 = vpop.xlane.xlu0 %551  ;;  %v807_v35 = vmul.f32 %v2157_v52, %v711_v14  ;;  %v716_v36 = vsub.f32 %v2524_v33, %v2779_v39 }
 0x1dd   :  { %v683_v57 = vmax.f32 %v651_v38, 0.0  ;;  %v589_v58 = vmul.f32 0.0078125, %v552_v53  ;;  %v845_v9 = vmul.f32 %v2636_v10, %v808_v32  ;;  %v718_v32 = vsub.f32 %v2520_v31, %v2789_v29 }
 0x1de   :  { %v2159_v49 = vpop.eup %2158  ;;  %v748_v55 = vadd.f32 1e-05, %v684_v51  ;;  %v654_v1 = vsub.f32 %v590_v19, %v622_v44  ;;  %v844_v24 = vmul.f32 %v2636_v10, %v807_v35  ;;  %v715_v44 = vsub.f32 %v2513_v27, %v2782_v3 }
 0x1df   :  { %v747_v18 = vadd.f32 1e-05, %v683_v57  ;;  %v653_v23 = vsub.f32 %v589_v58, %v621_v15  ;;  %v433_v62 = vpop.xlane.xlu1 %432  ;;  %v882_v43 = vadd.f32 %v2647_v60, %v845_v9  ;;  %v2161_v61 = vpop.eup %2160  ;;  %v810_v5 = vmul.f32 %v2159_v49, %v714_v28 }
 0x1e0   :  { %2162 = vrsqrt.f32 %v748_v55  ;;  %v686_v63 = vmax.f32 %v654_v1, 0.0  ;;  %v431_v4 = vpop.xlane.xlu0 %430  ;;  %v881_v21 = vadd.f32 %v2647_v60, %v844_v24  ;;  %v809_v30 = vmul.f32 %v2161_v61, %v713_v37 }
 0x1e1   :  { %2164 = vrsqrt.f32 %v747_v18  ;;  %v685_v12 = vmax.f32 %v653_v23, 0.0  ;;  %v914_v20 = vmax.f32 %v882_v43, 0.0  ;;  %v847_v34 = vmul.f32 %v2636_v10, %v810_v5 }
 0x1e2   :  { %v750_v8 = vadd.f32 1e-05, %v686_v63  ;;  %v913_v25 = vmax.f32 %v881_v21, 0.0  ;;  %v846_v6 = vmul.f32 %v2636_v10, %v809_v30  ;;  %v2829_v51 = vmul.f32 0.0078125, %v433_v62 }
 0x1e3   :  { %v749_v42 = vadd.f32 1e-05, %v685_v12  ;;  %v429_v56 = vpop.xlane.xlu1 %428  ;;  %v884_v11 = vadd.f32 %v2647_v60, %v847_v34  ;;  %v2831_v35 = vmul.f32 0.0078125, %v431_v4  ;;  %v717_v24 = vsub.f32 %v2506_v22, %v2793_v13 }
 0x1e4   :  { %2166 = vrsqrt.f32 %v750_v8  ;;  %v2811_v47 = vmul.f32 0.0078125, %v429_v56  ;;  %v427_v0 = vpop.xlane.xlu0 %426  ;;  %v935_v2 = vpack.c.bf16 %v914_v20, %v913_v25  ;;  %v883_v16 = vadd.f32 %v2647_v60, %v846_v6 }
 0x1e5   :  { %2168 = vrsqrt.f32 %v749_v42  ;;  %v2814_v26 = vmul.f32 0.0078125, %v427_v0  ;;  %v916_v14 = vmax.f32 %v884_v11, 0.0  ;;  %v626_v58 = vmul.f32 %v2829_v51, %v2829_v51 }
 0x1e6   :  { %2040 = vmatprep.mubr.bf16.mxu1 %v935_v2  ;;  %v624_v17 = vmul.f32 %v2811_v47, %v2811_v47  ;;  %v915_v40 = vmax.f32 %v883_v16, 0.0  ;;  %v625_v27 = vmul.f32 %v2831_v35, %v2831_v35 }
 0x1e7   :  { %v558_v45 = vpop.xlane.xlu1 %557  ;;  %v623_v52 = vmul.f32 %v2814_v26, %v2814_v26 }
 0x1e8   :  { %v592_v54 = vmul.f32 0.0078125, %v558_v45  ;;  %v556_v7 = vpop.xlane.xlu0 %555  ;;  %v936_v33 = vpack.c.bf16 %v916_v14, %v915_v40  ;;  %v720_v45 = vsub.f32 %v2553_v50, %v2811_v47  ;;  %v721_v40 = vsub.f32 %v2542_v41, %v2831_v35 }
 0x1e9   :  { %v591_v38 = vmul.f32 0.0078125, %v556_v7 }
 0x1ea   :  { %v2163_v59 = vpop.eup %2162  ;;  %v656_v19 = vsub.f32 %v592_v54, %v624_v17  ;;  %2041 = vmatmul.mubr.bf16.gmra.mrb[20].mxu1 %v936_v33  ;;  %v719_v17 = vsub.f32 %v2547_v46, %v2814_v26 }
 0x1eb   :  { %v2165_v53 = vpop.eup %2164  ;;  %v655_v15 = vsub.f32 %v591_v38, %v623_v52  ;;  %v562_v39 = vpop.xlane.xlu1 %561  ;;  %v812_v57 = vmul.f32 %v2163_v59, %v716_v36  ;;  %v722_v36 = vsub.f32 %v2550_v48, %v2829_v51 }
 0x1ec   :  { %v688_v9 = vmax.f32 %v656_v19, 0.0  ;;  %v594_v49 = vmul.f32 0.0078125, %v562_v39  ;;  %v560_v28 = vpop.xlane.xlu0 %559  ;;  %v811_v31 = vmul.f32 %v2165_v53, %v715_v44 }
 0x1ed   :  { %v687_v3 = vmax.f32 %v655_v15, 0.0  ;;  %v593_v29 = vmul.f32 0.0078125, %v560_v28  ;;  %v849_v55 = vmul.f32 %v2636_v10, %v812_v57  ;;  %v2866_v57 = vld [vmem:[%s3393_s3 + $0x3] ss:$0 sm:$0xff] }
 0x1ee   :  { %v2167_v1 = vpop.eup %2166  ;;  %v752_v18 = vadd.f32 1e-05, %v688_v9  ;;  %v658_v23 = vsub.f32 %v594_v49, %v626_v58  ;;  %v848_v62 = vmul.f32 %v2636_v10, %v811_v31 }
 0x1ef   :  { %v2169_v43 = vpop.eup %2168  ;;  %v751_v61 = vadd.f32 1e-05, %v687_v3  ;;  %v657_v63 = vsub.f32 %v593_v29, %v625_v27  ;;  %v886_v4 = vadd.f32 %v2647_v60, %v849_v55  ;;  %v814_v21 = vmul.f32 %v2167_v1, %v718_v32 }
 0x1f0   :  { %2170 = vrsqrt.f32 %v752_v18  ;;  %v690_v5 = vmax.f32 %v658_v23, 0.0  ;;  %v885_v37 = vadd.f32 %v2647_v60, %v848_v62  ;;  %v813_v12 = vmul.f32 %v2169_v43, %v717_v24 }
 0x1f1   :  { %2172 = vrsqrt.f32 %v751_v61  ;;  %v689_v20 = vmax.f32 %v657_v63, 0.0  ;;  %v918_v8 = vmax.f32 %v886_v4, 0.0  ;;  %v851_v22 = vmul.f32 %v2636_v10, %v814_v21 }
 0x1f2   :  { %v754_v13 = vadd.f32 1e-05, %v690_v5  ;;  %v917_v25 = vmax.f32 %v885_v37, 0.0  ;;  %v850_v42 = vmul.f32 %v2636_v10, %v813_v12 }
 0x1f3   :  { %v753_v56 = vadd.f32 1e-05, %v689_v20  ;;  %v888_v30 = vadd.f32 %v2647_v60, %v851_v22 }
 0x1f4   :  { %2174 = vrsqrt.f32 %v754_v13  ;;  %v937_v0 = vpack.c.bf16 %v918_v8, %v917_v25  ;;  %v887_v2 = vadd.f32 %v2647_v60, %v850_v42 }
 0x1f5   :  { %2176 = vrsqrt.f32 %v753_v56  ;;  %v920_v34 = vmax.f32 %v888_v30, 0.0 }
 0x1f6   :  { %2044 = vmatprep.mubr.bf16.mxu1 %v937_v0  ;;  %v919_v6 = vmax.f32 %v887_v2, 0.0 }
 0x1f8   :  { %v938_v11 = vpack.c.bf16 %v920_v34, %v919_v6 }
 0x1fa   :  { %v2171_v16 = vpop.eup %2170  ;;  %2045 = vmatmul.mubr.bf16.gmra.mrb[24].mxu1 %v938_v11 }
 0x1fb   :  { %v2173_v54 = vpop.eup %2172  ;;  %v816_v7 = vmul.f32 %v2171_v16, %v720_v45 }
 0x1fc   :  { %v815_v14 = vmul.f32 %v2173_v54, %v719_v17 }
 0x1fd   :  { %v853_v52 = vmul.f32 %v2636_v10, %v816_v7 }
 0x1fe   :  { %v2175_v38 = vpop.eup %2174  ;;  %v852_v59 = vmul.f32 %v2636_v10, %v815_v14 }
 0x1ff   :  { %v2177_v50 = vpop.eup %2176  ;;  %v890_v47 = vadd.f32 %v2647_v60, %v853_v52  ;;  %v818_v32 = vmul.f32 %v2175_v38, %v722_v36 }
 0x200   :  { %v889_v46 = vadd.f32 %v2647_v60, %v852_v59  ;;  %v817_v26 = vmul.f32 %v2177_v50, %v721_v40 }
 0x201   :  { %v922_v44 = vmax.f32 %v890_v47, 0.0  ;;  %v855_v19 = vmul.f32 %v2636_v10, %v818_v32 }
 0x202   :  { %v921_v53 = vmax.f32 %v889_v46, 0.0  ;;  %v854_v48 = vmul.f32 %v2636_v10, %v817_v26 }
 0x203   :  { %v892_v51 = vadd.f32 %v2647_v60, %v855_v19 }
 0x204   :  { %v939_v15 = vpack.c.bf16 %v922_v44, %v921_v53  ;;  %v891_v41 = vadd.f32 %v2647_v60, %v854_v48 }
 0x205   :  { %v924_v35 = vmax.f32 %v892_v51, 0.0 }
 0x206   :  { %2048 = vmatprep.mubr.bf16.mxu1 %v939_v15  ;;  %v923_v33 = vmax.f32 %v891_v41, 0.0 }
 0x208   :  { %v940_v39 = vpack.c.bf16 %v924_v35, %v923_v33 }
 0x20a   :  { %2049 = vmatmul.mubr.bf16.gmra.mrb[28].mxu1 %v940_v39 }
 0x26e   :  { %v2022_v58 = vpop.f32.mrb[0].mxu1 }
 0x26f   :  { %v2869_v9 = vadd.f32 %v2022_v58, %v2866_v57  ;;  %v1044_v10 = vpop.f32.mrb[1].mxu1 }
 0x270   :  { %v2023_v49 = vpop.f32.mrb[2].mxu1  ;;  %v2876_v31 = vadd.f32 %v2866_v57, %v1044_v10 }
 0x271   :  { %v2872_v28 = vadd.f32 %v2023_v49, %v2866_v57  ;;  %1175 = vadd.xlane.f32.xlu0 %v2869_v9  ;;  %v1047_v60 = vpop.f32.mrb[3].mxu1  ;;  %v1269_v3 = vmul.f32 %v2869_v9, %v2869_v9 }
 0x272   :  { %v2880_v27 = vadd.f32 %v2866_v57, %v1047_v60  ;;  %v1267_v55 = vmul.f32 %v2876_v31, %v2876_v31 }
 0x273   :  { %1177 = vadd.xlane.f32.xlu1 %v2872_v28  ;;  %v1270_v29 = vmul.f32 %v2872_v28, %v2872_v28 }
 0x274   :  { %v1268_v1 = vmul.f32 %v2880_v27, %v2880_v27 }
 0x275   :  { %1171 = vadd.xlane.f32.xlu0 %v2876_v31 }
 0x277   :  { %1173 = vadd.xlane.f32.xlu1 %v2880_v27 }
 0x279   :  { %1303 = vadd.xlane.f32.xlu0 %v1269_v3 }
 0x27b   :  { %1305 = vadd.xlane.f32.xlu1 %v1270_v29 }
 0x27d   :  { %1299 = vadd.xlane.f32.xlu0 %v1267_v55 }
 0x27e   :  { %v2026_v24 = vpop.f32.mrb[4].mxu1 }
 0x27f   :  { %v2893_v18 = vadd.f32 %v2026_v24, %v2866_v57  ;;  %1301 = vadd.xlane.f32.xlu1 %v1268_v1  ;;  %v1060_v23 = vpop.f32.mrb[5].mxu1 }
 0x280   :  { %v2027_v62 = vpop.f32.mrb[6].mxu1  ;;  %v2900_v63 = vadd.f32 %v2866_v57, %v1060_v23 }
 0x281   :  { %v2896_v43 = vadd.f32 %v2027_v62, %v2866_v57  ;;  %1183 = vadd.xlane.f32.xlu0 %v2893_v18  ;;  %v1063_v61 = vpop.f32.mrb[7].mxu1  ;;  %v1273_v21 = vmul.f32 %v2893_v18, %v2893_v18 }
 0x282   :  { %v2904_v4 = vadd.f32 %v2866_v57, %v1063_v61  ;;  %v1271_v37 = vmul.f32 %v2900_v63, %v2900_v63 }
 0x283   :  { %1185 = vadd.xlane.f32.xlu1 %v2896_v43  ;;  %v1274_v5 = vmul.f32 %v2896_v43, %v2896_v43 }
 0x284   :  { %v1272_v12 = vmul.f32 %v2904_v4, %v2904_v4 }
 0x285   :  { %1179 = vadd.xlane.f32.xlu0 %v2900_v63 }
 0x287   :  { %1181 = vadd.xlane.f32.xlu1 %v2904_v4 }
 0x289   :  { %1311 = vadd.xlane.f32.xlu0 %v1273_v21 }
 0x28b   :  { %1313 = vadd.xlane.f32.xlu1 %v1274_v5 }
 0x28d   :  { %1307 = vadd.xlane.f32.xlu0 %v1271_v37 }
 0x28e   :  { %v2030_v20 = vpop.f32.mrb[8].mxu1 }
 0x28f   :  { %v2917_v8 = vadd.f32 %v2030_v20, %v2866_v57  ;;  %1309 = vadd.xlane.f32.xlu1 %v1272_v12  ;;  %v1076_v22 = vpop.f32.mrb[9].mxu1 }
 0x290   :  { %v2031_v13 = vpop.f32.mrb[10].mxu1  ;;  %v2924_v56 = vadd.f32 %v2866_v57, %v1076_v22 }
 0x291   :  { %v2920_v25 = vadd.f32 %v2031_v13, %v2866_v57  ;;  %1191 = vadd.xlane.f32.xlu0 %v2917_v8  ;;  %v1079_v42 = vpop.f32.mrb[11].mxu1  ;;  %v1277_v0 = vmul.f32 %v2917_v8, %v2917_v8 }
 0x292   :  { %v2928_v30 = vadd.f32 %v2866_v57, %v1079_v42  ;;  %v1275_v34 = vmul.f32 %v2924_v56, %v2924_v56 }
 0x293   :  { %1193 = vadd.xlane.f32.xlu1 %v2920_v25  ;;  %v1278_v2 = vmul.f32 %v2920_v25, %v2920_v25 }
 0x294   :  { %v1276_v6 = vmul.f32 %v2928_v30, %v2928_v30 }
 0x295   :  { %1187 = vadd.xlane.f32.xlu0 %v2924_v56 }
 0x297   :  { %1189 = vadd.xlane.f32.xlu1 %v2928_v30 }
 0x299   :  { %1319 = vadd.xlane.f32.xlu0 %v1277_v0 }
 0x29b   :  { %1321 = vadd.xlane.f32.xlu1 %v1278_v2 }
 0x29d   :  { %1315 = vadd.xlane.f32.xlu0 %v1275_v34 }
 0x29e   :  { %v2940_v11 = vpop.f32.mrb[12].mxu1 }
 0x29f   :  { %1317 = vadd.xlane.f32.xlu1 %v1276_v6  ;;  %v1092_v45 = vpop.f32.mrb[13].mxu1 }
 0x2a0   :  { %v2943_v16 = vadd.f32 %v2866_v57, %v1092_v45  ;;  %v2945_v17 = vpop.f32.mrb[14].mxu1 }
 0x2a1   :  { %v1095_v54 = vpop.f32.mrb[15].mxu1 }
 0x2a2   :  { %v2948_v7 = vadd.f32 %v2866_v57, %v1095_v54  ;;  %1195 = vadd.xlane.f32.xlu0 %v2943_v16  ;;  %v1279_v42 = vmul.f32 %v2943_v16, %v2943_v16 }
 0x2a4   :  { %1197 = vadd.xlane.f32.xlu1 %v2948_v7  ;;  %v1280_v0 = vmul.f32 %v2948_v7, %v2948_v7 }
 0x2ad   :  { %v2038_v14 = vpop.f32.mrb[16].mxu1 }
 0x2ae   :  { %v2953_v36 = vadd.f32 %v2038_v14, %v2866_v57  ;;  %v1108_v52 = vpop.f32.mrb[17].mxu1 }
 0x2af   :  { %v2039_v38 = vpop.f32.mrb[18].mxu1  ;;  %v2960_v50 = vadd.f32 %v2866_v57, %v1108_v52  ;;  %v3050_v52 = vadd.f32 %v2940_v11, %v2866_v57 }
 0x2b0   :  { %v2956_v40 = vadd.f32 %v2039_v38, %v2866_v57  ;;  %1207 = vadd.xlane.f32.xlu0 %v2953_v36  ;;  %v1111_v59 = vpop.f32.mrb[19].mxu1  ;;  %v1285_v32 = vmul.f32 %v2953_v36, %v2953_v36  ;;  %v3054_v38 = vadd.f32 %v2945_v17, %v2866_v57 }
 0x2b1   :  { %v2964_v47 = vadd.f32 %v2866_v57, %v1111_v59  ;;  %v1283_v26 = vmul.f32 %v2960_v50, %v2960_v50  ;;  %3402 = vst [vmem:[#allocation7_spill] sm:$0xff] %v3050_v52  ;;  %v1281_v11 = vmul.f32 %v3050_v52, %v3050_v52 }
 0x2b2   :  { %1209 = vadd.xlane.f32.xlu1 %v2956_v40  ;;  %v1286_v46 = vmul.f32 %v2956_v40, %v2956_v40  ;;  %3403 = vst [vmem:[#allocation8_spill] sm:$0xff] %v3054_v38 }
 0x2b3   :  { %v1284_v44 = vmul.f32 %v2964_v47, %v2964_v47 }
 0x2b4   :  { %1203 = vadd.xlane.f32.xlu0 %v2960_v50 }
 0x2b6   :  { %1205 = vadd.xlane.f32.xlu1 %v2964_v47 }
 0x2b8   :  { %1335 = vadd.xlane.f32.xlu0 %v1285_v32 }
 0x2ba   :  { %1337 = vadd.xlane.f32.xlu1 %v1286_v46 }
 0x2bc   :  { %1331 = vadd.xlane.f32.xlu0 %v1283_v26 }
 0x2bd   :  { %v2042_v19 = vpop.f32.mrb[20].mxu1 }
 0x2be   :  { %v2977_v53 = vadd.f32 %v2042_v19, %v2866_v57  ;;  %1333 = vadd.xlane.f32.xlu1 %v1284_v44  ;;  %v1124_v48 = vpop.f32.mrb[21].mxu1 }
 0x2bf   :  { %v2043_v51 = vpop.f32.mrb[22].mxu1  ;;  %v2984_v35 = vadd.f32 %v2866_v57, %v1124_v48 }
 0x2c0   :  { %v2980_v15 = vadd.f32 %v2043_v51, %v2866_v57  ;;  %1215 = vadd.xlane.f32.xlu0 %v2977_v53  ;;  %v1127_v41 = vpop.f32.mrb[23].mxu1  ;;  %v1289_v39 = vmul.f32 %v2977_v53, %v2977_v53 }
 0x2c1   :  { %v2988_v33 = vadd.f32 %v2866_v57, %v1127_v41  ;;  %v1287_v10 = vmul.f32 %v2984_v35, %v2984_v35 }
 0x2c2   :  { %1217 = vadd.xlane.f32.xlu1 %v2980_v15  ;;  %v1290_v58 = vmul.f32 %v2980_v15, %v2980_v15 }
 0x2c3   :  { %v1288_v29 = vmul.f32 %v2988_v33, %v2988_v33 }
 0x2c4   :  { %1211 = vadd.xlane.f32.xlu0 %v2984_v35 }
 0x2c6   :  { %1213 = vadd.xlane.f32.xlu1 %v2988_v33 }
 0x2c8   :  { %1343 = vadd.xlane.f32.xlu0 %v1289_v39 }
 0x2ca   :  { %1345 = vadd.xlane.f32.xlu1 %v1290_v58 }
 0x2cc   :  { %1339 = vadd.xlane.f32.xlu0 %v1287_v10 }
 0x2cd   :  { %v2046_v49 = vpop.f32.mrb[24].mxu1 }
 0x2ce   :  { %v1140_v60 = vpop.f32.mrb[25].mxu1  ;;  %v2999_v3 = vadd.f32 %v2046_v49, %v2866_v57  ;;  %1341 = vadd.xlane.f32.xlu1 %v1288_v29 }
 0x2cf   :  { %v2047_v55 = vpop.f32.mrb[26].mxu1  ;;  %v3008_v23 = vadd.f32 %v2866_v57, %v1140_v60 }
 0x2d0   :  { %v1143_v1 = vpop.f32.mrb[27].mxu1  ;;  %v3004_v24 = vadd.f32 %v2047_v55, %v2866_v57  ;;  %1223 = vadd.xlane.f32.xlu0 %v2999_v3  ;;  %v1293_v61 = vmul.f32 %v2999_v3, %v2999_v3 }
 0x2d1   :  { %v3012_v62 = vadd.f32 %v2866_v57, %v1143_v1  ;;  %v1291_v5 = vmul.f32 %v3008_v23, %v3008_v23 }
 0x2d2   :  { %1225 = vadd.xlane.f32.xlu1 %v3004_v24  ;;  %v1294_v21 = vmul.f32 %v3004_v24, %v3004_v24 }
 0x2d3   :  { %v1292_v20 = vmul.f32 %v3012_v62, %v3012_v62 }
 0x2d4   :  { %1219 = vadd.xlane.f32.xlu0 %v3008_v23 }
 0x2d6   :  { %1221 = vadd.xlane.f32.xlu1 %v3012_v62 }
 0x2d8   :  { %1351 = vadd.xlane.f32.xlu0 %v1293_v61 }
 0x2da   :  { %1353 = vadd.xlane.f32.xlu1 %v1294_v21 }
 0x2dc   :  { %1347 = vadd.xlane.f32.xlu0 %v1291_v5 }
 0x2dd   :  { %v2050_v37 = vpop.f32.mrb[28].mxu1 }
 0x2de   :  { %v1156_v12 = vpop.f32.mrb[29].mxu1  ;;  %1349 = vadd.xlane.f32.xlu1 %v1292_v20  ;;  %v3029_v2 = vadd.f32 %v2050_v37, %v2866_v57 }
 0x2df   :  { %v2051_v22 = vpop.f32.mrb[30].mxu1  ;;  %v3036_v6 = vadd.f32 %v2866_v57, %v1156_v12 }
 0x2e0   :  { %v1159_v13 = vpop.f32.mrb[31].mxu1  ;;  %1323 = vadd.xlane.f32.xlu0 %v1279_v42  ;;  %v3032_v34 = vadd.f32 %v2051_v22, %v2866_v57  ;;  %v1297_v59 = vmul.f32 %v3029_v2, %v3029_v2 }
 0x2e1   :  { %v3040_v45 = vadd.f32 %v2866_v57, %v1159_v13  ;;  %v1295_v54 = vmul.f32 %v3036_v6, %v3036_v6  ;;  %v1282_v57 = vmul.f32 %v3054_v38, %v3054_v38 }
 0x2e2   :  { %1325 = vadd.xlane.f32.xlu1 %v1280_v0  ;;  %3401 = vst [vmem:[#allocation6_spill] sm:$0xff] %v3032_v34  ;;  %v1298_v32 = vmul.f32 %v3032_v34, %v3032_v34 }
 0x2e3   :  { %v1296_v14 = vmul.f32 %v3040_v45, %v3040_v45 }
 0x2e4   :  { %1231 = vadd.xlane.f32.xlu0 %v3029_v2 }
 0x2e6   :  { %1233 = vadd.xlane.f32.xlu1 %v3032_v34 }
 0x2e8   :  { %1227 = vadd.xlane.f32.xlu0 %v3036_v6 }
 0x2ea   :  { %1229 = vadd.xlane.f32.xlu1 %v3040_v45 }
 0x2ec   :  { %1355 = vadd.xlane.f32.xlu0 %v1295_v54 }
 0x2ee   :  { %1357 = vadd.xlane.f32.xlu1 %v1296_v14 }
 0x2f0   :  { %1199 = vadd.xlane.f32.xlu0 %v3050_v52 }
 0x2f2   :  { %1201 = vadd.xlane.f32.xlu1 %v3054_v38 }
 0x2f4   :  { %1359 = vadd.xlane.f32.xlu0 %v1297_v59 }
 0x2f6   :  { %1361 = vadd.xlane.f32.xlu1 %v1298_v32 }
 0x2f8   :  { %1327 = vadd.xlane.f32.xlu0 %v1281_v11 }
 0x2fa   :  { %1329 = vadd.xlane.f32.xlu1 %v1282_v57 }
 0x2fe   :  { %v1176_v17 = vpop.xlane.xlu0 %1175 }
 0x2ff   :  { %v1237_v44 = vmul.f32 0.0078125, %v1176_v17 }
 0x300   :  { %v1178_v46 = vpop.xlane.xlu1 %1177 }
 0x301   :  { %v1238_v48 = vmul.f32 0.0078125, %v1178_v46  ;;  %v1397_v41 = vmul.f32 %v1237_v44, %v1237_v44  ;;  %v1493_v32 = vsub.f32 %v2869_v9, %v1237_v44 }
 0x302   :  { %v3066_v26 = vpop.xlane.xlu0 %1171 }
 0x303   :  { %v1398_v10 = vmul.f32 %v1238_v48, %v1238_v48 }
 0x304   :  { %v3068_v19 = vpop.xlane.xlu1 %1173 }
 0x305   :  { %v3117_v38 = vmul.f32 0.0078125, %v3068_v19 }
 0x306   :  { %v1304_v51 = vpop.xlane.xlu0 %1303 }
 0x307   :  { %v1365_v39 = vmul.f32 0.0078125, %v1304_v51  ;;  %v1396_v19 = vmul.f32 %v3117_v38, %v3117_v38 }
 0x308   :  { %v1306_v58 = vpop.xlane.xlu1 %1305 }
 0x309   :  { %v1429_v49 = vsub.f32 %v1365_v39, %v1397_v41  ;;  %v1366_v60 = vmul.f32 0.0078125, %v1306_v58  ;;  %v1494_v41 = vsub.f32 %v2872_v28, %v1238_v48  ;;  %v3085_v58 = vld [vmem:[%s3393_s3 + $0x4] ss:$0 sm:$0xff]  ;;  %v3093_v28 = vld [vmem:[%s3393_s3 + $0x5] ss:$0 sm:$0xff] }
 0x30a   :  { %v3070_v29 = vpop.xlane.xlu0 %1299 }
 0x30b   :  { %v1461_v55 = vmax.f32 %v1429_v49, 0.0  ;;  %v1430_v1 = vsub.f32 %v1366_v60, %v1398_v10 }
 0x30c   :  { %v3072_v61 = vpop.xlane.xlu1 %1301 }
 0x30d   :  { %v1525_v21 = vadd.f32 1e-05, %v1461_v55  ;;  %v1462_v5 = vmax.f32 %v1430_v1, 0.0 }
 0x30e   :  { %v1184_v37 = vpop.xlane.xlu0 %1183 }
 0x30f   :  { %2178 = vrsqrt.f32 %v1525_v21  ;;  %v1526_v12 = vadd.f32 1e-05, %v1462_v5  ;;  %v1241_v13 = vmul.f32 0.0078125, %v1184_v37 }
 0x310   :  { %v1186_v20 = vpop.xlane.xlu1 %1185 }
 0x311   :  { %2180 = vrsqrt.f32 %v1526_v12  ;;  %v1242_v0 = vmul.f32 0.0078125, %v1186_v20  ;;  %v1401_v14 = vmul.f32 %v1241_v13, %v1241_v13 }
 0x312   :  { %v3074_v22 = vpop.xlane.xlu0 %1179 }
 0x313   :  { %v1402_v17 = vmul.f32 %v1242_v0, %v1242_v0 }
 0x314   :  { %v3076_v42 = vpop.xlane.xlu1 %1181 }
 0x316   :  { %v1312_v54 = vpop.xlane.xlu0 %1311 }
 0x317   :  { %v1369_v59 = vmul.f32 0.0078125, %v1312_v54 }
 0x318   :  { %v1314_v11 = vpop.xlane.xlu1 %1313 }
 0x319   :  { %v2179_v57 = vpop.eup %2178  ;;  %v1433_v46 = vsub.f32 %v1369_v59, %v1401_v14  ;;  %v1370_v51 = vmul.f32 0.0078125, %v1314_v11 }
 0x31a   :  { %v3080_v39 = vpop.xlane.xlu0 %1307  ;;  %v1589_v10 = vmul.f32 %v2179_v57, %v1493_v32 }
 0x31b   :  { %v2181_v49 = vpop.eup %2180  ;;  %v1465_v60 = vmax.f32 %v1433_v46, 0.0  ;;  %v1434_v55 = vsub.f32 %v1370_v51, %v1402_v17 }
 0x31c   :  { %v3087_v1 = vpop.xlane.xlu1 %1309  ;;  %v1590_v9 = vmul.f32 %v2181_v49, %v1494_v41  ;;  %v1626_v5 = vmul.f32 %v3085_v58, %v1589_v10 }
 0x31d   :  { %v1529_v44 = vadd.f32 1e-05, %v1465_v60  ;;  %v1466_v21 = vmax.f32 %v1434_v55, 0.0  ;;  %v1497_v60 = vsub.f32 %v2893_v18, %v1241_v13  ;;  %v3114_v13 = vmul.f32 0.0078125, %v3066_v26 }
 0x31e   :  { %v1192_v37 = vpop.xlane.xlu0 %1191  ;;  %v1627_v48 = vmul.f32 %v3085_v58, %v1590_v9  ;;  %v1663_v54 = vadd.f32 %v3093_v28, %v1626_v5  ;;  %v3108_v9 = vld [vmem:[%s3394_s4] sm:$0x1]  ;;  %v1364_v26 = vmul.f32 0.0078125, %v3072_v61  ;;  %s2268_s4 = smov [#allocation3]  }
 0x31f   :  { %2182 = vrsqrt.f32 %v1529_v44  ;;  %v1530_v12 = vadd.f32 1e-05, %v1466_v21  ;;  %v1245_v32 = vmul.f32 0.0078125, %v1192_v37  ;;  %3404 = vst [vmem:[#allocation9_spill] sm:$0xff] %v3108_v9  ;;  %1966 = vmatprep.mubr.f32.mxu0 %v3108_v9  ;;  %s1836_s8 = sshll.u32 %s2268_s4, 4  ;;  %s1837_s8 = int_to_ptr.vmem [resolvable:$true] %s1836_s8 }
 0x320   :  { %v1194_v20 = vpop.xlane.xlu1 %1193  ;;  %v1664_v14 = vadd.f32 %v3093_v28, %v1627_v48  ;;  %v1695_v17 = vmax.f32 %v1663_v54, 0.0  ;;  %v1498_v48 = vsub.f32 %v2896_v43, %v1242_v0  ;;  %s2242_s0 = scalar_lea.vmem %s1837_s8, 32  ;;  %p2247_p1 = scmp.lt.s32.totalorder %s1837_s8, %s1837_s8 }
 0x321   :  { %2184 = vrsqrt.f32 %v1530_v12  ;;  %v1246_v57 = vmul.f32 0.0078125, %v1194_v20  ;;  %v1405_v41 = vmul.f32 %v1245_v32, %v1245_v32  ;;  %p2243_p0 = scmp.ne.s32.totalorder %s1837_s8, %s2242_s0  ;;  %p2248_p2 = scmp.lt.s32.totalorder %s2242_s0, %s2242_s0 }
 0x322   :  { %v3098_v59 = vpop.xlane.xlu0 %1187  ;;  %v1696_v46 = vmax.f32 %v1664_v14, 0.0 }
 0x323   :  { %v1406_v21 = vmul.f32 %v1246_v57, %v1246_v57  ;;  %p2249_p3 = por %p2248_p2, %p2247_p1 }
 0x324   :  { %v3100_v11 = vpop.xlane.xlu1 %1189  ;;  %v3102_v49 = vpack.c.bf16 %v1696_v46, %v1695_v17 }
 0x325   :  { %p2250_p4 = pnand %p2249_p3, %p2243_p0 }
 0x326   :  { %v1320_v51 = vpop.xlane.xlu0 %1319 }
 0x327   :  { %v1373_v10 = vmul.f32 0.0078125, %v1320_v51 }
 0x328   :  { %v1322_v55 = vpop.xlane.xlu1 %1321 }
 0x329   :  { %v2183_v44 = vpop.eup %2182  ;;  %v1437_v5 = vsub.f32 %v1373_v10, %v1405_v41  ;;  %v1374_v37 = vmul.f32 0.0078125, %v1322_v55  ;;  %v1363_v10 = vmul.f32 0.0078125, %v3070_v29  ;;  %v1395_v55 = vmul.f32 %v3114_v13, %v3114_v13 }
 0x32a   :  { %v1593_v12 = vmul.f32 %v2183_v44, %v1497_v60  ;;  %v1428_v29 = vsub.f32 %v1364_v26, %v1396_v19 }
 0x32b   :  { %v2185_v20 = vpop.eup %2184  ;;  %v1469_v54 = vmax.f32 %v1437_v5, 0.0  ;;  %v1438_v14 = vsub.f32 %v1374_v37, %v1406_v21  ;;  %v1427_v44 = vsub.f32 %v1363_v10, %v1395_v55  ;;  %v1726_v37 = vld [vmem:[#allocation2] sm:$0x1] }
 0x32c   :  { %v1594_v17 = vmul.f32 %v2185_v20, %v1498_v48  ;;  %v1630_v18 = vmul.f32 %v3085_v58, %v1593_v12  ;;  %v2266_v12 = vmov 0   ;;  %v3130_v20 = vpop.xlane.xlu0 %1315  ;;  %v3133_v61 = vpop.xlane.xlu1 %1317 }
 0x32d   :  { %v1533_v46 = vadd.f32 1e-05, %v1469_v54  ;;  %v1470_v51 = vmax.f32 %v1438_v14, 0.0  ;;  %2087 = vset.pattern.permute.xlu0 %v2266_v12  ;;  %v1459_v54 = vmax.f32 %v1427_v44, 0.0  ;;  %v1501_v14 = vsub.f32 %v2917_v8, %v1245_v32 }
 0x32e   :  { %v1631_v41 = vmul.f32 %v3085_v58, %v1594_v17  ;;  %v1667_v0 = vadd.f32 %v3093_v28, %v1630_v18  ;;  %1729 = vperm.xlu0 %2087, %v1726_v37   ;;  %v1460_v18 = vmax.f32 %v1428_v29, 0.0  ;;  %v1367_v8 = vmul.f32 0.0078125, %v3080_v39 }
 0x32f   :  { %2186 = vrsqrt.f32 %v1533_v46  ;;  %v1534_v43 = vadd.f32 1e-05, %v1470_v51  ;;  %v1502_v46 = vsub.f32 %v2920_v25, %v1246_v57  ;;  %v1523_v10 = vadd.f32 1e-05, %v1459_v54 }
 0x330   :  { %v1668_v60 = vadd.f32 %v3093_v28, %v1631_v41  ;;  %v1699_v21 = vmax.f32 %v1667_v0, 0.0  ;;  %v3139_v0 = vpop.xlane.xlu0 %1195  ;;  %v1524_v26 = vadd.f32 1e-05, %v1460_v18 }
 0x331   :  { %2188 = vrsqrt.f32 %v1534_v43  ;;  %v3137_v43 = vmul.f32 0.0078125, %v3074_v22  ;;  %v3143_v32 = vpop.xlane.xlu1 %1197 }
 0x332   :  { %v1700_v5 = vmax.f32 %v1668_v60, 0.0  ;;  %2190 = vrsqrt.f32 %v1523_v10 }
 0x333   :  { %v1399_v57 = vmul.f32 %v3137_v43, %v3137_v43  ;;  %2192 = vrsqrt.f32 %v1524_v26 }
 0x334   :  { %v3128_v48 = vpack.c.bf16 %v1700_v5, %v1699_v21 }
 0x335   :  { %v1431_v21 = vsub.f32 %v1367_v8, %v1399_v57  ;;  %v1491_v8 = vsub.f32 %v2876_v31, %v3114_v13 }
 0x339   :  { %v2187_v17 = vpop.eup %2186 }
 0x33a   :  { %v1597_v51 = vmul.f32 %v2187_v17, %v1501_v14  ;;  %v3155_v14 = vmul.f32 0.0078125, %v3076_v42  ;;  %v1463_v17 = vmax.f32 %v1431_v21, 0.0 }
 0x33b   :  { %v2189_v41 = vpop.eup %2188 }
 0x33c   :  { %v1598_v60 = vmul.f32 %v2189_v41, %v1502_v46  ;;  %v1634_v55 = vmul.f32 %v3085_v58, %v1597_v51  ;;  %v1368_v51 = vmul.f32 0.0078125, %v3087_v1  ;;  %v2191_v10 = vpop.eup %2190  ;;  %v1400_v42 = vmul.f32 %v3155_v14, %v3155_v14 }
 0x33d   :  { %v1208_v22 = vpop.xlane.xlu0 %1207 }
 0x33e   :  { %v1635_v19 = vmul.f32 %v3085_v58, %v1598_v60  ;;  %v1671_v25 = vadd.f32 %v3093_v28, %v1634_v55  ;;  %v3152_v54 = vmul.f32 0.0078125, %v1208_v22  ;;  %v2193_v22 = vpop.eup %2192 }
 0x33f   :  { %v1210_v5 = vpop.xlane.xlu1 %1209 }
 0x340   :  { %v1672_v44 = vadd.f32 %v3093_v28, %v1635_v19  ;;  %v1703_v37 = vmax.f32 %v1671_v25, 0.0  ;;  %v3157_v46 = vmul.f32 0.0078125, %v1210_v5  ;;  %v1413_v60 = vmul.f32 %v3152_v54, %v3152_v54 }
 0x341   :  { %v1204_v12 = vpop.xlane.xlu0 %1203  ;;  %v1527_v19 = vadd.f32 1e-05, %v1463_v17  ;;  %v1492_v5 = vsub.f32 %v2880_v27, %v3117_v38 }
 0x342   :  { %v1704_v29 = vmax.f32 %v1672_v44, 0.0  ;;  %v3162_v55 = vmul.f32 0.0078125, %v1204_v12  ;;  %v1414_v1 = vmul.f32 %v3157_v46, %v3157_v46  ;;  %v1587_v12 = vmul.f32 %v2191_v10, %v1491_v8 }
 0x343   :  { %v1206_v18 = vpop.xlane.xlu1 %1205  ;;  %2194 = vrsqrt.f32 %v1527_v19  ;;  %v1588_v52 = vmul.f32 %v2193_v22, %v1492_v5 }
 0x344   :  { %v3150_v39 = vpack.c.bf16 %v1704_v29, %v1703_v37  ;;  %v3168_v25 = vmul.f32 0.0078125, %v1206_v18  ;;  %v1432_v37 = vsub.f32 %v1368_v51, %v1400_v42  ;;  %v1411_v31 = vmul.f32 %v3162_v55, %v3162_v55 }
 0x345   :  { %v1336_v41 = vpop.xlane.xlu0 %1335  ;;  %v1624_v51 = vmul.f32 %v3085_v58, %v1587_v12  ;;  %v1625_v19 = vmul.f32 %v3085_v58, %v1588_v52 }
 0x346   :  { %v1381_v26 = vmul.f32 0.0078125, %v1336_v41  ;;  %v1412_v41 = vmul.f32 %v3168_v25, %v3168_v25  ;;  %v1464_v27 = vmax.f32 %v1432_v37, 0.0 }
 0x347   :  { %v1338_v57 = vpop.xlane.xlu1 %1337  ;;  %v3181_v5 = vadd.f32 %v3093_v28, %v1624_v51  ;;  %v3192_v52 = vadd.f32 %v3093_v28, %v1625_v19 }
 0x348   :  { %v1445_v44 = vsub.f32 %v1381_v26, %v1413_v60  ;;  %v1382_v21 = vmul.f32 0.0078125, %v1338_v57 }
 0x349   :  { %v1332_v29 = vpop.xlane.xlu0 %1331 }
 0x34a   :  { %v1477_v13 = vmax.f32 %v1445_v44, 0.0  ;;  %v1446_v17 = vsub.f32 %v1382_v21, %v1414_v1  ;;  %v1379_v18 = vmul.f32 0.0078125, %v1332_v29  ;;  %v1528_v29 = vadd.f32 1e-05, %v1464_v27 }
 0x34b   :  { %v1334_v9 = vpop.xlane.xlu1 %1333 }
 0x34c   :  { %v1541_v60 = vadd.f32 1e-05, %v1477_v13  ;;  %v1478_v26 = vmax.f32 %v1446_v17, 0.0  ;;  %v1443_v57 = vsub.f32 %v1379_v18, %v1411_v31  ;;  %v1380_v34 = vmul.f32 0.0078125, %v1334_v9 }
 0x34d   :  { %v1216_v38 = vpop.xlane.xlu0 %1215  ;;  %v3184_v9 = vmul.f32 0.0078125, %v3098_v59  ;;  %v1495_v13 = vsub.f32 %v2900_v63, %v3137_v43  ;;  %v1371_v17 = vmul.f32 0.0078125, %v3130_v20  ;;  %v2195_v59 = vpop.eup %2194 }
 0x34e   :  { %2196 = vrsqrt.f32 %v1541_v60  ;;  %v1542_v10 = vadd.f32 1e-05, %v1478_v26  ;;  %v1475_v8 = vmax.f32 %v1443_v57, 0.0  ;;  %v1444_v42 = vsub.f32 %v1380_v34, %v1412_v41 }
 0x34f   :  { %v1218_v1 = vpop.xlane.xlu1 %1217  ;;  %v3186_v12 = vmul.f32 0.0078125, %v1216_v38  ;;  %v3189_v34 = vmul.f32 0.0078125, %v3100_v11  ;;  %v1372_v11 = vmul.f32 0.0078125, %v3133_v61  ;;  %v1693_v26 = vmax.f32 %v3181_v5, 0.0 }
 0x350   :  { %2198 = vrsqrt.f32 %v1542_v10  ;;  %v1539_v44 = vadd.f32 1e-05, %v1475_v8  ;;  %v1476_v21 = vmax.f32 %v1444_v42, 0.0  ;;  %v3197_v18 = vmul.f32 0.0078125, %v1218_v1 }
 0x351   :  { %v1212_v22 = vpop.xlane.xlu0 %1211  ;;  %v1403_v57 = vmul.f32 %v3184_v9, %v3184_v9  ;;  %v1417_v63 = vmul.f32 %v3186_v12, %v3186_v12  ;;  %v1404_v27 = vmul.f32 %v3189_v34, %v3189_v34  ;;  %v1694_v10 = vmax.f32 %v3192_v52, 0.0 }
 0x352   :  { %2200 = vrsqrt.f32 %v1539_v44  ;;  %v1540_v37 = vadd.f32 1e-05, %v1476_v21  ;;  %v3207_v20 = vmul.f32 0.0078125, %v1212_v22  ;;  %v1418_v1 = vmul.f32 %v3197_v18, %v3197_v18 }
 0x353   :  { %v1214_v31 = vpop.xlane.xlu1 %1213  ;;  %v1435_v42 = vsub.f32 %v1371_v17, %v1403_v57  ;;  %v1436_v21 = vsub.f32 %v1372_v11, %v1404_v27  ;;  %v1510_v22 = vsub.f32 %v2956_v40, %v3157_v46 }
 0x354   :  { %2202 = vrsqrt.f32 %v1540_v37  ;;  %v3213_v51 = vmul.f32 0.0078125, %v1214_v31  ;;  %v1591_v37 = vmul.f32 %v2195_v59, %v1495_v13  ;;  %v1415_v52 = vmul.f32 %v3207_v20, %v3207_v20 }
 0x355   :  { %2204 = vrsqrt.f32 %v1528_v29  ;;  %v1344_v60 = vpop.xlane.xlu0 %1343  ;;  %v1509_v29 = vsub.f32 %v2953_v36, %v3152_v54 }
 0x356   :  { %v1385_v43 = vmul.f32 0.0078125, %v1344_v60  ;;  %v1416_v11 = vmul.f32 %v3213_v51, %v3213_v51 }
 0x357   :  { %v1346_v61 = vpop.xlane.xlu1 %1345 }
 0x358   :  { %v2197_v8 = vpop.eup %2196  ;;  %v1449_v19 = vsub.f32 %v1385_v43, %v1417_v63  ;;  %v1386_v44 = vmul.f32 0.0078125, %v1346_v61  ;;  %v1507_v63 = vsub.f32 %v2960_v50, %v3162_v55  ;;  %v1468_v61 = vmax.f32 %v1436_v21, 0.0 }
 0x359   :  { %v1340_v5 = vpop.xlane.xlu0 %1339  ;;  %v1605_v36 = vmul.f32 %v2197_v8, %v1509_v29  ;;  %v1467_v29 = vmax.f32 %v1435_v42, 0.0 }
 0x35a   :  { %v2199_v31 = vpop.eup %2198  ;;  %v1481_v60 = vmax.f32 %v1449_v19, 0.0  ;;  %v1450_v17 = vsub.f32 %v1386_v44, %v1418_v1  ;;  %v1383_v57 = vmul.f32 0.0078125, %v1340_v5  ;;  %v1508_v19 = vsub.f32 %v2964_v47, %v3168_v25 }
 0x35b   :  { %v1342_v43 = vpop.xlane.xlu1 %1341  ;;  %v1606_v54 = vmul.f32 %v2199_v31, %v1510_v22  ;;  %v1642_v21 = vmul.f32 %v3085_v58, %v1605_v36 }
 0x35c   :  { %v2201_v27 = vpop.eup %2200  ;;  %v1545_v40 = vadd.f32 1e-05, %v1481_v60  ;;  %v1482_v46 = vmax.f32 %v1450_v17, 0.0  ;;  %v1447_v13 = vsub.f32 %v1383_v57, %v1415_v52  ;;  %v1384_v59 = vmul.f32 0.0078125, %v1342_v43 }
 0x35d   :  { %v1224_v1 = vpop.xlane.xlu0 %1223  ;;  %v1603_v44 = vmul.f32 %v2201_v27, %v1507_v63  ;;  %v1643_v5 = vmul.f32 %v3085_v58, %v1606_v54  ;;  %v3234_v60 = vmul.f32 0.0078125, %v3139_v0  ;;  %v1532_v43 = vadd.f32 1e-05, %v1468_v61 }
 0x35e   :  { %v2203_v50 = vpop.eup %2202  ;;  %2206 = vrsqrt.f32 %v1545_v40  ;;  %v1546_v55 = vadd.f32 1e-05, %v1482_v46  ;;  %v1479_v38 = vmax.f32 %v1447_v13, 0.0  ;;  %v1448_v41 = vsub.f32 %v1384_v59, %v1416_v11 }
 0x35f   :  { %v2205_v8 = vpop.eup %2204  ;;  %v1226_v22 = vpop.xlane.xlu1 %1225  ;;  %v1604_v31 = vmul.f32 %v2203_v50, %v1508_v19  ;;  %v1640_v52 = vmul.f32 %v3085_v58, %v1603_v44  ;;  %v2054_v11 = vpack.c.bf16 %v1694_v10, %v1693_v26  ;;  %v1680_v42 = vadd.f32 %v3093_v28, %v1643_v5 }
 0x360   :  { %2208 = vrsqrt.f32 %v1546_v55  ;;  %v1543_v47 = vadd.f32 1e-05, %v1479_v38  ;;  %v1480_v25 = vmax.f32 %v1448_v41, 0.0  ;;  %v3239_v27 = vmul.f32 0.0078125, %v1224_v1 }
 0x361   :  { %v1220_v17 = vpop.xlane.xlu0 %1219  ;;  %v1641_v57 = vmul.f32 %v3085_v58, %v1604_v31  ;;  %v1677_v63 = vadd.f32 %v3093_v28, %v1640_v52  ;;  %v1679_v40 = vadd.f32 %v3093_v28, %v1642_v21  ;;  %v3405_v41 = vsub.f32 %v2904_v4, %v3155_v14 }
 0x362   :  { %2210 = vrsqrt.f32 %v1543_v47  ;;  %v1544_v54 = vadd.f32 1e-05, %v1480_v25  ;;  %v3247_v46 = vmul.f32 %v3085_v58, %v1591_v37  ;;  %v1531_v26 = vadd.f32 1e-05, %v1467_v29 }
 0x363   :  { %v1222_v36 = vpop.xlane.xlu1 %1221  ;;  %v1678_v0 = vadd.f32 %v3093_v28, %v1641_v57  ;;  %v1592_v38 = vmul.f32 %v2205_v8, %v3405_v41  ;;  %v3251_v10 = vmul.f32 %v3234_v60, %v3234_v60  ;;  %v3253_v13 = vmul.f32 0.0078125, %v1226_v22 }
 0x364   :  { %2212 = vrsqrt.f32 %v1544_v54  ;;  %v3256_v59 = vmul.f32 0.0078125, %v3143_v32  ;;  %v1709_v19 = vmax.f32 %v1677_v63, 0.0  ;;  %v1712_v44 = vmax.f32 %v1680_v42, 0.0 }
 0x365   :  { %v1352_v61 = vpop.xlane.xlu0 %1351  ;;  %v1710_v1 = vmax.f32 %v1678_v0, 0.0  ;;  %2214 = vrsqrt.f32 %v1532_v43  ;;  %v1421_v4 = vmul.f32 %v3239_v27, %v3239_v27  ;;  %v3260_v14 = vmul.f32 0.0078125, %v1220_v17 }
 0x366   :  { %v1389_v37 = vmul.f32 0.0078125, %v1352_v61  ;;  %v3262_v5 = vmul.f32 0.0078125, %v1222_v36  ;;  %v1711_v8 = vmax.f32 %v1679_v40, 0.0  ;;  %v1629_v29 = vmul.f32 %v3085_v58, %v1592_v38 }
 0x367   :  { %v1354_v50 = vpop.xlane.xlu1 %1353  ;;  %v2052_v55 = vpack.c.bf16 %v1710_v1, %v1709_v19  ;;  %2216 = vrsqrt.f32 %v1531_v26  ;;  %v1422_v22 = vmul.f32 %v3253_v13, %v3253_v13  ;;  %v1408_v21 = vmul.f32 %v3256_v59, %v3256_v59 }
 0x368   :  { %v2207_v32 = vpop.eup %2206  ;;  %v1453_v31 = vsub.f32 %v1389_v37, %v1421_v4  ;;  %v1390_v52 = vmul.f32 0.0078125, %v1354_v50  ;;  %v1513_v47 = vsub.f32 %v2977_v53, %v3186_v12  ;;  %v1514_v25 = vsub.f32 %v2980_v15, %v3197_v18 }
 0x369   :  { %2053 = vmatprep.subr.bf16.mxu0 %v2052_v55  ;;  %v1348_v17 = vpop.xlane.xlu0 %1347  ;;  %v2056_v57 = vpack.c.bf16 %v1712_v44, %v1711_v8  ;;  %v1419_v42 = vmul.f32 %v3260_v14, %v3260_v14  ;;  %v1511_v0 = vsub.f32 %v2984_v35, %v3207_v20  ;;  %v1420_v53 = vmul.f32 %v3262_v5, %v3262_v5 }
 0x36a   :  { %v2209_v63 = vpop.eup %2208  ;;  %v1485_v43 = vmax.f32 %v1453_v31, 0.0  ;;  %v1454_v54 = vsub.f32 %v1390_v52, %v1422_v22  ;;  %v1387_v36 = vmul.f32 0.0078125, %v1348_v17  ;;  %2055 = vmatpush3.bf16.xpose.msra.mxu0 %v2054_v11  ;;  %v1609_v15 = vmul.f32 %v2207_v32, %v1513_v47 }
 0x36b   :  { %v1350_v12 = vpop.xlane.xlu1 %1349  ;;  %2057 = vmatprep.subr.bf16.mxu0 %v2056_v57  ;;  %v1610_v18 = vmul.f32 %v2209_v63, %v1514_v25  ;;  %v1512_v19 = vsub.f32 %v2988_v33, %v3213_v51  ;;  %v1666_v44 = vadd.f32 %v3093_v28, %v1629_v29 }
 0x36c   :  { %v2211_v40 = vpop.eup %2210  ;;  %v1549_v41 = vadd.f32 1e-05, %v1485_v43  ;;  %v1486_v38 = vmax.f32 %v1454_v54, 0.0  ;;  %v1451_v26 = vsub.f32 %v1387_v36, %v1419_v42  ;;  %v1388_v61 = vmul.f32 0.0078125, %v1350_v12 }
 0x36d   :  { %v1324_v1 = vpop.xlane.xlu0 %1323  ;;  %v1607_v11 = vmul.f32 %v2211_v40, %v1511_v0  ;;  %v1647_v35 = vmul.f32 %v3085_v58, %v1610_v18  ;;  %v1646_v31 = vmul.f32 %v3085_v58, %v1609_v15  ;;  %v1665_v36 = vadd.f32 %v3093_v28, %v3247_v46 }
 0x36e   :  { %v2213_v20 = vpop.eup %2212  ;;  %2218 = vrsqrt.f32 %v1549_v41  ;;  %v1550_v4 = vadd.f32 1e-05, %v1486_v38  ;;  %v1483_v37 = vmax.f32 %v1451_v26, 0.0  ;;  %v1452_v50 = vsub.f32 %v1388_v61, %v1420_v53 }
 0x36f   :  { %v1375_v55 = vmul.f32 0.0078125, %v1324_v1  ;;  %v1326_v8 = vpop.xlane.xlu1 %1325  ;;  %v1608_v32 = vmul.f32 %v2213_v20, %v1512_v19  ;;  %v1644_v22 = vmul.f32 %v3085_v58, %v1607_v11  ;;  %v2215_v52 = vpop.eup %2214  ;;  %v1684_v63 = vadd.f32 %v3093_v28, %v1647_v35 }
 0x370   :  { %2220 = vrsqrt.f32 %v1550_v4  ;;  %v1547_v33 = vadd.f32 1e-05, %v1483_v37  ;;  %v1484_v51 = vmax.f32 %v1452_v50, 0.0  ;;  %v1376_v47 = vmul.f32 0.0078125, %v1326_v8 }
 0x371   :  { %v1439_v29 = vsub.f32 %v1375_v55, %v3251_v10  ;;  %v1232_v25 = vpop.xlane.xlu0 %1231  ;;  %v1645_v17 = vmul.f32 %v3085_v58, %v1608_v32  ;;  %v1681_v57 = vadd.f32 %v3093_v28, %v1644_v22  ;;  %v2217_v42 = vpop.eup %2216  ;;  %v1499_v0 = vsub.f32 %v2924_v56, %v3184_v9 }
 0x372   :  { %2222 = vrsqrt.f32 %v1547_v33  ;;  %v1548_v43 = vadd.f32 1e-05, %v1484_v51  ;;  %v1440_v54 = vsub.f32 %v1376_v47, %v1408_v21  ;;  %2059 = vmatpush3.bf16.xpose.msra.mxu0 %v3102_v49  ;;  %v1683_v12 = vadd.f32 %v3093_v28, %v1646_v31 }
 0x373   :  { %v1234_v10 = vpop.xlane.xlu1 %1233  ;;  %v1682_v53 = vadd.f32 %v3093_v28, %v1645_v17  ;;  %v3406_v15 = vsub.f32 %v2928_v30, %v3189_v34  ;;  %v1471_v40 = vmax.f32 %v1439_v29, 0.0  ;;  %v1698_v41 = vmax.f32 %v1666_v44, 0.0 }
 0x374   :  { %2224 = vrsqrt.f32 %v1548_v43  ;;  %v1472_v21 = vmax.f32 %v1440_v54, 0.0  ;;  %v1713_v38 = vmax.f32 %v1681_v57, 0.0  ;;  %v1716_v46 = vmax.f32 %v1684_v63, 0.0 }
 0x375   :  { %v1596_v18 = vmul.f32 %v2215_v52, %v3406_v15  ;;  %v1228_v49 = vpop.xlane.xlu0 %1227  ;;  %v1714_v26 = vmax.f32 %v1682_v53, 0.0  ;;  %v1697_v56 = vmax.f32 %v1665_v36, 0.0  ;;  %v1595_v9 = vmul.f32 %v2217_v42, %v1499_v0 }
 0x376   :  { %v1536_v61 = vadd.f32 1e-05, %v1472_v21  ;;  %v3299_v19 = vmul.f32 0.0078125, %v1228_v49  ;;  %v1715_v35 = vmax.f32 %v1683_v12, 0.0  ;;  %v1535_v34 = vadd.f32 1e-05, %v1471_v40 }
 0x377   :  { %v1230_v1 = vpop.xlane.xlu1 %1229  ;;  %v2060_v11 = vpack.c.bf16 %v1714_v26, %v1713_v38  ;;  %v1633_v20 = vmul.f32 %v3085_v58, %v1596_v18  ;;  %v2062_v37 = vpack.c.bf16 %v1698_v41, %v1697_v56  ;;  %v1517_v44 = vsub.f32 %v2999_v3, %v3239_v27 }
 0x378   :  { %v2219_v30 = vpop.eup %2218  ;;  %v3302_v4 = vmul.f32 0.0078125, %v1230_v1  ;;  %v1518_v50 = vsub.f32 %v3004_v24, %v3253_v13  ;;  %v2064_v8 = vpack.c.bf16 %v1716_v46, %v1715_v35  ;;  %2226 = vrsqrt.f32 %v1536_v61 }
 0x379   :  { %2061 = vmatprep.subr.bf16.mxu0 %v2060_v11  ;;  %v1356_v55 = vpop.xlane.xlu0 %1355  ;;  %v1423_v22 = vmul.f32 %v3299_v19, %v3299_v19  ;;  %v1632_v52 = vmul.f32 %v3085_v58, %v1595_v9  ;;  %v1515_v33 = vsub.f32 %v3008_v23, %v3260_v14  ;;  %v1670_v3 = vadd.f32 %v3093_v28, %v1633_v20 }
 0x37a   :  { %v2221_v32 = vpop.eup %2220  ;;  %v1391_v31 = vmul.f32 0.0078125, %v1356_v55  ;;  %2063 = vmatpush3.bf16.xpose.msra.mxu0 %v2062_v37  ;;  %v1613_v24 = vmul.f32 %v2219_v30, %v1517_v44  ;;  %2228 = vrsqrt.f32 %v1535_v34  ;;  %v1424_v47 = vmul.f32 %v3302_v4, %v3302_v4 }
 0x37b   :  { %v1358_v51 = vpop.xlane.xlu1 %1357  ;;  %2065 = vmatprep.subr.bf16.mxu0 %v2064_v8  ;;  %v1614_v27 = vmul.f32 %v2221_v32, %v1518_v50  ;;  %v1516_v57 = vsub.f32 %v3012_v62, %v3262_v5  ;;  %v3318_v63 = vmul.f32 0.0078125, %v1232_v25  ;;  %v1503_v54 = vsub.f32 %v2943_v16, %v3234_v60 }
 0x37c   :  { %v2223_v13 = vpop.eup %2222  ;;  %v1455_v29 = vsub.f32 %v1391_v31, %v1423_v22  ;;  %v1392_v17 = vmul.f32 0.0078125, %v1358_v51  ;;  %v1504_v36 = vsub.f32 %v2948_v7, %v3256_v59  ;;  %v1669_v62 = vadd.f32 %v3093_v28, %v1632_v52 }
 0x37d   :  { %v1200_v42 = vpop.xlane.xlu0 %1199  ;;  %v1611_v23 = vmul.f32 %v2223_v13, %v1515_v33  ;;  %v1651_v14 = vmul.f32 %v3085_v58, %v1614_v27  ;;  %v1650_v5 = vmul.f32 %v3085_v58, %v1613_v24  ;;  %v3328_v25 = vmul.f32 0.0078125, %v1234_v10 }
 0x37e   :  { %v2225_v43 = vpop.eup %2224  ;;  %v1487_v0 = vmax.f32 %v1455_v29, 0.0  ;;  %v1456_v53 = vsub.f32 %v1392_v17, %v1424_v47  ;;  %v1702_v41 = vmax.f32 %v1670_v3, 0.0  ;;  %v1425_v16 = vmul.f32 %v3318_v63, %v3318_v63 }
 0x37f   :  { %v1202_v12 = vpop.xlane.xlu1 %1201  ;;  %v1612_v15 = vmul.f32 %v2225_v43, %v1516_v57  ;;  %v1648_v18 = vmul.f32 %v3085_v58, %v1611_v23  ;;  %v1688_v49 = vadd.f32 %v3093_v28, %v1651_v14  ;;  %v3335_v26 = vmul.f32 0.0078125, %v1200_v42 }
 0x380   :  { %v1551_v40 = vadd.f32 1e-05, %v1487_v0  ;;  %v1488_v21 = vmax.f32 %v1456_v53, 0.0  ;;  %v3338_v10 = vmul.f32 0.0078125, %v1202_v12  ;;  %v1701_v9 = vmax.f32 %v1669_v62, 0.0 }
 0x381   :  { %v1360_v60 = vpop.xlane.xlu0 %1359  ;;  %v1649_v7 = vmul.f32 %v3085_v58, %v1612_v15  ;;  %v1685_v59 = vadd.f32 %v3093_v28, %v1648_v18  ;;  %v1687_v1 = vadd.f32 %v3093_v28, %v1650_v5  ;;  %v1426_v35 = vmul.f32 %v3328_v25, %v3328_v25 }
 0x382   :  { %2230 = vrsqrt.f32 %v1551_v40  ;;  %v1552_v38 = vadd.f32 1e-05, %v1488_v21  ;;  %v1393_v46 = vmul.f32 0.0078125, %v1360_v60  ;;  %2067 = vmatpush3.bf16.xpose.msra.mxu0 %v3128_v48  ;;  %v2227_v11 = vpop.eup %2226  ;;  %v2070_v50 = vpack.c.bf16 %v1702_v41, %v1701_v9 }
 0x383   :  { %v1362_v61 = vpop.xlane.xlu1 %1361  ;;  %v1686_v56 = vadd.f32 %v3093_v28, %v1649_v7  ;;  %v1717_v37 = vmax.f32 %v1685_v59, 0.0  ;;  %v1720_v48 = vmax.f32 %v1688_v49, 0.0  ;;  %v1409_v8 = vmul.f32 %v3335_v26, %v3335_v26  ;;  %v3407_v59 = vld [vmem:[#allocation6_spill] sm:$0xff] }
 0x384   :  { %2232 = vrsqrt.f32 %v1552_v38  ;;  %v1457_v20 = vsub.f32 %v1393_v46, %v1425_v16  ;;  %v1394_v30 = vmul.f32 0.0078125, %v1362_v61  ;;  %v2229_v55 = vpop.eup %2228  ;;  %v1410_v52 = vmul.f32 %v3338_v10, %v3338_v10 }
 0x385   :  { %v1328_v34 = vpop.xlane.xlu0 %1327  ;;  %v1718_v44 = vmax.f32 %v1686_v56, 0.0  ;;  %v1719_v3 = vmax.f32 %v1687_v1, 0.0  ;;  %v1600_v24 = vmul.f32 %v2227_v11, %v1504_v36  ;;  %v1599_v57 = vmul.f32 %v2229_v55, %v1503_v54  ;;  %v3408_v1 = vld [vmem:[#allocation7_spill] sm:$0xff] }
 0x386   :  { %v1489_v32 = vmax.f32 %v1457_v20, 0.0  ;;  %v1458_v22 = vsub.f32 %v1394_v30, %v1426_v35  ;;  %v1377_v31 = vmul.f32 0.0078125, %v1328_v34  ;;  %v1519_v43 = vsub.f32 %v3036_v6, %v3299_v19  ;;  %v3409_v30 = vld [vmem:[#allocation8_spill] sm:$0xff] }
 0x387   :  { %v1330_v33 = vpop.xlane.xlu1 %1329  ;;  %v2068_v51 = vpack.c.bf16 %v1718_v44, %v1717_v37  ;;  %v2072_v17 = vpack.c.bf16 %v1720_v48, %v1719_v3  ;;  %v1637_v12 = vmul.f32 %v3085_v58, %v1600_v24  ;;  %v1520_v15 = vsub.f32 %v3040_v45, %v3302_v4  ;;  %v3410_v24 = vld [vmem:[#allocation9_spill] sm:$0xff] }
 0x388   :  { %v1553_v27 = vadd.f32 1e-05, %v1489_v32  ;;  %v1490_v13 = vmax.f32 %v1458_v22, 0.0  ;;  %v1441_v47 = vsub.f32 %v1377_v31, %v1409_v8  ;;  %v1378_v29 = vmul.f32 0.0078125, %v1330_v33 }
 0x389   :  { %2069 = vmatprep.subr.bf16.mxu0 %v2068_v51  ;;  %v1636_v5 = vmul.f32 %v3085_v58, %v1599_v57  ;;  %v1674_v6 = vadd.f32 %v3093_v28, %v1637_v12  ;;  %v1521_v4 = vsub.f32 %v3029_v2, %v3318_v63  ;;  %v1522_v49 = vsub.f32 %v3407_v59, %v3328_v25 }
 0x38a   :  { %2234 = vrsqrt.f32 %v1553_v27  ;;  %v1554_v42 = vadd.f32 1e-05, %v1490_v13  ;;  %v1473_v23 = vmax.f32 %v1441_v47, 0.0  ;;  %v1442_v14 = vsub.f32 %v1378_v29, %v1410_v52  ;;  %2071 = vmatpush3.bf16.xpose.msra.mxu0 %v2070_v50 }
 0x38b   :  { %2073 = vmatprep.subr.bf16.mxu0 %v2072_v17  ;;  %v1673_v45 = vadd.f32 %v3093_v28, %v1636_v5  ;;  %v1706_v7 = vmax.f32 %v1674_v6, 0.0  ;;  %v1506_v34 = vsub.f32 %v3409_v30, %v3338_v10  ;;  %v1732_v27 = vlaneseq }
 0x38c   :  { %v2231_v0 = vpop.eup %2230  ;;  %2236 = vrsqrt.f32 %v1554_v42  ;;  %v1537_v53 = vadd.f32 1e-05, %v1473_v23  ;;  %v1474_v36 = vmax.f32 %v1442_v14, 0.0  ;;  %v2267_v17 = vmov 1966171168  }
 0x38d   :  { %v1615_v18 = vmul.f32 %v2231_v0, %v1519_v43  ;;  %v1705_v9 = vmax.f32 %v1673_v45, 0.0  ;;  %v1733_v13 = vshrl.u32 %v1732_v27, 7  ;;  %v1811_v57 = vunpack.c.l.s4 %v2267_v17 }
 0x38e   :  { %v2233_v54 = vpop.eup %2232  ;;  %2238 = vrsqrt.f32 %v1537_v53  ;;  %v1538_v62 = vadd.f32 1e-05, %v1474_v36  ;;  %vm1827_vm1 = vcmp.lt.s32.totalorder %v1732_v27, 256 }
 0x38f   :  { %v1616_v40 = vmul.f32 %v2233_v54, %v1520_v15  ;;  %v1652_v21 = vmul.f32 %v3085_v58, %v1615_v18  ;;  %v2078_v63 = vpack.c.bf16 %v1706_v7, %v1705_v9  ;;  %v1734_v47 = vsub.s32 0, %v1733_v13 }
 0x390   :  { %2240 = vrsqrt.f32 %v1538_v62 }
 0x391   :  { %v1653_v19 = vmul.f32 %v3085_v58, %v1616_v40  ;;  %v1689_v41 = vadd.f32 %v3093_v28, %v1652_v21 }
 0x392   :  { %2075 = vmatpush3.bf16.xpose.msra.mxu0 %v3150_v39  ;;  %v1505_v39 = vsub.f32 %v3408_v1, %v3335_v26 }
 0x393   :  { %v1690_v16 = vadd.f32 %v3093_v28, %v1653_v19  ;;  %v1721_v38 = vmax.f32 %v1689_v41, 0.0 }
 0x394   :  { %v2235_v60 = vpop.eup %2234 }
 0x395   :  { %v1722_v46 = vmax.f32 %v1690_v16, 0.0  ;;  %v1617_v61 = vmul.f32 %v2235_v60, %v1521_v4 }
 0x396   :  { %v2237_v56 = vpop.eup %2236 }
 0x397   :  { %v2076_v11 = vpack.c.bf16 %v1722_v46, %v1721_v38  ;;  %v1618_v35 = vmul.f32 %v2237_v56, %v1522_v49  ;;  %v1654_v20 = vmul.f32 %v3085_v58, %v1617_v61 }
 0x398   :  { %v2239_v2 = vpop.eup %2238 }
 0x399   :  { %2077 = vmatprep.subr.bf16.mxu0 %v2076_v11  ;;  %v1655_v25 = vmul.f32 %v3085_v58, %v1618_v35  ;;  %v1691_v37 = vadd.f32 %v3093_v28, %v1654_v20  ;;  %v1601_v44 = vmul.f32 %v2239_v2, %v1505_v39 }
 0x39a   :  { %v2241_v50 = vpop.eup %2240  ;;  %2079 = vmatpush3.bf16.xpose.msra.mxu0 %v2078_v63 }
 0x39b   :  { %v1692_v48 = vadd.f32 %v3093_v28, %v1655_v25  ;;  %v1602_v26 = vmul.f32 %v2241_v50, %v1506_v34  ;;  %v1638_v55 = vmul.f32 %v3085_v58, %v1601_v44  ;;  %v1723_v8 = vmax.f32 %v1691_v37, 0.0 }
 0x39d   :  { %v1724_v32 = vmax.f32 %v1692_v48, 0.0  ;;  %v1639_v22 = vmul.f32 %v3085_v58, %v1602_v26  ;;  %v1675_v31 = vadd.f32 %v3093_v28, %v1638_v55  ;;  %v1812_v58 = vunpack.c.0.s8 %v1811_v57 }
 0x39f   :  { %v2080_v10 = vpack.c.bf16 %v1724_v32, %v1723_v8  ;;  %v1676_v52 = vadd.f32 %v3093_v28, %v1639_v22  ;;  %v1707_v33 = vmax.f32 %v1675_v31, 0.0  ;;  %v1815_v28 = vsub.s32 %v1812_v58, %v1733_v13 }
 0x3a1   :  { %2081 = vmatprep.subr.bf16.mxu0 %v2080_v10  ;;  %v1708_v51 = vmax.f32 %v1676_v52, 0.0 }
 0x3a3   :  { %v2082_v3 = vpack.c.bf16 %v1708_v51, %v1707_v33 }
 0x3a5   :  { %2083 = vmatpush3.bf16.xpose.msra.mxu0 %v2082_v3 }
 0x3ac   :  { %1967 = vmatmul.mubr.f32.vlgmr.msra.gmra.mrb[32].mxu0 %v3410_v24 }
 0x3ad   :  { %v1730_v29 = vpop.permute.xlu0 %1729 }
 0x3ae   :  { %v1735_v42 = vrot.slane %v1730_v29, %v1734_v47 }
 0x47f   :  { %v1802_v23 = vpop.f32.mrb[32].mxu0 }
 0x480   :  { %v1803_v14 = vadd.f32 %v1802_v23, %v1735_v42  ;;  %v1804_v43 = vpop.f32.mrb[33].mxu0 }
 0x481   :  { %v1805_v0 = vadd.f32 %v1804_v43, %v1735_v42 }
 0x483   :  { %v1809_v53 = vcombine.low %v1803_v14, %v1805_v0 }
 0x485   :  { %v1816_v36 = vrot.slane %v1809_v53, %v1815_v28 }
 0x487   :  { %v1823_v12 = vrot.slane %v1816_v36, %v1815_v28 }
 0x489   :  { %1829 = vst.msk [vmem:[#allocation3] sm:$0x3] %vm1827_vm1, %v1823_v12 }
 0x48a   :  { %2253 = shalt.err (!%p2250_p4)
}
 0x48b   :  { %s2254_s11 = scalar_lea.hbm %s3396_s6, 32 }
 0x48c   :  { %p2255_p5 = scmp.ne.s32.totalorder %s3396_s6, %s2254_s11  ;;  %p2258_p6 = scmp.lt.u32.totalorder %s2254_s11, %s3396_s6 }
 0x48e   :  { %p2260_p7 = pnand %p2258_p6, %p2255_p5 }
 0x490   :  { %2263 = shalt.err (!%p2260_p7)
}
 0x491   :  { %1839 = dma.vmem_to_hbm [thread:$0]  %s1837_s8, 32, %s3396_s6, [#allocation4]  }
 0x492   :  { %2264 = dma.done.wait [#allocation4], 32  }
 0x493   :  { %2265 = vsyncadd [#allocation4], 4294967264 }
 0x494   :  { %1843 = vsyncpa [#allocation4], 1 }

</bundles_post_ra>
